<compile_context>
chip_gen: v6e
topology: v6e:2x2x1
jax: 0.10.0
libtpu: 0.0.40
codegen_flags: <defaults>
</compile_context>

<pallas_src>
import functools
import math

import numpy as np
import jax
import jax.numpy as jnp
from jax.experimental import pallas as pl
from jax.experimental.pallas import tpu as pltpu

MUP_ENABLED = True
_LN_EPS = 1e-6
_RMS_EPS = 1e-6
_SQRT_2_OVER_PI = 0.7978845608028654


def _gelu_tanh(x):
    # PyTorch nn.GELU(approximate='tanh')
    return 0.5 * x * (1.0 + jnp.tanh(_SQRT_2_OVER_PI * (x + 0.044715 * x * x * x)))


def _vmem_limit_bytes():
    """~75% of physical VMEM (per-generation); conservative fallback fits v7x."""
    try:
        return int(pltpu.get_tpu_info().vmem_capacity_bytes * 0.75)
    except Exception:
        return 48 * 1024 * 1024


def _pick_tile(total, want):
    """Pick a tile size that exactly divides `total` (fall back to the full
    extent, which is always BlockSpec-legal). `want` must be a multiple of 8
    (row tiles) / 128 (lane tiles)."""
    if total <= want or total % want != 0:
        return total
    return want


# ----------------------------------------------------------------------------
# K1: modulation (adaLN parameter projection), tiled over the output dim.
# ----------------------------------------------------------------------------
def _modulation_kernel(vec_ref, w_ref, b_ref, out_ref):
    v = vec_ref[...].astype(jnp.float32)
    s = v * jax.nn.sigmoid(v)
    out_ref[...] = (jnp.dot(s.astype(w_ref.dtype), w_ref[...],
                            preferred_element_type=jnp.float32)
                    + b_ref[...].astype(jnp.float32)).astype(out_ref.dtype)


def _modulation(vec, w, b, *, tile_n, vmem_limit):
    B, D = vec.shape
    O = w.shape[1]
    TN = _pick_tile(O, tile_n)
    return pl.pallas_call(
        _modulation_kernel,
        grid=(O // TN,),
        in_specs=[
            pl.BlockSpec((B, D), lambda n: (0, 0)),
            pl.BlockSpec((D, TN), lambda n: (0, n)),
            pl.BlockSpec((1, TN), lambda n: (0, n)),
        ],
        out_specs=pl.BlockSpec((B, TN), lambda n: (0, n)),
        out_shape=jax.ShapeDtypeStruct((B, O), jnp.float32),
        compiler_params=pltpu.CompilerParams(
            dimension_semantics=("parallel",),
            vmem_limit_bytes=vmem_limit),
    )(vec, w, b.reshape(1, -1))


# ----------------------------------------------------------------------------
# K2: LayerNorm -> modulate -> QKV linear, weight-tile axis outermost.
# ----------------------------------------------------------------------------
def _ln_mod_qkv_kernel(x_ref, scale_ref, shift_ref, w_ref, b_ref, out_ref):
    x = x_ref[...].astype(jnp.float32)                       # (TL, D)
    mu = jnp.mean(x, axis=-1, keepdims=True)
    xc = x - mu
    var = jnp.mean(xc * xc, axis=-1, keepdims=True)
    xn = xc * jax.lax.rsqrt(var + _LN_EPS)
    xm = (1.0 + scale_ref[...].astype(jnp.float32)) * xn + shift_ref[...].astype(jnp.float32)
    out_ref[...] = (jnp.dot(xm.astype(w_ref.dtype), w_ref[...],
                            preferred_element_type=jnp.float32)
                    + b_ref[...].astype(jnp.float32)).astype(out_ref.dtype)


def _ln_modulate_qkv(x, scale, shift, w, b, *, tile_rows, tile_n,
                     out_dtype, vmem_limit):
    B, L, D = x.shape
    O = w.shape[1]
    TL = _pick_tile(L, tile_rows)
    TN = _pick_tile(O, tile_n)
    # Weight-tile axis first (outermost loop): each (D, TN) weight block is
    # DMA'd once and only the small x row tiles are re-streamed per weight tile.
    grid = (O // TN, B, L // TL)
    return pl.pallas_call(
        _ln_mod_qkv_kernel,
        grid=grid,
        in_specs=[
            pl.BlockSpec((None, TL, D), lambda n, bb, ll: (bb, ll, 0)),
            pl.BlockSpec((None, 1, D), lambda n, bb, ll: (bb, 0, 0)),
            pl.BlockSpec((None, 1, D), lambda n, bb, ll: (bb, 0, 0)),
            pl.BlockSpec((D, TN), lambda n, bb, ll: (0, n)),
            pl.BlockSpec((1, TN), lambda n, bb, ll: (0, n)),
        ],
        out_specs=pl.BlockSpec((None, TL, TN), lambda n, bb, ll: (bb, ll, n)),
        out_shape=jax.ShapeDtypeStruct((B, L, O), out_dtype),
        compiler_params=pltpu.CompilerParams(
            dimension_semantics=("parallel", "parallel", "parallel"),
            vmem_limit_bytes=vmem_limit),
    )(x, scale.reshape(B, 1, D), shift.reshape(B, 1, D), w, b.reshape(1, -1))


# ----------------------------------------------------------------------------
# K3: flash attention (online softmax) with fused QK-RMSNorm + RoPE.
#     q/k arrive in per-head [even half | odd half] column layout (weight
#     columns permuted offline), so RoPE is two static half slices, one concat,
#     and a single full-depth QK^T contraction.
# ----------------------------------------------------------------------------
def _flash_attn_kernel(q_ref, k_ref, v_ref, cq_ref, sq_ref, ck_ref, sk_ref,
                       qs_ref, ks_ref, o_ref, m_sc, l_sc, acc_sc,
                       *, dh2, mup_scale):
    f32 = jnp.float32
    ki = pl.program_id(3)

    @pl.when(ki == 0)
    def _init():
        m_sc[...] = jnp.full_like(m_sc, -jnp.inf)
        l_sc[...] = jnp.zeros_like(l_sc)
        acc_sc[...] = jnp.zeros_like(acc_sc)

    q = q_ref[...].astype(f32)                               # (TQ, Dh)
    k = k_ref[...].astype(f32)                               # (TK, Dh)

    # QK-RMSNorm over the full head dim (f32), per-position learned scale
    # (scale arrays are pre-permuted to the half layout).
    q = q * jax.lax.rsqrt(jnp.mean(q * q, axis=-1, keepdims=True) + _RMS_EPS) * qs_ref[...]
    k = k * jax.lax.rsqrt(jnp.mean(k * k, axis=-1, keepdims=True) + _RMS_EPS) * ks_ref[...]

    # RoPE in half layout; fold mup scale into the rotated q (O(L*Dh) VPU work).
    cq, sq = cq_ref[...], sq_ref[...]
    q1, q2 = q[:, :dh2], q[:, dh2:]
    q = jnp.concatenate([q1 * cq - q2 * sq, q1 * sq + q2 * cq], axis=-1) * mup_scale
    ck, sk = ck_ref[...], sk_ref[...]
    k1, k2 = k[:, :dh2], k[:, dh2:]
    k = jnp.concatenate([k1 * ck - k2 * sk, k1 * sk + k2 * ck], axis=-1)

    # Single full-depth contraction: (TQ, Dh) . (TK, Dh)^T -> (TQ, TK)
    s = jax.lax.dot_general(q, k, (((1,), (1,)), ((), ())),
                            preferred_element_type=f32)

    m_prev = m_sc[...]
    m_new = jnp.maximum(m_prev, jnp.max(s, axis=-1, keepdims=True))
    alpha = jnp.exp(m_prev - m_new)
    p = jnp.exp(s - m_new)
    l_sc[...] = alpha * l_sc[...] + jnp.sum(p, axis=-1, keepdims=True)
    # bf16 MXU operands for PV, f32 accumulation.
    acc_sc[...] = alpha * acc_sc[...] + jnp.dot(
        p.astype(jnp.bfloat16), v_ref[...].astype(jnp.bfloat16),
        preferred_element_type=f32)
    m_sc[...] = m_new

    @pl.when(ki == pl.num_programs(3) - 1)
    def _finalize():
        o_ref[...] = (acc_sc[...] * pl.reciprocal(l_sc[...], approx=True)
                      ).astype(o_ref.dtype)


def _flash_attention(q, k, v, cos, sin, q_scale, k_scale, *,
                     tile_q, tile_kv, out_dtype, vmem_limit):
    B, H, L, Dh = q.shape
    Dh2 = Dh // 2
    scale = (8.0 / Dh) if MUP_ENABLED else 1.0 / math.sqrt(Dh)
    TQ = _pick_tile(L, tile_q)
    TK = _pick_tile(L, tile_kv)
    nq, nk = L // TQ, L // TK
    kernel = functools.partial(_flash_attn_kernel, dh2=Dh2, mup_scale=float(scale))

    q_spec = pl.BlockSpec((None, None, TQ, Dh), lambda b, h, qi, ki: (b, h, qi, 0))
    kv_spec = pl.BlockSpec((None, None, TK, Dh), lambda b, h, qi, ki: (b, h, ki, 0))
    cq_spec = pl.BlockSpec((TQ, Dh2), lambda b, h, qi, ki: (qi, 0))
    ck_spec = pl.BlockSpec((TK, Dh2), lambda b, h, qi, ki: (ki, 0))
    qs_spec = pl.BlockSpec((TQ, Dh), lambda b, h, qi, ki: (qi, 0))
    ks_spec = pl.BlockSpec((TK, Dh), lambda b, h, qi, ki: (ki, 0))
    o_spec = pl.BlockSpec((None, None, TQ, Dh), lambda b, h, qi, ki: (b, h, qi, 0))

    flops = int(4 * B * H * L * L * Dh)                      # QK^T + PV
    transcendentals = int(2 * B * H * L * L)                 # exp (p + alpha)
    bytes_accessed = int((q.size + (k.size + v.size) * nq) * q.dtype.itemsize
                         + B * H * L * Dh * jnp.dtype(out_dtype).itemsize)

    return pl.pallas_call(
        kernel,
        grid=(B, H, nq, nk),
        in_specs=[q_spec, kv_spec, kv_spec,
                  cq_spec, cq_spec, ck_spec, ck_spec,
                  qs_spec, ks_spec],
        out_specs=o_spec,
        out_shape=jax.ShapeDtypeStruct((B, H, L, Dh), out_dtype),
        scratch_shapes=[pltpu.VMEM((TQ, 1), jnp.float32),
                        pltpu.VMEM((TQ, 1), jnp.float32),
                        pltpu.VMEM((TQ, Dh), jnp.float32)],
        compiler_params=pltpu.CompilerParams(
            dimension_semantics=("parallel", "parallel", "parallel", "arbitrary"),
            vmem_limit_bytes=vmem_limit),
        cost_estimate=pl.CostEstimate(flops=flops,
                                      transcendentals=transcendentals,
                                      bytes_accessed=bytes_accessed),
    )(q, k, v, cos, sin, cos, sin, q_scale, k_scale)


# ----------------------------------------------------------------------------
# K4: proj + gated residual + LN2 + modulate + MLP + gated residual,
#     MLP hidden dim tiled as the last ("arbitrary") grid axis.
# ----------------------------------------------------------------------------
def _post_kernel(x_ref, attn_ref, g1_ref, sc2_ref, sh2_ref, g2_ref,
                 wp_ref, bp_ref, w1_ref, b1_ref, w2_ref, b2_ref,
                 out_ref, xres_sc, h_sc, acc_sc):
    f32 = jnp.float32
    dm = pl.program_id(2)

    @pl.when(dm == 0)
    def _init():
        a = attn_ref[...]
        proj = (jnp.dot(a.astype(wp_ref.dtype), wp_ref[...],
                        preferred_element_type=f32)
                + bp_ref[...].astype(f32))
        xres = x_ref[...].astype(f32) + g1_ref[...].astype(f32) * proj
        mu = jnp.mean(xres, axis=-1, keepdims=True)
        xc = xres - mu
        var = jnp.mean(xc * xc, axis=-1, keepdims=True)
        xn = xc * jax.lax.rsqrt(var + _LN_EPS)
        xres_sc[...] = xres
        h_sc[...] = (1.0 + sc2_ref[...].astype(f32)) * xn + sh2_ref[...].astype(f32)
        acc_sc[...] = jnp.zeros_like(acc_sc)

    h = h_sc[...]
    t = (jnp.dot(h.astype(w1_ref.dtype), w1_ref[...], preferred_element_type=f32)
         + b1_ref[...].astype(f32))
    g = _gelu_tanh(t)
    acc_sc[...] += jnp.dot(g.astype(w2_ref.dtype), w2_ref[...],
                           preferred_element_type=f32)

    @pl.when(dm == pl.num_programs(2) - 1)
    def _finalize():
        out_ref[...] = (xres_sc[...]
                        + g2_ref[...].astype(f32)
                        * (acc_sc[...] + b2_ref[...].astype(f32))).astype(out_ref.dtype)


def _post_stream(x, attn, gate1, scale2, shift2, gate2,
                 wp, bp, w1, b1, w2, b2, *, tile_rows, tile_dm, vmem_limit):
    B, L, D = x.shape
    Dm = w1.shape[1]
    TL = _pick_tile(L, tile_rows)
    TD = _pick_tile(Dm, tile_dm)
    grid = (B, L // TL, Dm // TD)            # Dm axis last + "arbitrary"
    row_sp = pl.BlockSpec((None, TL, D), lambda b, l, m: (b, l, 0))
    mod_sp = pl.BlockSpec((None, 1, D), lambda b, l, m: (b, 0, 0))
    return pl.pallas_call(
        _post_kernel,
        grid=grid,
        in_specs=[row_sp, row_sp, mod_sp, mod_sp, mod_sp, mod_sp,
                  pl.BlockSpec((D, D), lambda b, l, m: (0, 0)),
                  pl.BlockSpec((1, D), lambda b, l, m: (0, 0)),
                  pl.BlockSpec((D, TD), lambda b, l, m: (0, m)),
                  pl.BlockSpec((1, TD), lambda b, l, m: (0, m)),
                  pl.BlockSpec((TD, D), lambda b, l, m: (m, 0)),
                  pl.BlockSpec((1, D), lambda b, l, m: (0, 0))],
        out_specs=row_sp,
        out_shape=jax.ShapeDtypeStruct((B, L, D), x.dtype),
        scratch_shapes=[pltpu.VMEM((TL, D), jnp.float32),
                        pltpu.VMEM((TL, D), jnp.float32),
                        pltpu.VMEM((TL, D), jnp.float32)],
        compiler_params=pltpu.CompilerParams(
            dimension_semantics=("parallel", "parallel", "arbitrary"),
            vmem_limit_bytes=vmem_limit),
    )(x, attn,
      gate1.reshape(B, 1, D), scale2.reshape(B, 1, D),
      shift2.reshape(B, 1, D), gate2.reshape(B, 1, D),
      wp, bp.reshape(1, -1), w1, b1.reshape(1, -1), w2, b2.reshape(1, -1))


# ----------------------------------------------------------------------------
# Full DoubleStreamBlock forward.
# ----------------------------------------------------------------------------
def double_stream_block(img, txt, vec, pe, params, *, num_heads,
                        tile_rows=256, tile_n=1536, tile_dm=1024,
                        tile_q=256, tile_kv=512):
    """Matches DoubleStreamBlock.forward(img, txt, vec, pe) with vec provided.

    Weights are in (in_features, out_features) layout (== PyTorch weight.T).
    pe = (pe_single, pe_double); pe_double: (1, 1, L_txt+L_img, Dh//2, 2, 2).
    """
    B, L_img, D = img.shape
    L_txt = txt.shape[1]
    H = num_heads
    assert D % H == 0
    Dh = D // H
    assert Dh % 2 == 0
    L = L_txt + L_img
    bf = jnp.bfloat16
    vmem_limit = _vmem_limit_bytes()

    # --- cos/sin straight from pe_double ([[cos,-sin],[sin,cos]] layout);
    #     the 2x2 matrices are never materialized in the hot path.
    _, pe_double = pe
    pe_d = jnp.asarray(pe_double, jnp.float32)[0, 0]          # (L, Dh/2, 2, 2)
    cos = pe_d[..., 0, 0]                                     # (L, Dh/2)
    sin = pe_d[..., 1, 0]                                     # (L, Dh/2)

    # --- offline column permutation: within each head, q/k columns reordered
    #     to [even indices | odd indices] so RoPE pairs are contiguous halves.
    half = np.arange(0, Dh, 2)
    head_perm = np.concatenate([half, half + 1])              # (Dh,)
    qk_perm = (np.arange(H)[:, None] * Dh + head_perm[None, :]).reshape(-1)
    full_perm = jnp.asarray(np.concatenate([qk_perm, D + qk_perm,
                                            2 * D + np.arange(D)]))
    head_perm_j = jnp.asarray(head_perm)

    def prep_qkv_wb(w, b):
        return (jnp.take(w, full_perm, axis=1).astype(bf),
                jnp.take(b, full_perm, axis=0))

    img_qkv_w, img_qkv_b = prep_qkv_wb(params["img_qkv_w"], params["img_qkv_b"])
    txt_qkv_w, txt_qkv_b = prep_qkv_wb(params["txt_qkv_w"], params["txt_qkv_b"])

    # --- K1: modulation (adaLN params) per stream
    img_mod = _modulation(vec, params["img_mod_w"].astype(bf), params["img_mod_b"],
                          tile_n=tile_n, vmem_limit=vmem_limit)
    txt_mod = _modulation(vec, params["txt_mod_w"].astype(bf), params["txt_mod_b"],
                          tile_n=tile_n, vmem_limit=vmem_limit)
    i_sh1, i_sc1, i_g1, i_sh2, i_sc2, i_g2 = jnp.split(img_mod, 6, axis=-1)
    t_sh1, t_sc1, t_g1, t_sh2, t_sc2, t_g2 = jnp.split(txt_mod, 6, axis=-1)

    # --- K2: LN1 + modulate + QKV projection (bf16 lane-dense slab out)
    img_qkv = _ln_modulate_qkv(img, i_sc1, i_sh1, img_qkv_w, img_qkv_b,
                               tile_rows=tile_rows, tile_n=tile_n,
                               out_dtype=bf, vmem_limit=vmem_limit)
    txt_qkv = _ln_modulate_qkv(txt, t_sc1, t_sh1, txt_qkv_w, txt_qkv_b,
                               tile_rows=tile_rows, tile_n=tile_n,
                               out_dtype=bf, vmem_limit=vmem_limit)

    # --- XLA layout plumbing: head split + txt|img concat (bf16 traffic).
    def split_heads(qkv, Lx):
        r = qkv.reshape(B, Lx, 3, H, Dh)
        return (jnp.transpose(r[:, :, 0], (0, 2, 1, 3)),
                jnp.transpose(r[:, :, 1], (0, 2, 1, 3)),
                jnp.transpose(r[:, :, 2], (0, 2, 1, 3)))

    tq, tk, tv = split_heads(txt_qkv, L_txt)
    iq, ik, iv = split_heads(img_qkv, L_img)
    q = jnp.concatenate([tq, iq], axis=2)                     # (B, H, L, Dh)
    k = jnp.concatenate([tk, ik], axis=2)
    v = jnp.concatenate([tv, iv], axis=2)

    # per-position RMSNorm scales in the permuted half layout (txt rows then img rows)
    def per_pos(scale_txt, scale_img):
        ts = jnp.take(scale_txt, head_perm_j, axis=0)
        im = jnp.take(scale_img, head_perm_j, axis=0)
        return jnp.concatenate(
            [jnp.broadcast_to(ts, (L_txt, Dh)),
             jnp.broadcast_to(im, (L_img, Dh))], axis=0).astype(jnp.float32)

    q_scale = per_pos(params["txt_q_scale"], params["img_q_scale"])
    k_scale = per_pos(params["txt_k_scale"], params["img_k_scale"])

    # --- K3: flash attention over the joint sequence
    attn = _flash_attention(q, k, v, cos, sin, q_scale, k_scale,
                            tile_q=tile_q, tile_kv=tile_kv,
                            out_dtype=bf, vmem_limit=vmem_limit)
    attn = jnp.transpose(attn, (0, 2, 1, 3)).reshape(B, L, D)
    txt_attn, img_attn = attn[:, :L_txt], attn[:, L_txt:]

    # --- K4: proj + gated residual + LN2 + modulate + MLP + gated residual
    img_out = _post_stream(img, img_attn, i_g1, i_sc2, i_sh2, i_g2,
                           params["img_proj_w"].astype(bf), params["img_proj_b"],
                           params["img_mlp_w1"].astype(bf), params["img_mlp_b1"],
                           params["img_mlp_w2"].astype(bf), params["img_mlp_b2"],
                           tile_rows=tile_rows, tile_dm=tile_dm,
                           vmem_limit=vmem_limit)
    txt_out = _post_stream(txt, txt_attn, t_g1, t_sc2, t_sh2, t_g2,
                           params["txt_proj_w"].astype(bf), params["txt_proj_b"],
                           params["txt_mlp_w1"].astype(bf), params["txt_mlp_b1"],
                           params["txt_mlp_w2"].astype(bf), params["txt_mlp_b2"],
                           tile_rows=tile_rows, tile_dm=tile_dm,
                           vmem_limit=vmem_limit)
    return img_out, txt_out


# ----------------------------------------------------------------------------
# Pure-JAX f32 reference (mirrors the PyTorch module, same params).
# ----------------------------------------------------------------------------
def _reference_forward(img, txt, vec, pe, params, *, num_heads):
    B, L_img, D = img.shape
    L_txt = txt.shape[1]
    H = num_heads
    Dh = D // H
    _, pe_double = pe
    hp = jax.lax.Precision.HIGHEST

    def silu(x):
        return x * jax.nn.sigmoid(x)

    def linear(x, w, b):
        return jnp.einsum("...i,io->...o", x, w, precision=hp) + b

    def layer_norm(x):
        mu = jnp.mean(x, -1, keepdims=True)
        var = jnp.mean((x - mu) ** 2, -1, keepdims=True)
        return (x - mu) * jax.lax.rsqrt(var + _LN_EPS)

    def rms_norm(x, scale):
        rr = jax.lax.rsqrt(jnp.mean(x * x, -1, keepdims=True) + _RMS_EPS)
        return x * rr * scale

    def modulation(w, b):
        p = linear(silu(vec), w, b)[:, None, :]
        return jnp.split(p, 6, axis=-1)

    def apply_rope_ref(xq, xk, freqs):
        def rope(x):
            x_ = x.reshape(*x.shape[:-1], -1, 1, 2)
            out = freqs[..., 0] * x_[..., 0] + freqs[..., 1] * x_[..., 1]
            return out.reshape(x.shape)
        return rope(xq), rope(xk)

    def prepare(x, sc, sh, qkv_w, qkv_b, qs, ks):
        xm = (1.0 + sc) * layer_norm(x) + sh
        qkv = linear(xm, qkv_w, qkv_b)
        r = qkv.reshape(B, x.shape[1], 3, H, Dh)
        q = jnp.transpose(r[:, :, 0], (0, 2, 1, 3))
        k = jnp.transpose(r[:, :, 1], (0, 2, 1, 3))
        v = jnp.transpose(r[:, :, 2], (0, 2, 1, 3))
        return rms_norm(q, qs), rms_norm(k, ks), v

    i_sh1, i_sc1, i_g1, i_sh2, i_sc2, i_g2 = modulation(params["img_mod_w"], params["img_mod_b"])
    t_sh1, t_sc1, t_g1, t_sh2, t_sc2, t_g2 = modulation(params["txt_mod_w"], params["txt_mod_b"])

    iq, ik, iv = prepare(img, i_sc1, i_sh1, params["img_qkv_w"], params["img_qkv_b"],
                         params["img_q_scale"], params["img_k_scale"])
    tq, tk, tv = prepare(txt, t_sc1, t_sh1, params["txt_qkv_w"], params["txt_qkv_b"],
                         params["txt_q_scale"], params["txt_k_scale"])
    q = jnp.concatenate([tq, iq], axis=2)
    k = jnp.concatenate([tk, ik], axis=2)
    v = jnp.concatenate([tv, iv], axis=2)

    q, k = apply_rope_ref(q, k, jnp.asarray(pe_double, jnp.float32))
    scale = (8.0 / Dh) if MUP_ENABLED else 1.0 / math.sqrt(Dh)
    s = jnp.einsum("bhqd,bhkd->bhqk", q, k, precision=hp) * scale
    p = jax.nn.softmax(s, axis=-1)
    o = jnp.einsum("bhqk,bhkd->bhqd", p, v, precision=hp)
    attn = jnp.transpose(o, (0, 2, 1, 3)).reshape(B, L_txt + L_img, D)
    txt_a, img_a = attn[:, :L_txt], attn[:, L_txt:]

    def post(x, a, g1, sc2, sh2, g2, pw, pb, w1, b1, w2, b2):
        x = x + g1 * linear(a, pw, pb)
        h = (1.0 + sc2) * layer_norm(x) + sh2
        h = _gelu_tanh(linear(h, w1, b1))
        return x + g2 * linear(h, w2, b2)

    img_o = post(img, img_a, i_g1, i_sc2, i_sh2, i_g2,
                 params["img_proj_w"], params["img_proj_b"],
                 params["img_mlp_w1"], params["img_mlp_b1"],
                 params["img_mlp_w2"], params["img_mlp_b2"])
    txt_o = post(txt, txt_a, t_g1, t_sc2, t_sh2, t_g2,
                 params["txt_proj_w"], params["txt_proj_b"],
                 params["txt_mlp_w1"], params["txt_mlp_b1"],
                 params["txt_mlp_w2"], params["txt_mlp_b2"])
    return img_o, txt_o


def _make_pe(L, head_dim, theta=10000.0):
    """EmbedND-style RoPE matrices for one position axis: (1,1,L,head_dim/2,2,2)."""
    d_half = head_dim // 2
    pos = jnp.arange(L, dtype=jnp.float32)
    scale = jnp.arange(0, head_dim, 2, dtype=jnp.float32) / head_dim
    omega = 1.0 / (theta ** scale)
    ang = pos[:, None] * omega[None, :]
    cos, sin = jnp.cos(ang), jnp.sin(ang)
    mat = jnp.stack([cos, -sin, sin, cos], axis=-1).reshape(L, d_half, 2, 2)
    return mat[None, None]


# ----------------------------------------------------------------------------
if __name__ == "__main__":
    B = 2
    hidden = 64
    num_heads = 4
    head_dim = hidden // num_heads            # 16
    mlp_hidden = int(hidden * 4.0)            # 256
    L_txt, L_img = 8, 24
    L = L_txt + L_img                         # 32

    key = jax.random.PRNGKey(0)
    keys = iter(jax.random.split(key, 40))

    def nrm(shape, s=0.1):
        return jax.random.normal(next(keys), shape, jnp.float32) * s

    # Weights in (in, out) layout == PyTorch Linear weight.T (same forward math).
    params = {
        "img_mod_w": nrm((hidden, 6 * hidden)), "img_mod_b": nrm((6 * hidden,)),
        "txt_mod_w": nrm((hidden, 6 * hidden)), "txt_mod_b": nrm((6 * hidden,)),
        "img_qkv_w": nrm((hidden, 3 * hidden)), "img_qkv_b": nrm((3 * hidden,)),
        "txt_qkv_w": nrm((hidden, 3 * hidden)), "txt_qkv_b": nrm((3 * hidden,)),
        "img_q_scale": 1.0 + nrm((head_dim,)), "img_k_scale": 1.0 + nrm((head_dim,)),
        "txt_q_scale": 1.0 + nrm((head_dim,)), "txt_k_scale": 1.0 + nrm((head_dim,)),
        "img_proj_w": nrm((hidden, hidden)), "img_proj_b": nrm((hidden,)),
        "txt_proj_w": nrm((hidden, hidden)), "txt_proj_b": nrm((hidden,)),
        "img_mlp_w1": nrm((hidden, mlp_hidden)), "img_mlp_b1": nrm((mlp_hidden,)),
        "img_mlp_w2": nrm((mlp_hidden, hidden)), "img_mlp_b2": nrm((hidden,)),
        "txt_mlp_w1": nrm((hidden, mlp_hidden)), "txt_mlp_b1": nrm((mlp_hidden,)),
        "txt_mlp_w2": nrm((mlp_hidden, hidden)), "txt_mlp_b2": nrm((hidden,)),
    }

    img = nrm((B, L_img, hidden), 1.0)
    txt = nrm((B, L_txt, hidden), 1.0)
    vec = nrm((B, hidden), 1.0)
    pe = (None, _make_pe(L, head_dim))        # (pe_single, pe_double)

    # Small tiles at toy shapes so the flash KV loop, the MLP hidden-dim
    # accumulation loop, and the K1 weight-tile loop are all actually exercised.
    fwd = jax.jit(functools.partial(
        double_stream_block, num_heads=num_heads,
        tile_rows=8, tile_n=128, tile_dm=128, tile_q=8, tile_kv=8))

    img_out, txt_out = fwd(img, txt, vec, pe, params)
    img_out, txt_out = jax.block_until_ready((img_out, txt_out))

    assert img_out.shape == (B, L_img, hidden), img_out.shape
    assert txt_out.shape == (B, L_txt, hidden), txt_out.shape
    assert bool(jnp.all(jnp.isfinite(img_out))) and bool(jnp.all(jnp.isfinite(txt_out)))

    ref_img, ref_txt = _reference_forward(img, txt, vec, pe, params, num_heads=num_heads)
    # bf16 weights / activations in the Pallas path -> slightly loosened tolerance.
    np.testing.assert_allclose(np.asarray(img_out), np.asarray(ref_img), atol=2e-2, rtol=2e-2)
    np.testing.assert_allclose(np.asarray(txt_out), np.asarray(ref_txt), atol=2e-2, rtol=2e-2)

    print("KERNEL_OK")
</pallas_src>

<mosaic_0001>
module attributes {stable_mosaic.version = 11 : i64} {
  func.func @_modulation_kernel(%arg0: i32, %arg1: memref<2x64xf32, #tpu.memory_space<vmem>>, %arg2: memref<64x128xbf16, #tpu.memory_space<vmem>>, %arg3: memref<1x128xf32, #tpu.memory_space<vmem>>, %arg4: memref<2x128xf32, #tpu.memory_space<vmem>>) attributes {dimension_semantics = [#tpu.dimension_semantics<parallel>], iteration_bounds = array<i64: 3>, scalar_prefetch = 0 : i64, scratch_operands = 0 : i64, tpu.core_type = #tpu.core_type<tc>, window_params = [{pipeline_mode = #tpu.pipeline_mode<synchronous>, transform_indices = @transform_0, window_bounds = array<i64: 2, 64>}, {transform_indices = @transform_1, window_bounds = array<i64: 64, 128>}, {transform_indices = @transform_2, window_bounds = array<i64: 1, 128>}, {transform_indices = @transform_3, window_bounds = array<i64: 2, 128>}]} {
    %c0 = arith.constant 0 : index
    %c0_0 = arith.constant 0 : index
    %0 = vector.load %arg1[%c0, %c0_0] : memref<2x64xf32, #tpu.memory_space<vmem>>, vector<2x64xf32>
    %1 = arith.negf %0 : vector<2x64xf32>
    %2 = math.exp %1 : vector<2x64xf32>
    %cst = arith.constant 1.000000e+00 : f32
    %3 = vector.broadcast %cst : f32 to vector<2x64xf32>
    %4 = arith.addf %3, %2 : vector<2x64xf32>
    %5 = arith.divf %3, %4 : vector<2x64xf32>
    %6 = arith.mulf %0, %5 : vector<2x64xf32>
    %7 = arith.truncf %6 : vector<2x64xf32> to vector<2x64xbf16>
    %c0_1 = arith.constant 0 : index
    %c0_2 = arith.constant 0 : index
    %8 = vector.load %arg2[%c0_1, %c0_2] : memref<64x128xbf16, #tpu.memory_space<vmem>>, vector<64x128xbf16>
    %cst_3 = arith.constant dense<0.000000e+00> : vector<2x128xf32>
    %9 = tpu.matmul %7, %8, %cst_3 {dimension_numbers = #tpu.dot_dimension_numbers<[1], [0], [0], [1], [0, 0, 1, 1], [], []>} : vector<2x64xbf16>, vector<64x128xbf16>, vector<2x128xf32> -> vector<2x128xf32>
    %c0_4 = arith.constant 0 : index
    %c0_5 = arith.constant 0 : index
    %10 = vector.load %arg3[%c0_4, %c0_5] : memref<1x128xf32, #tpu.memory_space<vmem>>, vector<1x128xf32>
    %11 = vector.broadcast %10 : vector<1x128xf32> to vector<2x128xf32>
    %12 = arith.addf %9, %11 : vector<2x128xf32>
    %c0_6 = arith.constant 0 : index
    %c0_7 = arith.constant 0 : index
    %13 = vector.load %arg4[%c0_6, %c0_7] : memref<2x128xf32, #tpu.memory_space<vmem>>, vector<2x128xf32>
    tpu.vector_store %arg4[%c0_6, %c0_7], %12 {strides = array<i32>} : memref<2x128xf32, #tpu.memory_space<vmem>>, vector<2x128xf32>,
    return
  }
  func.func @transform_0(%arg0: i32) -> (i32, i32) {
    %c0_i32 = arith.constant 0 : i32
    %c0_i32_0 = arith.constant 0 : i32
    %c0_i32_1 = arith.constant 0 : i32
    return %c0_i32, %c0_i32_0 : i32, i32
  }
  func.func @transform_1(%arg0: i32) -> (i32, i32) {
    %c0_i32 = arith.constant 0 : i32
    %c0_i32_0 = arith.constant 0 : i32
    return %c0_i32, %arg0 : i32, i32
  }
  func.func @transform_2(%arg0: i32) -> (i32, i32) {
    %c0_i32 = arith.constant 0 : i32
    %c0_i32_0 = arith.constant 0 : i32
    return %c0_i32, %arg0 : i32, i32
  }
  func.func @transform_3(%arg0: i32) -> (i32, i32) {
    %c0_i32 = arith.constant 0 : i32
    %c0_i32_0 = arith.constant 0 : i32
    return %c0_i32, %arg0 : i32, i32
  }
}

module attributes {stable_mosaic.version = 11 : i64} {
  func.func @_ln_mod_qkv_kernel(%arg0: i32, %arg1: i32, %arg2: i32, %arg3: memref<1x8x64xf32, #tpu.memory_space<vmem>>, %arg4: memref<1x1x64xf32, #tpu.memory_space<vmem>>, %arg5: memref<1x1x64xf32, #tpu.memory_space<vmem>>, %arg6: memref<64x192xbf16, #tpu.memory_space<vmem>>, %arg7: memref<1x192xf32, #tpu.memory_space<vmem>>, %arg8: memref<1x8x192xbf16, #tpu.memory_space<vmem>>) attributes {dimension_semantics = [#tpu.dimension_semantics<parallel>, #tpu.dimension_semantics<parallel>, #tpu.dimension_semantics<parallel>], iteration_bounds = array<i64: 1, 2, 3>, scalar_prefetch = 0 : i64, scratch_operands = 0 : i64, tpu.core_type = #tpu.core_type<tc>, window_params = [{transform_indices = @transform_0, window_bounds = array<i64: 1, 8, 64>}, {transform_indices = @transform_1, window_bounds = array<i64: 1, 1, 64>}, {transform_indices = @transform_2, window_bounds = array<i64: 1, 1, 64>}, {transform_indices = @transform_3, window_bounds = array<i64: 64, 192>}, {transform_indices = @transform_4, window_bounds = array<i64: 1, 192>}, {transform_indices = @transform_5, window_bounds = array<i64: 1, 8, 192>}]} {
    %c0 = arith.constant 0 : index
    %c0_0 = arith.constant 0 : index
    %c0_1 = arith.constant 0 : index
    %0 = vector.load %arg3[%c0, %c0_0, %c0_1] : memref<1x8x64xf32, #tpu.memory_space<vmem>>, vector<1x8x64xf32>
    %1 = vector.shape_cast %0 : vector<1x8x64xf32> to vector<8x64xf32>
    %cst = arith.constant dense<0.000000e+00> : vector<8xf32>
    %2 = vector.multi_reduction <add>, %1, %cst [1] : vector<8x64xf32> to vector<8xf32>
    %3 = vector.shape_cast %2 : vector<8xf32> to vector<8x1xf32>
    %cst_2 = arith.constant 6.400000e+01 : f32
    %4 = vector.broadcast %cst_2 : f32 to vector<8x1xf32>
    %5 = arith.divf %3, %4 : vector<8x1xf32>
    %6 = vector.broadcast %5 : vector<8x1xf32> to vector<8x64xf32>
    %7 = arith.subf %1, %6 : vector<8x64xf32>
    %8 = arith.mulf %7, %7 : vector<8x64xf32>
    %cst_3 = arith.constant dense<0.000000e+00> : vector<8xf32>
    %9 = vector.multi_reduction <add>, %8, %cst_3 [1] : vector<8x64xf32> to vector<8xf32>
    %10 = vector.shape_cast %9 : vector<8xf32> to vector<8x1xf32>
    %cst_4 = arith.constant 6.400000e+01 : f32
    %11 = vector.broadcast %cst_4 : f32 to vector<8x1xf32>
    %12 = arith.divf %10, %11 : vector<8x1xf32>
    %cst_5 = arith.constant 9.99999997E-7 : f32
    %13 = vector.broadcast %cst_5 : f32 to vector<8x1xf32>
    %14 = arith.addf %12, %13 : vector<8x1xf32>
    %15 = math.rsqrt %14 : vector<8x1xf32>
    %16 = vector.broadcast %15 : vector<8x1xf32> to vector<8x64xf32>
    %17 = arith.mulf %7, %16 : vector<8x64xf32>
    %c0_6 = arith.constant 0 : index
    %c0_7 = arith.constant 0 : index
    %c0_8 = arith.constant 0 : index
    %18 = vector.load %arg4[%c0_6, %c0_7, %c0_8] : memref<1x1x64xf32, #tpu.memory_space<vmem>>, vector<1x1x64xf32>
    %19 = vector.shape_cast %18 : vector<1x1x64xf32> to vector<1x64xf32>
    %cst_9 = arith.constant 1.000000e+00 : f32
    %20 = vector.broadcast %cst_9 : f32 to vector<1x64xf32>
    %21 = arith.addf %20, %19 : vector<1x64xf32>
    %22 = vector.broadcast %21 : vector<1x64xf32> to vector<8x64xf32>
    %23 = arith.mulf %22, %17 : vector<8x64xf32>
    %c0_10 = arith.constant 0 : index
    %c0_11 = arith.constant 0 : index
    %c0_12 = arith.constant 0 : index
    %24 = vector.load %arg5[%c0_10, %c0_11, %c0_12] : memref<1x1x64xf32, #tpu.memory_space<vmem>>, vector<1x1x64xf32>
    %25 = vector.shape_cast %24 : vector<1x1x64xf32> to vector<1x64xf32>
    %26 = vector.broadcast %25 : vector<1x64xf32> to vector<8x64xf32>
    %27 = arith.addf %23, %26 : vector<8x64xf32>
    %28 = arith.truncf %27 : vector<8x64xf32> to vector<8x64xbf16>
    %c0_13 = arith.constant 0 : index
    %c0_14 = arith.constant 0 : index
    %29 = vector.load %arg6[%c0_13, %c0_14] : memref<64x192xbf16, #tpu.memory_space<vmem>>, vector<64x192xbf16>
    %cst_15 = arith.constant dense<0.000000e+00> : vector<8x192xf32>
    %30 = tpu.matmul %28, %29, %cst_15 {dimension_numbers = #tpu.dot_dimension_numbers<[1], [0], [0], [1], [0, 0, 1, 1], [], []>} : vector<8x64xbf16>, vector<64x192xbf16>, vector<8x192xf32> -> vector<8x192xf32>
    %c0_16 = arith.constant 0 : index
    %c0_17 = arith.constant 0 : index
    %31 = vector.load %arg7[%c0_16, %c0_17] : memref<1x192xf32, #tpu.memory_space<vmem>>, vector<1x192xf32>
    %32 = vector.broadcast %31 : vector<1x192xf32> to vector<8x192xf32>
    %33 = arith.addf %30, %32 : vector<8x192xf32>
    %34 = arith.truncf %33 : vector<8x192xf32> to vector<8x192xbf16>
    %c0_18 = arith.constant 0 : index
    %c0_19 = arith.constant 0 : index
    %c0_20 = arith.constant 0 : index
    %35 = vector.load %arg8[%c0_18, %c0_19, %c0_20] : memref<1x8x192xbf16, #tpu.memory_space<vmem>>, vector<1x8x192xbf16>
    %36 = vector.shape_cast %35 : vector<1x8x192xbf16> to vector<8x192xbf16>
    %37 = vector.shape_cast %34 : vector<8x192xbf16> to vector<1x8x192xbf16>
    tpu.vector_store %arg8[%c0_18, %c0_19, %c0_20], %37 {strides = array<i32>} : memref<1x8x192xbf16, #tpu.memory_space<vmem>>, vector<1x8x192xbf16>,
    return
  }
  func.func @transform_0(%arg0: i32, %arg1: i32, %arg2: i32) -> (i32, i32, i32) {
    %c0_i32 = arith.constant 0 : i32
    %c0_i32_0 = arith.constant 0 : i32
    return %arg1, %arg2, %c0_i32 : i32, i32, i32
  }
  func.func @transform_1(%arg0: i32, %arg1: i32, %arg2: i32) -> (i32, i32, i32) {
    %c0_i32 = arith.constant 0 : i32
    %c0_i32_0 = arith.constant 0 : i32
    %c0_i32_1 = arith.constant 0 : i32
    return %arg1, %c0_i32, %c0_i32_0 : i32, i32, i32
  }
  func.func @transform_2(%arg0: i32, %arg1: i32, %arg2: i32) -> (i32, i32, i32) {
    %c0_i32 = arith.constant 0 : i32
    %c0_i32_0 = arith.constant 0 : i32
    %c0_i32_1 = arith.constant 0 : i32
    return %arg1, %c0_i32, %c0_i32_0 : i32, i32, i32
  }
  func.func @transform_3(%arg0: i32, %arg1: i32, %arg2: i32) -> (i32, i32) {
    %c0_i32 = arith.constant 0 : i32
    %c0_i32_0 = arith.constant 0 : i32
    return %c0_i32, %arg0 : i32, i32
  }
  func.func @transform_4(%arg0: i32, %arg1: i32, %arg2: i32) -> (i32, i32) {
    %c0_i32 = arith.constant 0 : i32
    %c0_i32_0 = arith.constant 0 : i32
    return %c0_i32, %arg0 : i32, i32
  }
  func.func @transform_5(%arg0: i32, %arg1: i32, %arg2: i32) -> (i32, i32, i32) {
    %c0_i32 = arith.constant 0 : i32
    return %arg1, %arg2, %arg0 : i32, i32, i32
  }
}

module attributes {stable_mosaic.version = 11 : i64} {
  func.func @_ln_mod_qkv_kernel(%arg0: i32, %arg1: i32, %arg2: i32, %arg3: memref<1x8x64xf32, #tpu.memory_space<vmem>>, %arg4: memref<1x1x64xf32, #tpu.memory_space<vmem>>, %arg5: memref<1x1x64xf32, #tpu.memory_space<vmem>>, %arg6: memref<64x192xbf16, #tpu.memory_space<vmem>>, %arg7: memref<1x192xf32, #tpu.memory_space<vmem>>, %arg8: memref<1x8x192xbf16, #tpu.memory_space<vmem>>) attributes {dimension_semantics = [#tpu.dimension_semantics<parallel>, #tpu.dimension_semantics<parallel>, #tpu.dimension_semantics<parallel>], iteration_bounds = array<i64: 1, 2, 1>, scalar_prefetch = 0 : i64, scratch_operands = 0 : i64, tpu.core_type = #tpu.core_type<tc>, window_params = [{transform_indices = @transform_0, window_bounds = array<i64: 1, 8, 64>}, {transform_indices = @transform_1, window_bounds = array<i64: 1, 1, 64>}, {transform_indices = @transform_2, window_bounds = array<i64: 1, 1, 64>}, {transform_indices = @transform_3, window_bounds = array<i64: 64, 192>}, {transform_indices = @transform_4, window_bounds = array<i64: 1, 192>}, {transform_indices = @transform_5, window_bounds = array<i64: 1, 8, 192>}]} {
    %c0 = arith.constant 0 : index
    %c0_0 = arith.constant 0 : index
    %c0_1 = arith.constant 0 : index
    %0 = vector.load %arg3[%c0, %c0_0, %c0_1] : memref<1x8x64xf32, #tpu.memory_space<vmem>>, vector<1x8x64xf32>
    %1 = vector.shape_cast %0 : vector<1x8x64xf32> to vector<8x64xf32>
    %cst = arith.constant dense<0.000000e+00> : vector<8xf32>
    %2 = vector.multi_reduction <add>, %1, %cst [1] : vector<8x64xf32> to vector<8xf32>
    %3 = vector.shape_cast %2 : vector<8xf32> to vector<8x1xf32>
    %cst_2 = arith.constant 6.400000e+01 : f32
    %4 = vector.broadcast %cst_2 : f32 to vector<8x1xf32>
    %5 = arith.divf %3, %4 : vector<8x1xf32>
    %6 = vector.broadcast %5 : vector<8x1xf32> to vector<8x64xf32>
    %7 = arith.subf %1, %6 : vector<8x64xf32>
    %8 = arith.mulf %7, %7 : vector<8x64xf32>
    %cst_3 = arith.constant dense<0.000000e+00> : vector<8xf32>
    %9 = vector.multi_reduction <add>, %8, %cst_3 [1] : vector<8x64xf32> to vector<8xf32>
    %10 = vector.shape_cast %9 : vector<8xf32> to vector<8x1xf32>
    %cst_4 = arith.constant 6.400000e+01 : f32
    %11 = vector.broadcast %cst_4 : f32 to vector<8x1xf32>
    %12 = arith.divf %10, %11 : vector<8x1xf32>
    %cst_5 = arith.constant 9.99999997E-7 : f32
    %13 = vector.broadcast %cst_5 : f32 to vector<8x1xf32>
    %14 = arith.addf %12, %13 : vector<8x1xf32>
    %15 = math.rsqrt %14 : vector<8x1xf32>
    %16 = vector.broadcast %15 : vector<8x1xf32> to vector<8x64xf32>
    %17 = arith.mulf %7, %16 : vector<8x64xf32>
    %c0_6 = arith.constant 0 : index
    %c0_7 = arith.constant 0 : index
    %c0_8 = arith.constant 0 : index
    %18 = vector.load %arg4[%c0_6, %c0_7, %c0_8] : memref<1x1x64xf32, #tpu.memory_space<vmem>>, vector<1x1x64xf32>
    %19 = vector.shape_cast %18 : vector<1x1x64xf32> to vector<1x64xf32>
    %cst_9 = arith.constant 1.000000e+00 : f32
    %20 = vector.broadcast %cst_9 : f32 to vector<1x64xf32>
    %21 = arith.addf %20, %19 : vector<1x64xf32>
    %22 = vector.broadcast %21 : vector<1x64xf32> to vector<8x64xf32>
    %23 = arith.mulf %22, %17 : vector<8x64xf32>
    %c0_10 = arith.constant 0 : index
    %c0_11 = arith.constant 0 : index
    %c0_12 = arith.constant 0 : index
    %24 = vector.load %arg5[%c0_10, %c0_11, %c0_12] : memref<1x1x64xf32, #tpu.memory_space<vmem>>, vector<1x1x64xf32>
    %25 = vector.shape_cast %24 : vector<1x1x64xf32> to vector<1x64xf32>
    %26 = vector.broadcast %25 : vector<1x64xf32> to vector<8x64xf32>
    %27 = arith.addf %23, %26 : vector<8x64xf32>
    %28 = arith.truncf %27 : vector<8x64xf32> to vector<8x64xbf16>
    %c0_13 = arith.constant 0 : index
    %c0_14 = arith.constant 0 : index
    %29 = vector.load %arg6[%c0_13, %c0_14] : memref<64x192xbf16, #tpu.memory_space<vmem>>, vector<64x192xbf16>
    %cst_15 = arith.constant dense<0.000000e+00> : vector<8x192xf32>
    %30 = tpu.matmul %28, %29, %cst_15 {dimension_numbers = #tpu.dot_dimension_numbers<[1], [0], [0], [1], [0, 0, 1, 1], [], []>} : vector<8x64xbf16>, vector<64x192xbf16>, vector<8x192xf32> -> vector<8x192xf32>
    %c0_16 = arith.constant 0 : index
    %c0_17 = arith.constant 0 : index
    %31 = vector.load %arg7[%c0_16, %c0_17] : memref<1x192xf32, #tpu.memory_space<vmem>>, vector<1x192xf32>
    %32 = vector.broadcast %31 : vector<1x192xf32> to vector<8x192xf32>
    %33 = arith.addf %30, %32 : vector<8x192xf32>
    %34 = arith.truncf %33 : vector<8x192xf32> to vector<8x192xbf16>
    %c0_18 = arith.constant 0 : index
    %c0_19 = arith.constant 0 : index
    %c0_20 = arith.constant 0 : index
    %35 = vector.load %arg8[%c0_18, %c0_19, %c0_20] : memref<1x8x192xbf16, #tpu.memory_space<vmem>>, vector<1x8x192xbf16>
    %36 = vector.shape_cast %35 : vector<1x8x192xbf16> to vector<8x192xbf16>
    %37 = vector.shape_cast %34 : vector<8x192xbf16> to vector<1x8x192xbf16>
    tpu.vector_store %arg8[%c0_18, %c0_19, %c0_20], %37 {strides = array<i32>} : memref<1x8x192xbf16, #tpu.memory_space<vmem>>, vector<1x8x192xbf16>,
    return
  }
  func.func @transform_0(%arg0: i32, %arg1: i32, %arg2: i32) -> (i32, i32, i32) {
    %c0_i32 = arith.constant 0 : i32
    %c0_i32_0 = arith.constant 0 : i32
    return %arg1, %arg2, %c0_i32 : i32, i32, i32
  }
  func.func @transform_1(%arg0: i32, %arg1: i32, %arg2: i32) -> (i32, i32, i32) {
    %c0_i32 = arith.constant 0 : i32
    %c0_i32_0 = arith.constant 0 : i32
    %c0_i32_1 = arith.constant 0 : i32
    return %arg1, %c0_i32, %c0_i32_0 : i32, i32, i32
  }
  func.func @transform_2(%arg0: i32, %arg1: i32, %arg2: i32) -> (i32, i32, i32) {
    %c0_i32 = arith.constant 0 : i32
    %c0_i32_0 = arith.constant 0 : i32
    %c0_i32_1 = arith.constant 0 : i32
    return %arg1, %c0_i32, %c0_i32_0 : i32, i32, i32
  }
  func.func @transform_3(%arg0: i32, %arg1: i32, %arg2: i32) -> (i32, i32) {
    %c0_i32 = arith.constant 0 : i32
    %c0_i32_0 = arith.constant 0 : i32
    return %c0_i32, %arg0 : i32, i32
  }
  func.func @transform_4(%arg0: i32, %arg1: i32, %arg2: i32) -> (i32, i32) {
    %c0_i32 = arith.constant 0 : i32
    %c0_i32_0 = arith.constant 0 : i32
    return %c0_i32, %arg0 : i32, i32
  }
  func.func @transform_5(%arg0: i32, %arg1: i32, %arg2: i32) -> (i32, i32, i32) {
    %c0_i32 = arith.constant 0 : i32
    return %arg1, %arg2, %arg0 : i32, i32, i32
  }
}

module attributes {stable_mosaic.version = 11 : i64} {
  func.func @_flash_attn_kernel(%arg0: i32, %arg1: i32, %arg2: i32, %arg3: i32, %arg4: memref<1x1x8x16xbf16, #tpu.memory_space<vmem>>, %arg5: memref<1x1x8x16xbf16, #tpu.memory_space<vmem>>, %arg6: memref<1x1x8x16xbf16, #tpu.memory_space<vmem>>, %arg7: memref<8x8xf32, #tpu.memory_space<vmem>>, %arg8: memref<8x8xf32, #tpu.memory_space<vmem>>, %arg9: memref<8x8xf32, #tpu.memory_space<vmem>>, %arg10: memref<8x8xf32, #tpu.memory_space<vmem>>, %arg11: memref<8x16xf32, #tpu.memory_space<vmem>>, %arg12: memref<8x16xf32, #tpu.memory_space<vmem>>, %arg13: memref<1x1x8x16xbf16, #tpu.memory_space<vmem>>, %arg14: memref<8x1xf32, #tpu.memory_space<vmem>>, %arg15: memref<8x1xf32, #tpu.memory_space<vmem>>, %arg16: memref<8x16xf32, #tpu.memory_space<vmem>>) attributes {dimension_semantics = [#tpu.dimension_semantics<parallel>, #tpu.dimension_semantics<parallel>, #tpu.dimension_semantics<parallel>, #tpu.dimension_semantics<arbitrary>], iteration_bounds = array<i64: 2, 4, 4, 4>, scalar_prefetch = 0 : i64, scratch_operands = 3 : i64, tpu.core_type = #tpu.core_type<tc>, window_params = [{transform_indices = @transform_0, window_bounds = array<i64: 1, 1, 8, 16>}, {transform_indices = @transform_1, window_bounds = array<i64: 1, 1, 8, 16>}, {transform_indices = @transform_2, window_bounds = array<i64: 1, 1, 8, 16>}, {transform_indices = @transform_3, window_bounds = array<i64: 8, 8>}, {transform_indices = @transform_4, window_bounds = array<i64: 8, 8>}, {transform_indices = @transform_5, window_bounds = array<i64: 8, 8>}, {transform_indices = @transform_6, window_bounds = array<i64: 8, 8>}, {transform_indices = @transform_7, window_bounds = array<i64: 8, 16>}, {transform_indices = @transform_8, window_bounds = array<i64: 8, 16>}, {transform_indices = @transform_9, window_bounds = array<i64: 1, 1, 8, 16>}]} {
    %c0_i32 = arith.constant 0 : i32
    %0 = arith.cmpi eq, %arg3, %c0_i32 : i32
    %1 = arith.extui %0 : i1 to i32
    %c0_i32_0 = arith.constant 0 : i32
    %2 = arith.cmpi ne, %1, %c0_i32_0 : i32
    scf.if %2 {
      %cst_47 = arith.constant 0xFF800000 : f32
      %86 = vector.broadcast %cst_47 : f32 to vector<8x1xf32>
      %c0_48 = arith.constant 0 : index
      %c0_49 = arith.constant 0 : index
      %87 = vector.load %arg14[%c0_48, %c0_49] : memref<8x1xf32, #tpu.memory_space<vmem>>, vector<8x1xf32>
      tpu.vector_store %arg14[%c0_48, %c0_49], %86 {strides = array<i32>} : memref<8x1xf32, #tpu.memory_space<vmem>>, vector<8x1xf32>,
      %cst_50 = arith.constant 0.000000e+00 : f32
      %88 = vector.broadcast %cst_50 : f32 to vector<8x1xf32>
      %c0_51 = arith.constant 0 : index
      %c0_52 = arith.constant 0 : index
      %89 = vector.load %arg15[%c0_51, %c0_52] : memref<8x1xf32, #tpu.memory_space<vmem>>, vector<8x1xf32>
      tpu.vector_store %arg15[%c0_51, %c0_52], %88 {strides = array<i32>} : memref<8x1xf32, #tpu.memory_space<vmem>>, vector<8x1xf32>,
      %cst_53 = arith.constant 0.000000e+00 : f32
      %90 = vector.broadcast %cst_53 : f32 to vector<8x16xf32>
      %c0_54 = arith.constant 0 : index
      %c0_55 = arith.constant 0 : index
      %91 = vector.load %arg16[%c0_54, %c0_55] : memref<8x16xf32, #tpu.memory_space<vmem>>, vector<8x16xf32>
      tpu.vector_store %arg16[%c0_54, %c0_55], %90 {strides = array<i32>} : memref<8x16xf32, #tpu.memory_space<vmem>>, vector<8x16xf32>,
    } else {
    }
    %c0 = arith.constant 0 : index
    %c0_1 = arith.constant 0 : index
    %c0_2 = arith.constant 0 : index
    %c0_3 = arith.constant 0 : index
    %3 = vector.load %arg4[%c0, %c0_1, %c0_2, %c0_3] : memref<1x1x8x16xbf16, #tpu.memory_space<vmem>>, vector<1x1x8x16xbf16>
    %4 = vector.shape_cast %3 : vector<1x1x8x16xbf16> to vector<8x16xbf16>
    %5 = arith.extf %4 : vector<8x16xbf16> to vector<8x16xf32>
    %c0_4 = arith.constant 0 : index
    %c0_5 = arith.constant 0 : index
    %c0_6 = arith.constant 0 : index
    %c0_7 = arith.constant 0 : index
    %6 = vector.load %arg5[%c0_4, %c0_5, %c0_6, %c0_7] : memref<1x1x8x16xbf16, #tpu.memory_space<vmem>>, vector<1x1x8x16xbf16>
    %7 = vector.shape_cast %6 : vector<1x1x8x16xbf16> to vector<8x16xbf16>
    %8 = arith.extf %7 : vector<8x16xbf16> to vector<8x16xf32>
    %9 = arith.mulf %5, %5 : vector<8x16xf32>
    %cst = arith.constant dense<0.000000e+00> : vector<8xf32>
    %10 = vector.multi_reduction <add>, %9, %cst [1] : vector<8x16xf32> to vector<8xf32>
    %11 = vector.shape_cast %10 : vector<8xf32> to vector<8x1xf32>
    %cst_8 = arith.constant 1.600000e+01 : f32
    %12 = vector.broadcast %cst_8 : f32 to vector<8x1xf32>
    %13 = arith.divf %11, %12 : vector<8x1xf32>
    %cst_9 = arith.constant 9.99999997E-7 : f32
    %14 = vector.broadcast %cst_9 : f32 to vector<8x1xf32>
    %15 = arith.addf %13, %14 : vector<8x1xf32>
    %16 = math.rsqrt %15 : vector<8x1xf32>
    %17 = vector.broadcast %16 : vector<8x1xf32> to vector<8x16xf32>
    %18 = arith.mulf %5, %17 : vector<8x16xf32>
    %c0_10 = arith.constant 0 : index
    %c0_11 = arith.constant 0 : index
    %19 = vector.load %arg11[%c0_10, %c0_11] : memref<8x16xf32, #tpu.memory_space<vmem>>, vector<8x16xf32>
    %20 = arith.mulf %18, %19 : vector<8x16xf32>
    %21 = arith.mulf %8, %8 : vector<8x16xf32>
    %cst_12 = arith.constant dense<0.000000e+00> : vector<8xf32>
    %22 = vector.multi_reduction <add>, %21, %cst_12 [1] : vector<8x16xf32> to vector<8xf32>
    %23 = vector.shape_cast %22 : vector<8xf32> to vector<8x1xf32>
    %cst_13 = arith.constant 1.600000e+01 : f32
    %24 = vector.broadcast %cst_13 : f32 to vector<8x1xf32>
    %25 = arith.divf %23, %24 : vector<8x1xf32>
    %cst_14 = arith.constant 9.99999997E-7 : f32
    %26 = vector.broadcast %cst_14 : f32 to vector<8x1xf32>
    %27 = arith.addf %25, %26 : vector<8x1xf32>
    %28 = math.rsqrt %27 : vector<8x1xf32>
    %29 = vector.broadcast %28 : vector<8x1xf32> to vector<8x16xf32>
    %30 = arith.mulf %8, %29 : vector<8x16xf32>
    %c0_15 = arith.constant 0 : index
    %c0_16 = arith.constant 0 : index
    %31 = vector.load %arg12[%c0_15, %c0_16] : memref<8x16xf32, #tpu.memory_space<vmem>>, vector<8x16xf32>
    %32 = arith.mulf %30, %31 : vector<8x16xf32>
    %c0_17 = arith.constant 0 : index
    %c0_18 = arith.constant 0 : index
    %33 = vector.load %arg7[%c0_17, %c0_18] : memref<8x8xf32, #tpu.memory_space<vmem>>, vector<8x8xf32>
    %c0_19 = arith.constant 0 : index
    %c0_20 = arith.constant 0 : index
    %34 = vector.load %arg8[%c0_19, %c0_20] : memref<8x8xf32, #tpu.memory_space<vmem>>, vector<8x8xf32>
    %35 = vector.extract_strided_slice %20 {offsets = [0, 0], sizes = [8, 8], strides = [1, 1]} : vector<8x16xf32> to vector<8x8xf32>
    %36 = vector.extract_strided_slice %20 {offsets = [0, 8], sizes = [8, 8], strides = [1, 1]} : vector<8x16xf32> to vector<8x8xf32>
    %37 = arith.mulf %35, %33 : vector<8x8xf32>
    %38 = arith.mulf %36, %34 : vector<8x8xf32>
    %39 = arith.subf %37, %38 : vector<8x8xf32>
    %40 = arith.mulf %35, %34 : vector<8x8xf32>
    %41 = arith.mulf %36, %33 : vector<8x8xf32>
    %42 = arith.addf %40, %41 : vector<8x8xf32>
    %43 = tpu.concatenate %39, %42 in 1 : vector<8x8xf32>, vector<8x8xf32> -> vector<8x16xf32>
    %cst_21 = arith.constant 5.000000e-01 : f32
    %44 = vector.broadcast %cst_21 : f32 to vector<8x16xf32>
    %45 = arith.mulf %43, %44 : vector<8x16xf32>
    %c0_22 = arith.constant 0 : index
    %c0_23 = arith.constant 0 : index
    %46 = vector.load %arg9[%c0_22, %c0_23] : memref<8x8xf32, #tpu.memory_space<vmem>>, vector<8x8xf32>
    %c0_24 = arith.constant 0 : index
    %c0_25 = arith.constant 0 : index
    %47 = vector.load %arg10[%c0_24, %c0_25] : memref<8x8xf32, #tpu.memory_space<vmem>>, vector<8x8xf32>
    %48 = vector.extract_strided_slice %32 {offsets = [0, 0], sizes = [8, 8], strides = [1, 1]} : vector<8x16xf32> to vector<8x8xf32>
    %49 = vector.extract_strided_slice %32 {offsets = [0, 8], sizes = [8, 8], strides = [1, 1]} : vector<8x16xf32> to vector<8x8xf32>
    %50 = arith.mulf %48, %46 : vector<8x8xf32>
    %51 = arith.mulf %49, %47 : vector<8x8xf32>
    %52 = arith.subf %50, %51 : vector<8x8xf32>
    %53 = arith.mulf %48, %47 : vector<8x8xf32>
    %54 = arith.mulf %49, %46 : vector<8x8xf32>
    %55 = arith.addf %53, %54 : vector<8x8xf32>
    %56 = tpu.concatenate %52, %55 in 1 : vector<8x8xf32>, vector<8x8xf32> -> vector<8x16xf32>
    %cst_26 = arith.constant dense<0.000000e+00> : vector<8x8xf32>
    %57 = tpu.matmul %45, %56, %cst_26 {dimension_numbers = #tpu.dot_dimension_numbers<[1], [1], [0], [0], [0, 0, 1, 0], [], []>} : vector<8x16xf32>, vector<8x16xf32>, vector<8x8xf32> -> vector<8x8xf32>
    %c0_27 = arith.constant 0 : index
    %c0_28 = arith.constant 0 : index
    %58 = vector.load %arg14[%c0_27, %c0_28] : memref<8x1xf32, #tpu.memory_space<vmem>>, vector<8x1xf32>
    %cst_29 = arith.constant dense<0xFF800000> : vector<8xf32>
    %59 = vector.multi_reduction <maximumf>, %57, %cst_29 [1] : vector<8x8xf32> to vector<8xf32>
    %60 = vector.shape_cast %59 : vector<8xf32> to vector<8x1xf32>
    %61 = arith.maximumf %58, %60 : vector<8x1xf32>
    %62 = arith.subf %58, %61 : vector<8x1xf32>
    %63 = math.exp %62 : vector<8x1xf32>
    %64 = vector.broadcast %61 : vector<8x1xf32> to vector<8x8xf32>
    %65 = arith.subf %57, %64 : vector<8x8xf32>
    %66 = math.exp %65 : vector<8x8xf32>
    %c0_30 = arith.constant 0 : index
    %c0_31 = arith.constant 0 : index
    %67 = vector.load %arg15[%c0_30, %c0_31] : memref<8x1xf32, #tpu.memory_space<vmem>>, vector<8x1xf32>
    %68 = arith.mulf %63, %67 : vector<8x1xf32>
    %cst_32 = arith.constant dense<0.000000e+00> : vector<8xf32>
    %69 = vector.multi_reduction <add>, %66, %cst_32 [1] : vector<8x8xf32> to vector<8xf32>
    %70 = vector.shape_cast %69 : vector<8xf32> to vector<8x1xf32>
    %71 = arith.addf %68, %70 : vector<8x1xf32>
    %c0_33 = arith.constant 0 : index
    %c0_34 = arith.constant 0 : index
    %72 = vector.load %arg15[%c0_33, %c0_34] : memref<8x1xf32, #tpu.memory_space<vmem>>, vector<8x1xf32>
    tpu.vector_store %arg15[%c0_33, %c0_34], %71 {strides = array<i32>} : memref<8x1xf32, #tpu.memory_space<vmem>>, vector<8x1xf32>,
    %c0_35 = arith.constant 0 : index
    %c0_36 = arith.constant 0 : index
    %73 = vector.load %arg16[%c0_35, %c0_36] : memref<8x16xf32, #tpu.memory_space<vmem>>, vector<8x16xf32>
    %74 = vector.broadcast %63 : vector<8x1xf32> to vector<8x16xf32>
    %75 = arith.mulf %74, %73 : vector<8x16xf32>
    %76 = arith.truncf %66 : vector<8x8xf32> to vector<8x8xbf16>
    %c0_37 = arith.constant 0 : index
    %c0_38 = arith.constant 0 : index
    %c0_39 = arith.constant 0 : index
    %c0_40 = arith.constant 0 : index
    %77 = vector.load %arg6[%c0_37, %c0_38, %c0_39, %c0_40] : memref<1x1x8x16xbf16, #tpu.memory_space<vmem>>, vector<1x1x8x16xbf16>
    %78 = vector.shape_cast %77 : vector<1x1x8x16xbf16> to vector<8x16xbf16>
    %cst_41 = arith.constant dense<0.000000e+00> : vector<8x16xf32>
    %79 = tpu.matmul %76, %78, %cst_41 {dimension_numbers = #tpu.dot_dimension_numbers<[1], [0], [0], [1], [0, 0, 1, 1], [], []>} : vector<8x8xbf16>, vector<8x16xbf16>, vector<8x16xf32> -> vector<8x16xf32>
    %80 = arith.addf %75, %79 : vector<8x16xf32>
    %c0_42 = arith.constant 0 : index
    %c0_43 = arith.constant 0 : index
    %81 = vector.load %arg16[%c0_42, %c0_43] : memref<8x16xf32, #tpu.memory_space<vmem>>, vector<8x16xf32>
    tpu.vector_store %arg16[%c0_42, %c0_43], %80 {strides = array<i32>} : memref<8x16xf32, #tpu.memory_space<vmem>>, vector<8x16xf32>,
    %c0_44 = arith.constant 0 : index
    %c0_45 = arith.constant 0 : index
    %82 = vector.load %arg14[%c0_44, %c0_45] : memref<8x1xf32, #tpu.memory_space<vmem>>, vector<8x1xf32>
    tpu.vector_store %arg14[%c0_44, %c0_45], %61 {strides = array<i32>} : memref<8x1xf32, #tpu.memory_space<vmem>>, vector<8x1xf32>,
    %c3_i32 = arith.constant 3 : i32
    %83 = arith.cmpi eq, %arg3, %c3_i32 : i32
    %84 = arith.extui %83 : i1 to i32
    %c0_i32_46 = arith.constant 0 : i32
    %85 = arith.cmpi ne, %84, %c0_i32_46 : i32
    scf.if %85 {
      %c0_47 = arith.constant 0 : index
      %c0_48 = arith.constant 0 : index
      %86 = vector.load %arg16[%c0_47, %c0_48] : memref<8x16xf32, #tpu.memory_space<vmem>>, vector<8x16xf32>
      %c0_49 = arith.constant 0 : index
      %c0_50 = arith.constant 0 : index
      %87 = vector.load %arg15[%c0_49, %c0_50] : memref<8x1xf32, #tpu.memory_space<vmem>>, vector<8x1xf32>
      %88 = tpu.reciprocal %87 {approx = true} : vector<8x1xf32> -> vector<8x1xf32>
      %89 = vector.broadcast %88 : vector<8x1xf32> to vector<8x16xf32>
      %90 = arith.mulf %86, %89 : vector<8x16xf32>
      %91 = arith.truncf %90 : vector<8x16xf32> to vector<8x16xbf16>
      %c0_51 = arith.constant 0 : index
      %c0_52 = arith.constant 0 : index
      %c0_53 = arith.constant 0 : index
      %c0_54 = arith.constant 0 : index
      %92 = vector.load %arg13[%c0_51, %c0_52, %c0_53, %c0_54] : memref<1x1x8x16xbf16, #tpu.memory_space<vmem>>, vector<1x1x8x16xbf16>
      %93 = vector.shape_cast %92 : vector<1x1x8x16xbf16> to vector<8x16xbf16>
      %94 = vector.shape_cast %91 : vector<8x16xbf16> to vector<1x1x8x16xbf16>
      tpu.vector_store %arg13[%c0_51, %c0_52, %c0_53, %c0_54], %94 {strides = array<i32>} : memref<1x1x8x16xbf16, #tpu.memory_space<vmem>>, vector<1x1x8x16xbf16>,
    } else {
    }
    return
  }
  func.func @transform_0(%arg0: i32, %arg1: i32, %arg2: i32, %arg3: i32) -> (i32, i32, i32, i32) {
    %c0_i32 = arith.constant 0 : i32
    %c0_i32_0 = arith.constant 0 : i32
    return %arg0, %arg1, %arg2, %c0_i32 : i32, i32, i32, i32
  }
  func.func @transform_1(%arg0: i32, %arg1: i32, %arg2: i32, %arg3: i32) -> (i32, i32, i32, i32) {
    %c0_i32 = arith.constant 0 : i32
    %c0_i32_0 = arith.constant 0 : i32
    return %arg0, %arg1, %arg3, %c0_i32 : i32, i32, i32, i32
  }
  func.func @transform_2(%arg0: i32, %arg1: i32, %arg2: i32, %arg3: i32) -> (i32, i32, i32, i32) {
    %c0_i32 = arith.constant 0 : i32
    %c0_i32_0 = arith.constant 0 : i32
    return %arg0, %arg1, %arg3, %c0_i32 : i32, i32, i32, i32
  }
  func.func @transform_3(%arg0: i32, %arg1: i32, %arg2: i32, %arg3: i32) -> (i32, i32) {
    %c0_i32 = arith.constant 0 : i32
    %c0_i32_0 = arith.constant 0 : i32
    return %arg2, %c0_i32 : i32, i32
  }
  func.func @transform_4(%arg0: i32, %arg1: i32, %arg2: i32, %arg3: i32) -> (i32, i32) {
    %c0_i32 = arith.constant 0 : i32
    %c0_i32_0 = arith.constant 0 : i32
    return %arg2, %c0_i32 : i32, i32
  }
  func.func @transform_5(%arg0: i32, %arg1: i32, %arg2: i32, %arg3: i32) -> (i32, i32) {
    %c0_i32 = arith.constant 0 : i32
    %c0_i32_0 = arith.constant 0 : i32
    return %arg3, %c0_i32 : i32, i32
  }
  func.func @transform_6(%arg0: i32, %arg1: i32, %arg2: i32, %arg3: i32) -> (i32, i32) {
    %c0_i32 = arith.constant 0 : i32
    %c0_i32_0 = arith.constant 0 : i32
    return %arg3, %c0_i32 : i32, i32
  }
  func.func @transform_7(%arg0: i32, %arg1: i32, %arg2: i32, %arg3: i32) -> (i32, i32) {
    %c0_i32 = arith.constant 0 : i32
    %c0_i32_0 = arith.constant 0 : i32
    return %arg2, %c0_i32 : i32, i32
  }
  func.func @transform_8(%arg0: i32, %arg1: i32, %arg2: i32, %arg3: i32) -> (i32, i32) {
    %c0_i32 = arith.constant 0 : i32
    %c0_i32_0 = arith.constant 0 : i32
    return %arg3, %c0_i32 : i32, i32
  }
  func.func @transform_9(%arg0: i32, %arg1: i32, %arg2: i32, %arg3: i32) -> (i32, i32, i32, i32) {
    %c0_i32 = arith.constant 0 : i32
    %c0_i32_0 = arith.constant 0 : i32
    return %arg0, %arg1, %arg2, %c0_i32 : i32, i32, i32, i32
  }
}

module attributes {stable_mosaic.version = 11 : i64} {
  func.func @_post_kernel(%arg0: i32, %arg1: i32, %arg2: i32, %arg3: memref<1x8x64xf32, #tpu.memory_space<vmem>>, %arg4: memref<1x8x64xbf16, #tpu.memory_space<vmem>>, %arg5: memref<1x1x64xf32, #tpu.memory_space<vmem>>, %arg6: memref<1x1x64xf32, #tpu.memory_space<vmem>>, %arg7: memref<1x1x64xf32, #tpu.memory_space<vmem>>, %arg8: memref<1x1x64xf32, #tpu.memory_space<vmem>>, %arg9: memref<64x64xbf16, #tpu.memory_space<vmem>>, %arg10: memref<1x64xf32, #tpu.memory_space<vmem>>, %arg11: memref<64x128xbf16, #tpu.memory_space<vmem>>, %arg12: memref<1x128xf32, #tpu.memory_space<vmem>>, %arg13: memref<128x64xbf16, #tpu.memory_space<vmem>>, %arg14: memref<1x64xf32, #tpu.memory_space<vmem>>, %arg15: memref<1x8x64xf32, #tpu.memory_space<vmem>>, %arg16: memref<8x64xf32, #tpu.memory_space<vmem>>, %arg17: memref<8x64xf32, #tpu.memory_space<vmem>>, %arg18: memref<8x64xf32, #tpu.memory_space<vmem>>) attributes {dimension_semantics = [#tpu.dimension_semantics<parallel>, #tpu.dimension_semantics<parallel>, #tpu.dimension_semantics<arbitrary>], iteration_bounds = array<i64: 2, 1, 2>, scalar_prefetch = 0 : i64, scratch_operands = 3 : i64, tpu.core_type = #tpu.core_type<tc>, window_params = [{transform_indices = @transform_0, window_bounds = array<i64: 1, 8, 64>}, {transform_indices = @transform_1, window_bounds = array<i64: 1, 8, 64>}, {transform_indices = @transform_2, window_bounds = array<i64: 1, 1, 64>}, {transform_indices = @transform_3, window_bounds = array<i64: 1, 1, 64>}, {transform_indices = @transform_4, window_bounds = array<i64: 1, 1, 64>}, {transform_indices = @transform_5, window_bounds = array<i64: 1, 1, 64>}, {pipeline_mode = #tpu.pipeline_mode<synchronous>, transform_indices = @transform_6, window_bounds = array<i64: 64, 64>}, {pipeline_mode = #tpu.pipeline_mode<synchronous>, transform_indices = @transform_7, window_bounds = array<i64: 1, 64>}, {transform_indices = @transform_8, window_bounds = array<i64: 64, 128>}, {transform_indices = @transform_9, window_bounds = array<i64: 1, 128>}, {transform_indices = @transform_10, window_bounds = array<i64: 128, 64>}, {pipeline_mode = #tpu.pipeline_mode<synchronous>, transform_indices = @transform_11, window_bounds = array<i64: 1, 64>}, {transform_indices = @transform_12, window_bounds = array<i64: 1, 8, 64>}]} {
    %c0_i32 = arith.constant 0 : i32
    %0 = arith.cmpi eq, %arg2, %c0_i32 : i32
    %1 = arith.extui %0 : i1 to i32
    %c0_i32_0 = arith.constant 0 : i32
    %2 = arith.cmpi ne, %1, %c0_i32_0 : i32
    scf.if %2 {
      %c0_18 = arith.constant 0 : index
      %c0_19 = arith.constant 0 : index
      %c0_20 = arith.constant 0 : index
      %32 = vector.load %arg4[%c0_18, %c0_19, %c0_20] : memref<1x8x64xbf16, #tpu.memory_space<vmem>>, vector<1x8x64xbf16>
      %33 = vector.shape_cast %32 : vector<1x8x64xbf16> to vector<8x64xbf16>
      %c0_21 = arith.constant 0 : index
      %c0_22 = arith.constant 0 : index
      %34 = vector.load %arg9[%c0_21, %c0_22] : memref<64x64xbf16, #tpu.memory_space<vmem>>, vector<64x64xbf16>
      %cst_23 = arith.constant dense<0.000000e+00> : vector<8x64xf32>
      %35 = tpu.matmul %33, %34, %cst_23 {dimension_numbers = #tpu.dot_dimension_numbers<[1], [0], [0], [1], [0, 0, 1, 1], [], []>} : vector<8x64xbf16>, vector<64x64xbf16>, vector<8x64xf32> -> vector<8x64xf32>
      %c0_24 = arith.constant 0 : index
      %c0_25 = arith.constant 0 : index
      %36 = vector.load %arg10[%c0_24, %c0_25] : memref<1x64xf32, #tpu.memory_space<vmem>>, vector<1x64xf32>
      %37 = vector.broadcast %36 : vector<1x64xf32> to vector<8x64xf32>
      %38 = arith.addf %35, %37 : vector<8x64xf32>
      %c0_26 = arith.constant 0 : index
      %c0_27 = arith.constant 0 : index
      %c0_28 = arith.constant 0 : index
      %39 = vector.load %arg3[%c0_26, %c0_27, %c0_28] : memref<1x8x64xf32, #tpu.memory_space<vmem>>, vector<1x8x64xf32>
      %40 = vector.shape_cast %39 : vector<1x8x64xf32> to vector<8x64xf32>
      %c0_29 = arith.constant 0 : index
      %c0_30 = arith.constant 0 : index
      %c0_31 = arith.constant 0 : index
      %41 = vector.load %arg5[%c0_29, %c0_30, %c0_31] : memref<1x1x64xf32, #tpu.memory_space<vmem>>, vector<1x1x64xf32>
      %42 = vector.shape_cast %41 : vector<1x1x64xf32> to vector<1x64xf32>
      %43 = vector.broadcast %42 : vector<1x64xf32> to vector<8x64xf32>
      %44 = arith.mulf %43, %38 : vector<8x64xf32>
      %45 = arith.addf %40, %44 : vector<8x64xf32>
      %cst_32 = arith.constant dense<0.000000e+00> : vector<8xf32>
      %46 = vector.multi_reduction <add>, %45, %cst_32 [1] : vector<8x64xf32> to vector<8xf32>
      %47 = vector.shape_cast %46 : vector<8xf32> to vector<8x1xf32>
      %cst_33 = arith.constant 6.400000e+01 : f32
      %48 = vector.broadcast %cst_33 : f32 to vector<8x1xf32>
      %49 = arith.divf %47, %48 : vector<8x1xf32>
      %50 = vector.broadcast %49 : vector<8x1xf32> to vector<8x64xf32>
      %51 = arith.subf %45, %50 : vector<8x64xf32>
      %52 = arith.mulf %51, %51 : vector<8x64xf32>
      %cst_34 = arith.constant dense<0.000000e+00> : vector<8xf32>
      %53 = vector.multi_reduction <add>, %52, %cst_34 [1] : vector<8x64xf32> to vector<8xf32>
      %54 = vector.shape_cast %53 : vector<8xf32> to vector<8x1xf32>
      %cst_35 = arith.constant 6.400000e+01 : f32
      %55 = vector.broadcast %cst_35 : f32 to vector<8x1xf32>
      %56 = arith.divf %54, %55 : vector<8x1xf32>
      %cst_36 = arith.constant 9.99999997E-7 : f32
      %57 = vector.broadcast %cst_36 : f32 to vector<8x1xf32>
      %58 = arith.addf %56, %57 : vector<8x1xf32>
      %59 = math.rsqrt %58 : vector<8x1xf32>
      %60 = vector.broadcast %59 : vector<8x1xf32> to vector<8x64xf32>
      %61 = arith.mulf %51, %60 : vector<8x64xf32>
      %c0_37 = arith.constant 0 : index
      %c0_38 = arith.constant 0 : index
      %62 = vector.load %arg16[%c0_37, %c0_38] : memref<8x64xf32, #tpu.memory_space<vmem>>, vector<8x64xf32>
      tpu.vector_store %arg16[%c0_37, %c0_38], %45 {strides = array<i32>} : memref<8x64xf32, #tpu.memory_space<vmem>>, vector<8x64xf32>,
      %c0_39 = arith.constant 0 : index
      %c0_40 = arith.constant 0 : index
      %c0_41 = arith.constant 0 : index
      %63 = vector.load %arg6[%c0_39, %c0_40, %c0_41] : memref<1x1x64xf32, #tpu.memory_space<vmem>>, vector<1x1x64xf32>
      %64 = vector.shape_cast %63 : vector<1x1x64xf32> to vector<1x64xf32>
      %cst_42 = arith.constant 1.000000e+00 : f32
      %65 = vector.broadcast %cst_42 : f32 to vector<1x64xf32>
      %66 = arith.addf %65, %64 : vector<1x64xf32>
      %67 = vector.broadcast %66 : vector<1x64xf32> to vector<8x64xf32>
      %68 = arith.mulf %67, %61 : vector<8x64xf32>
      %c0_43 = arith.constant 0 : index
      %c0_44 = arith.constant 0 : index
      %c0_45 = arith.constant 0 : index
      %69 = vector.load %arg7[%c0_43, %c0_44, %c0_45] : memref<1x1x64xf32, #tpu.memory_space<vmem>>, vector<1x1x64xf32>
      %70 = vector.shape_cast %69 : vector<1x1x64xf32> to vector<1x64xf32>
      %71 = vector.broadcast %70 : vector<1x64xf32> to vector<8x64xf32>
      %72 = arith.addf %68, %71 : vector<8x64xf32>
      %c0_46 = arith.constant 0 : index
      %c0_47 = arith.constant 0 : index
      %73 = vector.load %arg17[%c0_46, %c0_47] : memref<8x64xf32, #tpu.memory_space<vmem>>, vector<8x64xf32>
      tpu.vector_store %arg17[%c0_46, %c0_47], %72 {strides = array<i32>} : memref<8x64xf32, #tpu.memory_space<vmem>>, vector<8x64xf32>,
      %cst_48 = arith.constant 0.000000e+00 : f32
      %74 = vector.broadcast %cst_48 : f32 to vector<8x64xf32>
      %c0_49 = arith.constant 0 : index
      %c0_50 = arith.constant 0 : index
      %75 = vector.load %arg18[%c0_49, %c0_50] : memref<8x64xf32, #tpu.memory_space<vmem>>, vector<8x64xf32>
      tpu.vector_store %arg18[%c0_49, %c0_50], %74 {strides = array<i32>} : memref<8x64xf32, #tpu.memory_space<vmem>>, vector<8x64xf32>,
    } else {
    }
    %c0 = arith.constant 0 : index
    %c0_1 = arith.constant 0 : index
    %3 = vector.load %arg17[%c0, %c0_1] : memref<8x64xf32, #tpu.memory_space<vmem>>, vector<8x64xf32>
    %4 = arith.truncf %3 : vector<8x64xf32> to vector<8x64xbf16>
    %c0_2 = arith.constant 0 : index
    %c0_3 = arith.constant 0 : index
    %5 = vector.load %arg11[%c0_2, %c0_3] : memref<64x128xbf16, #tpu.memory_space<vmem>>, vector<64x128xbf16>
    %cst = arith.constant dense<0.000000e+00> : vector<8x128xf32>
    %6 = tpu.matmul %4, %5, %cst {dimension_numbers = #tpu.dot_dimension_numbers<[1], [0], [0], [1], [0, 0, 1, 1], [], []>} : vector<8x64xbf16>, vector<64x128xbf16>, vector<8x128xf32> -> vector<8x128xf32>
    %c0_4 = arith.constant 0 : index
    %c0_5 = arith.constant 0 : index
    %7 = vector.load %arg12[%c0_4, %c0_5] : memref<1x128xf32, #tpu.memory_space<vmem>>, vector<1x128xf32>
    %8 = vector.broadcast %7 : vector<1x128xf32> to vector<8x128xf32>
    %9 = arith.addf %6, %8 : vector<8x128xf32>
    %cst_6 = arith.constant 5.000000e-01 : f32
    %10 = vector.broadcast %cst_6 : f32 to vector<8x128xf32>
    %11 = arith.mulf %10, %9 : vector<8x128xf32>
    %cst_7 = arith.constant 4.471500e-02 : f32
    %12 = vector.broadcast %cst_7 : f32 to vector<8x128xf32>
    %13 = arith.mulf %12, %9 : vector<8x128xf32>
    %14 = arith.mulf %13, %9 : vector<8x128xf32>
    %15 = arith.mulf %14, %9 : vector<8x128xf32>
    %16 = arith.addf %9, %15 : vector<8x128xf32>
    %cst_8 = arith.constant 0.797884583 : f32
    %17 = vector.broadcast %cst_8 : f32 to vector<8x128xf32>
    %18 = arith.mulf %17, %16 : vector<8x128xf32>
    %19 = math.tanh %18 : vector<8x128xf32>
    %cst_9 = arith.constant 1.000000e+00 : f32
    %20 = vector.broadcast %cst_9 : f32 to vector<8x128xf32>
    %21 = arith.addf %20, %19 : vector<8x128xf32>
    %22 = arith.mulf %11, %21 : vector<8x128xf32>
    %c0_10 = arith.constant 0 : index
    %c0_11 = arith.constant 0 : index
    %23 = vector.load %arg18[%c0_10, %c0_11] : memref<8x64xf32, #tpu.memory_space<vmem>>, vector<8x64xf32>
    %24 = arith.truncf %22 : vector<8x128xf32> to vector<8x128xbf16>
    %c0_12 = arith.constant 0 : index
    %c0_13 = arith.constant 0 : index
    %25 = vector.load %arg13[%c0_12, %c0_13] : memref<128x64xbf16, #tpu.memory_space<vmem>>, vector<128x64xbf16>
    %cst_14 = arith.constant dense<0.000000e+00> : vector<8x64xf32>
    %26 = tpu.matmul %24, %25, %cst_14 {dimension_numbers = #tpu.dot_dimension_numbers<[1], [0], [0], [1], [0, 0, 1, 1], [], []>} : vector<8x128xbf16>, vector<128x64xbf16>, vector<8x64xf32> -> vector<8x64xf32>
    %27 = arith.addf %23, %26 : vector<8x64xf32>
    %c0_15 = arith.constant 0 : index
    %c0_16 = arith.constant 0 : index
    %28 = vector.load %arg18[%c0_15, %c0_16] : memref<8x64xf32, #tpu.memory_space<vmem>>, vector<8x64xf32>
    tpu.vector_store %arg18[%c0_15, %c0_16], %27 {strides = array<i32>} : memref<8x64xf32, #tpu.memory_space<vmem>>, vector<8x64xf32>,
    %c1_i32 = arith.constant 1 : i32
    %29 = arith.cmpi eq, %arg2, %c1_i32 : i32
    %30 = arith.extui %29 : i1 to i32
    %c0_i32_17 = arith.constant 0 : i32
    %31 = arith.cmpi ne, %30, %c0_i32_17 : i32
    scf.if %31 {
      %c0_18 = arith.constant 0 : index
      %c0_19 = arith.constant 0 : index
      %32 = vector.load %arg16[%c0_18, %c0_19] : memref<8x64xf32, #tpu.memory_space<vmem>>, vector<8x64xf32>
      %c0_20 = arith.constant 0 : index
      %c0_21 = arith.constant 0 : index
      %c0_22 = arith.constant 0 : index
      %33 = vector.load %arg8[%c0_20, %c0_21, %c0_22] : memref<1x1x64xf32, #tpu.memory_space<vmem>>, vector<1x1x64xf32>
      %34 = vector.shape_cast %33 : vector<1x1x64xf32> to vector<1x64xf32>
      %c0_23 = arith.constant 0 : index
      %c0_24 = arith.constant 0 : index
      %35 = vector.load %arg18[%c0_23, %c0_24] : memref<8x64xf32, #tpu.memory_space<vmem>>, vector<8x64xf32>
      %c0_25 = arith.constant 0 : index
      %c0_26 = arith.constant 0 : index
      %36 = vector.load %arg14[%c0_25, %c0_26] : memref<1x64xf32, #tpu.memory_space<vmem>>, vector<1x64xf32>
      %37 = vector.broadcast %36 : vector<1x64xf32> to vector<8x64xf32>
      %38 = arith.addf %35, %37 : vector<8x64xf32>
      %39 = vector.broadcast %34 : vector<1x64xf32> to vector<8x64xf32>
      %40 = arith.mulf %39, %38 : vector<8x64xf32>
      %41 = arith.addf %32, %40 : vector<8x64xf32>
      %c0_27 = arith.constant 0 : index
      %c0_28 = arith.constant 0 : index
      %c0_29 = arith.constant 0 : index
      %42 = vector.load %arg15[%c0_27, %c0_28, %c0_29] : memref<1x8x64xf32, #tpu.memory_space<vmem>>, vector<1x8x64xf32>
      %43 = vector.shape_cast %42 : vector<1x8x64xf32> to vector<8x64xf32>
      %44 = vector.shape_cast %41 : vector<8x64xf32> to vector<1x8x64xf32>
      tpu.vector_store %arg15[%c0_27, %c0_28, %c0_29], %44 {strides = array<i32>} : memref<1x8x64xf32, #tpu.memory_space<vmem>>, vector<1x8x64xf32>,
    } else {
    }
    return
  }
  func.func @transform_0(%arg0: i32, %arg1: i32, %arg2: i32) -> (i32, i32, i32) {
    %c0_i32 = arith.constant 0 : i32
    %c0_i32_0 = arith.constant 0 : i32
    return %arg0, %arg1, %c0_i32 : i32, i32, i32
  }
  func.func @transform_1(%arg0: i32, %arg1: i32, %arg2: i32) -> (i32, i32, i32) {
    %c0_i32 = arith.constant 0 : i32
    %c0_i32_0 = arith.constant 0 : i32
    return %arg0, %arg1, %c0_i32 : i32, i32, i32
  }
  func.func @transform_2(%arg0: i32, %arg1: i32, %arg2: i32) -> (i32, i32, i32) {
    %c0_i32 = arith.constant 0 : i32
    %c0_i32_0 = arith.constant 0 : i32
    %c0_i32_1 = arith.constant 0 : i32
    return %arg0, %c0_i32, %c0_i32_0 : i32, i32, i32
  }
  func.func @transform_3(%arg0: i32, %arg1: i32, %arg2: i32) -> (i32, i32, i32) {
    %c0_i32 = arith.constant 0 : i32
    %c0_i32_0 = arith.constant 0 : i32
    %c0_i32_1 = arith.constant 0 : i32
    return %arg0, %c0_i32, %c0_i32_0 : i32, i32, i32
  }
  func.func @transform_4(%arg0: i32, %arg1: i32, %arg2: i32) -> (i32, i32, i32) {
    %c0_i32 = arith.constant 0 : i32
    %c0_i32_0 = arith.constant 0 : i32
    %c0_i32_1 = arith.constant 0 : i32
    return %arg0, %c0_i32, %c0_i32_0 : i32, i32, i32
  }
  func.func @transform_5(%arg0: i32, %arg1: i32, %arg2: i32) -> (i32, i32, i32) {
    %c0_i32 = arith.constant 0 : i32
    %c0_i32_0 = arith.constant 0 : i32
    %c0_i32_1 = arith.constant 0 : i32
    return %arg0, %c0_i32, %c0_i32_0 : i32, i32, i32
  }
  func.func @transform_6(%arg0: i32, %arg1: i32, %arg2: i32) -> (i32, i32) {
    %c0_i32 = arith.constant 0 : i32
    %c0_i32_0 = arith.constant 0 : i32
    %c0_i32_1 = arith.constant 0 : i32
    return %c0_i32, %c0_i32_0 : i32, i32
  }
  func.func @transform_7(%arg0: i32, %arg1: i32, %arg2: i32) -> (i32, i32) {
    %c0_i32 = arith.constant 0 : i32
    %c0_i32_0 = arith.constant 0 : i32
    %c0_i32_1 = arith.constant 0 : i32
    return %c0_i32, %c0_i32_0 : i32, i32
  }
  func.func @transform_8(%arg0: i32, %arg1: i32, %arg2: i32) -> (i32, i32) {
    %c0_i32 = arith.constant 0 : i32
    %c0_i32_0 = arith.constant 0 : i32
    return %c0_i32, %arg2 : i32, i32
  }
  func.func @transform_9(%arg0: i32, %arg1: i32, %arg2: i32) -> (i32, i32) {
    %c0_i32 = arith.constant 0 : i32
    %c0_i32_0 = arith.constant 0 : i32
    return %c0_i32, %arg2 : i32, i32
  }
  func.func @transform_10(%arg0: i32, %arg1: i32, %arg2: i32) -> (i32, i32) {
    %c0_i32 = arith.constant 0 : i32
    %c0_i32_0 = arith.constant 0 : i32
    return %arg2, %c0_i32 : i32, i32
  }
  func.func @transform_11(%arg0: i32, %arg1: i32, %arg2: i32) -> (i32, i32) {
    %c0_i32 = arith.constant 0 : i32
    %c0_i32_0 = arith.constant 0 : i32
    %c0_i32_1 = arith.constant 0 : i32
    return %c0_i32, %c0_i32_0 : i32, i32
  }
  func.func @transform_12(%arg0: i32, %arg1: i32, %arg2: i32) -> (i32, i32, i32) {
    %c0_i32 = arith.constant 0 : i32
    %c0_i32_0 = arith.constant 0 : i32
    return %arg0, %arg1, %c0_i32 : i32, i32, i32
  }
}

module attributes {stable_mosaic.version = 11 : i64} {
  func.func @_post_kernel(%arg0: i32, %arg1: i32, %arg2: i32, %arg3: memref<1x8x64xf32, #tpu.memory_space<vmem>>, %arg4: memref<1x8x64xbf16, #tpu.memory_space<vmem>>, %arg5: memref<1x1x64xf32, #tpu.memory_space<vmem>>, %arg6: memref<1x1x64xf32, #tpu.memory_space<vmem>>, %arg7: memref<1x1x64xf32, #tpu.memory_space<vmem>>, %arg8: memref<1x1x64xf32, #tpu.memory_space<vmem>>, %arg9: memref<64x64xbf16, #tpu.memory_space<vmem>>, %arg10: memref<1x64xf32, #tpu.memory_space<vmem>>, %arg11: memref<64x128xbf16, #tpu.memory_space<vmem>>, %arg12: memref<1x128xf32, #tpu.memory_space<vmem>>, %arg13: memref<128x64xbf16, #tpu.memory_space<vmem>>, %arg14: memref<1x64xf32, #tpu.memory_space<vmem>>, %arg15: memref<1x8x64xf32, #tpu.memory_space<vmem>>, %arg16: memref<8x64xf32, #tpu.memory_space<vmem>>, %arg17: memref<8x64xf32, #tpu.memory_space<vmem>>, %arg18: memref<8x64xf32, #tpu.memory_space<vmem>>) attributes {dimension_semantics = [#tpu.dimension_semantics<parallel>, #tpu.dimension_semantics<parallel>, #tpu.dimension_semantics<arbitrary>], iteration_bounds = array<i64: 2, 3, 2>, scalar_prefetch = 0 : i64, scratch_operands = 3 : i64, tpu.core_type = #tpu.core_type<tc>, window_params = [{transform_indices = @transform_0, window_bounds = array<i64: 1, 8, 64>}, {transform_indices = @transform_1, window_bounds = array<i64: 1, 8, 64>}, {transform_indices = @transform_2, window_bounds = array<i64: 1, 1, 64>}, {transform_indices = @transform_3, window_bounds = array<i64: 1, 1, 64>}, {transform_indices = @transform_4, window_bounds = array<i64: 1, 1, 64>}, {transform_indices = @transform_5, window_bounds = array<i64: 1, 1, 64>}, {pipeline_mode = #tpu.pipeline_mode<synchronous>, transform_indices = @transform_6, window_bounds = array<i64: 64, 64>}, {pipeline_mode = #tpu.pipeline_mode<synchronous>, transform_indices = @transform_7, window_bounds = array<i64: 1, 64>}, {transform_indices = @transform_8, window_bounds = array<i64: 64, 128>}, {transform_indices = @transform_9, window_bounds = array<i64: 1, 128>}, {transform_indices = @transform_10, window_bounds = array<i64: 128, 64>}, {pipeline_mode = #tpu.pipeline_mode<synchronous>, transform_indices = @transform_11, window_bounds = array<i64: 1, 64>}, {transform_indices = @transform_12, window_bounds = array<i64: 1, 8, 64>}]} {
    %c0_i32 = arith.constant 0 : i32
    %0 = arith.cmpi eq, %arg2, %c0_i32 : i32
    %1 = arith.extui %0 : i1 to i32
    %c0_i32_0 = arith.constant 0 : i32
    %2 = arith.cmpi ne, %1, %c0_i32_0 : i32
    scf.if %2 {
      %c0_18 = arith.constant 0 : index
      %c0_19 = arith.constant 0 : index
      %c0_20 = arith.constant 0 : index
      %32 = vector.load %arg4[%c0_18, %c0_19, %c0_20] : memref<1x8x64xbf16, #tpu.memory_space<vmem>>, vector<1x8x64xbf16>
      %33 = vector.shape_cast %32 : vector<1x8x64xbf16> to vector<8x64xbf16>
      %c0_21 = arith.constant 0 : index
      %c0_22 = arith.constant 0 : index
      %34 = vector.load %arg9[%c0_21, %c0_22] : memref<64x64xbf16, #tpu.memory_space<vmem>>, vector<64x64xbf16>
      %cst_23 = arith.constant dense<0.000000e+00> : vector<8x64xf32>
      %35 = tpu.matmul %33, %34, %cst_23 {dimension_numbers = #tpu.dot_dimension_numbers<[1], [0], [0], [1], [0, 0, 1, 1], [], []>} : vector<8x64xbf16>, vector<64x64xbf16>, vector<8x64xf32> -> vector<8x64xf32>
      %c0_24 = arith.constant 0 : index
      %c0_25 = arith.constant 0 : index
      %36 = vector.load %arg10[%c0_24, %c0_25] : memref<1x64xf32, #tpu.memory_space<vmem>>, vector<1x64xf32>
      %37 = vector.broadcast %36 : vector<1x64xf32> to vector<8x64xf32>
      %38 = arith.addf %35, %37 : vector<8x64xf32>
      %c0_26 = arith.constant 0 : index
      %c0_27 = arith.constant 0 : index
      %c0_28 = arith.constant 0 : index
      %39 = vector.load %arg3[%c0_26, %c0_27, %c0_28] : memref<1x8x64xf32, #tpu.memory_space<vmem>>, vector<1x8x64xf32>
      %40 = vector.shape_cast %39 : vector<1x8x64xf32> to vector<8x64xf32>
      %c0_29 = arith.constant 0 : index
      %c0_30 = arith.constant 0 : index
      %c0_31 = arith.constant 0 : index
      %41 = vector.load %arg5[%c0_29, %c0_30, %c0_31] : memref<1x1x64xf32, #tpu.memory_space<vmem>>, vector<1x1x64xf32>
      %42 = vector.shape_cast %41 : vector<1x1x64xf32> to vector<1x64xf32>
      %43 = vector.broadcast %42 : vector<1x64xf32> to vector<8x64xf32>
      %44 = arith.mulf %43, %38 : vector<8x64xf32>
      %45 = arith.addf %40, %44 : vector<8x64xf32>
      %cst_32 = arith.constant dense<0.000000e+00> : vector<8xf32>
      %46 = vector.multi_reduction <add>, %45, %cst_32 [1] : vector<8x64xf32> to vector<8xf32>
      %47 = vector.shape_cast %46 : vector<8xf32> to vector<8x1xf32>
      %cst_33 = arith.constant 6.400000e+01 : f32
      %48 = vector.broadcast %cst_33 : f32 to vector<8x1xf32>
      %49 = arith.divf %47, %48 : vector<8x1xf32>
      %50 = vector.broadcast %49 : vector<8x1xf32> to vector<8x64xf32>
      %51 = arith.subf %45, %50 : vector<8x64xf32>
      %52 = arith.mulf %51, %51 : vector<8x64xf32>
      %cst_34 = arith.constant dense<0.000000e+00> : vector<8xf32>
      %53 = vector.multi_reduction <add>, %52, %cst_34 [1] : vector<8x64xf32> to vector<8xf32>
      %54 = vector.shape_cast %53 : vector<8xf32> to vector<8x1xf32>
      %cst_35 = arith.constant 6.400000e+01 : f32
      %55 = vector.broadcast %cst_35 : f32 to vector<8x1xf32>
      %56 = arith.divf %54, %55 : vector<8x1xf32>
      %cst_36 = arith.constant 9.99999997E-7 : f32
      %57 = vector.broadcast %cst_36 : f32 to vector<8x1xf32>
      %58 = arith.addf %56, %57 : vector<8x1xf32>
      %59 = math.rsqrt %58 : vector<8x1xf32>
      %60 = vector.broadcast %59 : vector<8x1xf32> to vector<8x64xf32>
      %61 = arith.mulf %51, %60 : vector<8x64xf32>
      %c0_37 = arith.constant 0 : index
      %c0_38 = arith.constant 0 : index
      %62 = vector.load %arg16[%c0_37, %c0_38] : memref<8x64xf32, #tpu.memory_space<vmem>>, vector<8x64xf32>
      tpu.vector_store %arg16[%c0_37, %c0_38], %45 {strides = array<i32>} : memref<8x64xf32, #tpu.memory_space<vmem>>, vector<8x64xf32>,
      %c0_39 = arith.constant 0 : index
      %c0_40 = arith.constant 0 : index
      %c0_41 = arith.constant 0 : index
      %63 = vector.load %arg6[%c0_39, %c0_40, %c0_41] : memref<1x1x64xf32, #tpu.memory_space<vmem>>, vector<1x1x64xf32>
      %64 = vector.shape_cast %63 : vector<1x1x64xf32> to vector<1x64xf32>
      %cst_42 = arith.constant 1.000000e+00 : f32
      %65 = vector.broadcast %cst_42 : f32 to vector<1x64xf32>
      %66 = arith.addf %65, %64 : vector<1x64xf32>
      %67 = vector.broadcast %66 : vector<1x64xf32> to vector<8x64xf32>
      %68 = arith.mulf %67, %61 : vector<8x64xf32>
      %c0_43 = arith.constant 0 : index
      %c0_44 = arith.constant 0 : index
      %c0_45 = arith.constant 0 : index
      %69 = vector.load %arg7[%c0_43, %c0_44, %c0_45] : memref<1x1x64xf32, #tpu.memory_space<vmem>>, vector<1x1x64xf32>
      %70 = vector.shape_cast %69 : vector<1x1x64xf32> to vector<1x64xf32>
      %71 = vector.broadcast %70 : vector<1x64xf32> to vector<8x64xf32>
      %72 = arith.addf %68, %71 : vector<8x64xf32>
      %c0_46 = arith.constant 0 : index
      %c0_47 = arith.constant 0 : index
      %73 = vector.load %arg17[%c0_46, %c0_47] : memref<8x64xf32, #tpu.memory_space<vmem>>, vector<8x64xf32>
      tpu.vector_store %arg17[%c0_46, %c0_47], %72 {strides = array<i32>} : memref<8x64xf32, #tpu.memory_space<vmem>>, vector<8x64xf32>,
      %cst_48 = arith.constant 0.000000e+00 : f32
      %74 = vector.broadcast %cst_48 : f32 to vector<8x64xf32>
      %c0_49 = arith.constant 0 : index
      %c0_50 = arith.constant 0 : index
      %75 = vector.load %arg18[%c0_49, %c0_50] : memref<8x64xf32, #tpu.memory_space<vmem>>, vector<8x64xf32>
      tpu.vector_store %arg18[%c0_49, %c0_50], %74 {strides = array<i32>} : memref<8x64xf32, #tpu.memory_space<vmem>>, vector<8x64xf32>,
    } else {
    }
    %c0 = arith.constant 0 : index
    %c0_1 = arith.constant 0 : index
    %3 = vector.load %arg17[%c0, %c0_1] : memref<8x64xf32, #tpu.memory_space<vmem>>, vector<8x64xf32>
    %4 = arith.truncf %3 : vector<8x64xf32> to vector<8x64xbf16>
    %c0_2 = arith.constant 0 : index
    %c0_3 = arith.constant 0 : index
    %5 = vector.load %arg11[%c0_2, %c0_3] : memref<64x128xbf16, #tpu.memory_space<vmem>>, vector<64x128xbf16>
    %cst = arith.constant dense<0.000000e+00> : vector<8x128xf32>
    %6 = tpu.matmul %4, %5, %cst {dimension_numbers = #tpu.dot_dimension_numbers<[1], [0], [0], [1], [0, 0, 1, 1], [], []>} : vector<8x64xbf16>, vector<64x128xbf16>, vector<8x128xf32> -> vector<8x128xf32>
    %c0_4 = arith.constant 0 : index
    %c0_5 = arith.constant 0 : index
    %7 = vector.load %arg12[%c0_4, %c0_5] : memref<1x128xf32, #tpu.memory_space<vmem>>, vector<1x128xf32>
    %8 = vector.broadcast %7 : vector<1x128xf32> to vector<8x128xf32>
    %9 = arith.addf %6, %8 : vector<8x128xf32>
    %cst_6 = arith.constant 5.000000e-01 : f32
    %10 = vector.broadcast %cst_6 : f32 to vector<8x128xf32>
    %11 = arith.mulf %10, %9 : vector<8x128xf32>
    %cst_7 = arith.constant 4.471500e-02 : f32
    %12 = vector.broadcast %cst_7 : f32 to vector<8x128xf32>
    %13 = arith.mulf %12, %9 : vector<8x128xf32>
    %14 = arith.mulf %13, %9 : vector<8x128xf32>
    %15 = arith.mulf %14, %9 : vector<8x128xf32>
    %16 = arith.addf %9, %15 : vector<8x128xf32>
    %cst_8 = arith.constant 0.797884583 : f32
    %17 = vector.broadcast %cst_8 : f32 to vector<8x128xf32>
    %18 = arith.mulf %17, %16 : vector<8x128xf32>
    %19 = math.tanh %18 : vector<8x128xf32>
    %cst_9 = arith.constant 1.000000e+00 : f32
    %20 = vector.broadcast %cst_9 : f32 to vector<8x128xf32>
    %21 = arith.addf %20, %19 : vector<8x128xf32>
    %22 = arith.mulf %11, %21 : vector<8x128xf32>
    %c0_10 = arith.constant 0 : index
    %c0_11 = arith.constant 0 : index
    %23 = vector.load %arg18[%c0_10, %c0_11] : memref<8x64xf32, #tpu.memory_space<vmem>>, vector<8x64xf32>
    %24 = arith.truncf %22 : vector<8x128xf32> to vector<8x128xbf16>
    %c0_12 = arith.constant 0 : index
    %c0_13 = arith.constant 0 : index
    %25 = vector.load %arg13[%c0_12, %c0_13] : memref<128x64xbf16, #tpu.memory_space<vmem>>, vector<128x64xbf16>
    %cst_14 = arith.constant dense<0.000000e+00> : vector<8x64xf32>
    %26 = tpu.matmul %24, %25, %cst_14 {dimension_numbers = #tpu.dot_dimension_numbers<[1], [0], [0], [1], [0, 0, 1, 1], [], []>} : vector<8x128xbf16>, vector<128x64xbf16>, vector<8x64xf32> -> vector<8x64xf32>
    %27 = arith.addf %23, %26 : vector<8x64xf32>
    %c0_15 = arith.constant 0 : index
    %c0_16 = arith.constant 0 : index
    %28 = vector.load %arg18[%c0_15, %c0_16] : memref<8x64xf32, #tpu.memory_space<vmem>>, vector<8x64xf32>
    tpu.vector_store %arg18[%c0_15, %c0_16], %27 {strides = array<i32>} : memref<8x64xf32, #tpu.memory_space<vmem>>, vector<8x64xf32>,
    %c1_i32 = arith.constant 1 : i32
    %29 = arith.cmpi eq, %arg2, %c1_i32 : i32
    %30 = arith.extui %29 : i1 to i32
    %c0_i32_17 = arith.constant 0 : i32
    %31 = arith.cmpi ne, %30, %c0_i32_17 : i32
    scf.if %31 {
      %c0_18 = arith.constant 0 : index
      %c0_19 = arith.constant 0 : index
      %32 = vector.load %arg16[%c0_18, %c0_19] : memref<8x64xf32, #tpu.memory_space<vmem>>, vector<8x64xf32>
      %c0_20 = arith.constant 0 : index
      %c0_21 = arith.constant 0 : index
      %c0_22 = arith.constant 0 : index
      %33 = vector.load %arg8[%c0_20, %c0_21, %c0_22] : memref<1x1x64xf32, #tpu.memory_space<vmem>>, vector<1x1x64xf32>
      %34 = vector.shape_cast %33 : vector<1x1x64xf32> to vector<1x64xf32>
      %c0_23 = arith.constant 0 : index
      %c0_24 = arith.constant 0 : index
      %35 = vector.load %arg18[%c0_23, %c0_24] : memref<8x64xf32, #tpu.memory_space<vmem>>, vector<8x64xf32>
      %c0_25 = arith.constant 0 : index
      %c0_26 = arith.constant 0 : index
      %36 = vector.load %arg14[%c0_25, %c0_26] : memref<1x64xf32, #tpu.memory_space<vmem>>, vector<1x64xf32>
      %37 = vector.broadcast %36 : vector<1x64xf32> to vector<8x64xf32>
      %38 = arith.addf %35, %37 : vector<8x64xf32>
      %39 = vector.broadcast %34 : vector<1x64xf32> to vector<8x64xf32>
      %40 = arith.mulf %39, %38 : vector<8x64xf32>
      %41 = arith.addf %32, %40 : vector<8x64xf32>
      %c0_27 = arith.constant 0 : index
      %c0_28 = arith.constant 0 : index
      %c0_29 = arith.constant 0 : index
      %42 = vector.load %arg15[%c0_27, %c0_28, %c0_29] : memref<1x8x64xf32, #tpu.memory_space<vmem>>, vector<1x8x64xf32>
      %43 = vector.shape_cast %42 : vector<1x8x64xf32> to vector<8x64xf32>
      %44 = vector.shape_cast %41 : vector<8x64xf32> to vector<1x8x64xf32>
      tpu.vector_store %arg15[%c0_27, %c0_28, %c0_29], %44 {strides = array<i32>} : memref<1x8x64xf32, #tpu.memory_space<vmem>>, vector<1x8x64xf32>,
    } else {
    }
    return
  }
  func.func @transform_0(%arg0: i32, %arg1: i32, %arg2: i32) -> (i32, i32, i32) {
    %c0_i32 = arith.constant 0 : i32
    %c0_i32_0 = arith.constant 0 : i32
    return %arg0, %arg1, %c0_i32 : i32, i32, i32
  }
  func.func @transform_1(%arg0: i32, %arg1: i32, %arg2: i32) -> (i32, i32, i32) {
    %c0_i32 = arith.constant 0 : i32
    %c0_i32_0 = arith.constant 0 : i32
    return %arg0, %arg1, %c0_i32 : i32, i32, i32
  }
  func.func @transform_2(%arg0: i32, %arg1: i32, %arg2: i32) -> (i32, i32, i32) {
    %c0_i32 = arith.constant 0 : i32
    %c0_i32_0 = arith.constant 0 : i32
    %c0_i32_1 = arith.constant 0 : i32
    return %arg0, %c0_i32, %c0_i32_0 : i32, i32, i32
  }
  func.func @transform_3(%arg0: i32, %arg1: i32, %arg2: i32) -> (i32, i32, i32) {
    %c0_i32 = arith.constant 0 : i32
    %c0_i32_0 = arith.constant 0 : i32
    %c0_i32_1 = arith.constant 0 : i32
    return %arg0, %c0_i32, %c0_i32_0 : i32, i32, i32
  }
  func.func @transform_4(%arg0: i32, %arg1: i32, %arg2: i32) -> (i32, i32, i32) {
    %c0_i32 = arith.constant 0 : i32
    %c0_i32_0 = arith.constant 0 : i32
    %c0_i32_1 = arith.constant 0 : i32
    return %arg0, %c0_i32, %c0_i32_0 : i32, i32, i32
  }
  func.func @transform_5(%arg0: i32, %arg1: i32, %arg2: i32) -> (i32, i32, i32) {
    %c0_i32 = arith.constant 0 : i32
    %c0_i32_0 = arith.constant 0 : i32
    %c0_i32_1 = arith.constant 0 : i32
    return %arg0, %c0_i32, %c0_i32_0 : i32, i32, i32
  }
  func.func @transform_6(%arg0: i32, %arg1: i32, %arg2: i32) -> (i32, i32) {
    %c0_i32 = arith.constant 0 : i32
    %c0_i32_0 = arith.constant 0 : i32
    %c0_i32_1 = arith.constant 0 : i32
    return %c0_i32, %c0_i32_0 : i32, i32
  }
  func.func @transform_7(%arg0: i32, %arg1: i32, %arg2: i32) -> (i32, i32) {
    %c0_i32 = arith.constant 0 : i32
    %c0_i32_0 = arith.constant 0 : i32
    %c0_i32_1 = arith.constant 0 : i32
    return %c0_i32, %c0_i32_0 : i32, i32
  }
  func.func @transform_8(%arg0: i32, %arg1: i32, %arg2: i32) -> (i32, i32) {
    %c0_i32 = arith.constant 0 : i32
    %c0_i32_0 = arith.constant 0 : i32
    return %c0_i32, %arg2 : i32, i32
  }
  func.func @transform_9(%arg0: i32, %arg1: i32, %arg2: i32) -> (i32, i32) {
    %c0_i32 = arith.constant 0 : i32
    %c0_i32_0 = arith.constant 0 : i32
    return %c0_i32, %arg2 : i32, i32
  }
  func.func @transform_10(%arg0: i32, %arg1: i32, %arg2: i32) -> (i32, i32) {
    %c0_i32 = arith.constant 0 : i32
    %c0_i32_0 = arith.constant 0 : i32
    return %arg2, %c0_i32 : i32, i32
  }
  func.func @transform_11(%arg0: i32, %arg1: i32, %arg2: i32) -> (i32, i32) {
    %c0_i32 = arith.constant 0 : i32
    %c0_i32_0 = arith.constant 0 : i32
    %c0_i32_1 = arith.constant 0 : i32
    return %c0_i32, %c0_i32_0 : i32, i32
  }
  func.func @transform_12(%arg0: i32, %arg1: i32, %arg2: i32) -> (i32, i32, i32) {
    %c0_i32 = arith.constant 0 : i32
    %c0_i32_0 = arith.constant 0 : i32
    return %arg0, %arg1, %c0_i32 : i32, i32, i32
  }
}

</mosaic_0001>

<bundles_post_ra>
// kernel: double_stream_block.7
= control target key start
LH: loop header
LB: loop body
LE: loop exit
PB: predicated region body
PF: predicated region fallthrough
CT: control target
= control target key end

     0   :  { %s531_s12 = smov 0   ;;  %s533_s13 = smov 0   ;;  %s591_s0 = inlined_call_operand.vmem [shape: f32[2,64], index: 0, kind: input, shape index: {}]   ;;  %s592_s1 = inlined_call_operand.vmem [shape: bf16[64,384], index: 1, kind: input, shape index: {}]   ;;  %s593_s2 = inlined_call_operand.vmem [shape: f32[1,384], index: 2, kind: input, shape index: {}]   ;;  %s594_s3 = inlined_call_operand.vmem [shape: f32[2,384], index: 3, kind: output, shape index: {}]  }
   0x1   :  { %s535_s14 = smov 0  }
   0x2 LB: > { %s416_s15 = sadd.s32 4294967295, %s507_s14   ;;  %s548_s16 = sadd.s32 1, %s507_s14   ;;  %s507_s14 = sphi %s535_s14, %s597_s14   ;;  %s503_s13 = sphi %s533_s13, %s596_s13   ;;  %s499_s12 = sphi %s531_s12, %s595_s12  }
   0x3   : > { %s38_s17 = ssub.s32 %s507_s14, %s548_s16  ;;  %s41_s18 = sadd.s32 1, %s503_s13 }
   0x4   : > { %p39_p0 = scmp.eq.s32.totalorder %s38_s17, 0  ;;  %p48_p1 = scmp.ne.s32.totalorder %s503_s13, %s499_s12 }
   0x5   : > { %p49_p2 = scmp.eq.s32.totalorder %s507_s14, 0  ;;  %p419_p4 = scmp.ge.s32.totalorder %s507_s14, 3 }
   0x6   : > { %s557_s19 = scalar_select %p39_p0, %s503_s13, %s41_s18  }
   0x7   : > { %p50_p3 = por %p49_p2, %p48_p1  ;;  %129 = sbr.rel (%p419_p4) target bundleno = 21 (0x15), region = 20 }
   0xc   : > { %132 = sbr.rel (!%p50_p3) target bundleno = 21 (0x15), region = 24  ;;  %s134_s20 = sand.u32 (%p50_p3), 1, %s503_s13  }
   0xd   : > { %s421_s21 = sshll.u32 (%p50_p3), %s507_s14, 2  ;;  %s420_s22 = sshll.u32 (%p50_p3), %s134_s20, 5 }
   0xe   : > { %s138_s25 = scalar_lea.vmem (%p50_p3), %s592_s1, %s421_s21  ;;  %s136_s26 = scalar_lea.vmem (%p50_p3), [#allocation2], %s420_s22 }
   0xf   : > { %v155_v0 = vld [vmem:[%s138_s25] sm:$0xf] (%p50_p3)  ;;  %v157_v1 = vld [vmem:[%s138_s25 + $0xc] sm:$0xf] (%p50_p3)  ;;  %v159_v2 = vld [vmem:[%s138_s25 + $0x18] sm:$0xf] (%p50_p3) }
  0x10   : > { %156 = vst [vmem:[%s136_s26] sm:$0xf] (%p50_p3), %v155_v0  ;;  %158 = vst [vmem:[%s136_s26 + $0x4] sm:$0xf] (%p50_p3), %v157_v1  ;;  %v161_v3 = vld [vmem:[%s138_s25 + $0x24] sm:$0xf] (%p50_p3) }
  0x11   : > { %v163_v4 = vld [vmem:[%s138_s25 + $0x30] sm:$0xf]  ;;  %160 = vst [vmem:[%s136_s26 + $0x8] sm:$0xf] %v159_v2  ;;  %162 = vst [vmem:[%s136_s26 + $0xc] sm:$0xf] %v161_v3 }
  0x12   : > { %164 = vst [vmem:[%s136_s26 + $0x10] sm:$0xf] %v163_v4  ;;  %v165_v5 = vld [vmem:[%s138_s25 + $0x3c] sm:$0xf]  ;;  %v167_v6 = vld [vmem:[%s138_s25 + $0x48] sm:$0xf] }
  0x13   : > { %v169_v7 = vld [vmem:[%s138_s25 + $0x54] sm:$0xf]  ;;  %166 = vst [vmem:[%s136_s26 + $0x14] sm:$0xf] %v165_v5  ;;  %168 = vst [vmem:[%s136_s26 + $0x18] sm:$0xf] %v167_v6 }
  0x14   : > { %170 = vst [vmem:[%s136_s26 + $0x1c] sm:$0xf] %v169_v7 }
  0x15 PF: > { %p422_p5 = scmp.ge.s32.totalorder %s507_s14, 1  ;;  %p215_p6 = scmp.lt.s32.totalorder %s507_s14, 4 }
  0x17   : > { %p216_p7 = pnand %p422_p5, %p215_p6 }
  0x18   : > { %s222_s27 = sand.u32 (!%p216_p7), 1, %s499_s12   ;;  %p247_p8 = scmp.lt.s32.totalorder (!%p216_p7), %s416_s15, 2 }
  0x19   : > { %219 = sbr.rel (%p216_p7) target bundleno = 266 (0x10a), region = 69  ;;  %s423_s30 = sshll.u32 (!%p216_p7), %s222_s27, 5 }
  0x1a   : > { %s224_s4 = scalar_lea.vmem (!%p216_p7), [#allocation2], %s423_s30 }
  0x1e   : > { %v255_v8 = vld [vmem:[%s591_s0] sm:$0x3]  ;;  %v509_v9 = vmov 0.0   ;;  %vm510_vm0 = vmmov 0   ;;  %v477_v11 = vld [vmem:[%s224_s4 + $0x18] sm:$0xff]   ;;  %v478_v12 = vld [vmem:[%s224_s4 + $0x10] sm:$0xff]  }
  0x1f   : > { %439 = vmatprep.subr.bf16.mxu0 %v509_v9  ;;  %447 = vmatprep.mubr.msk.bf16.mxu0 %vm510_vm0, %v509_v9  ;;  %v425_v10 = vmul.f32 -1.442695, %v255_v8  ;;  %v479_v13 = vld [vmem:[%s224_s4 + $0x8] sm:$0xff]   ;;  %v480_v14 = vld [vmem:[%s224_s4] sm:$0xff]   ;;  %vm303_vm1 = vcmask 523264   ;;  %s599_s15 = smov (!%p247_p8, %s416_s15), 2 }
  0x20   : > { %440 = vmatpush3.bf16.msra.mxu0 %v477_v11  ;;  %s249_s7 = scalar_lea.vmem %s593_s2, %s599_s15  ;;  %s424_s8 = sshll.u32 %s599_s15, 1 }
  0x21   : > { %481 = vpow2.f32 %v425_v10  ;;  %441 = vmatprep.subr.bf16.mxu0 %v509_v9  ;;  %v426_v20 = vld [vmem:[%s249_s7] ss:$0 sm:$0xff]  ;;  %s253_s11 = scalar_lea.vmem %s594_s3, %s424_s8 }
  0x24   : > { %442 = vmatpush3.bf16.msra.mxu0 %v478_v12 }
  0x25   : > { %443 = vmatprep.subr.bf16.mxu0 %v509_v9 }
  0x28   : > { %444 = vmatpush3.bf16.msra.mxu0 %v479_v13 }
  0x29   : > { %445 = vmatprep.subr.bf16.mxu0 %v509_v9 }
  0x2c   : > { %446 = vmatpush3.bf16.msra.mxu0 %v480_v14 }
  0x2e   : > { %v482_v15 = vpop.eup %481 }
  0x2f   : > { %v259_v16 = vadd.f32 1.0, %v482_v15 }
  0x31   : > { %483 = vrcp.f32 %v259_v16 }
  0x3e   : > { %v484_v17 = vpop.eup %483 }
  0x3f   : > { %v262_v18 = vmul.f32 %v484_v17, %v255_v8 }
  0x41   : > { %v263_v19 = vpack.c.bf16 %v262_v18, %v262_v18 }
  0x43   : > { %448 = vmatmul.mubr.msk.bf16.vlgmr.msra.gmra.mxu0 %vm303_vm1, %v263_v19 }
 0x103   : > { %v341_v21 = vpop.f32.mrf.mxu0 }
 0x104   : > { %v342_v22 = vadd.f32 %v426_v20, %v341_v21 }
 0x105   : > { %v449_v23 = vpop.f32.mrf.mxu0 }
 0x106   : > { %347 = vst [vmem:[%s253_s11] sm:$0x3] %v342_v22 }
 0x107   : > { %v344_v24 = vpop.f32.mrf.mxu0 }
 0x109   : > { %v450_v25 = vpop.f32.mrf.mxu0 }
 0x10a PF: > { %p10_p9 = scmp.ge.s32.totalorder %s548_s16, 5   ;;  %s595_s12 = smov %s503_s13 }
 0x10b   : > { %s596_s13 = smov %s557_s19  ;;  %s597_s14 = smov %s548_s16 }
 0x10c   :  { %12 = sbr.rel (!%p10_p9) target bundleno = 2 (0x2), region = 111 }

// kernel: double_stream_block.9
= control target key start
LH: loop header
LB: loop body
LE: loop exit
PB: predicated region body
PF: predicated region fallthrough
CT: control target
= control target key end

     0   :  { %s802_s18 = smov 0   ;;  %s804_s19 = smov 0   ;;  %s899_s0 = inlined_call_operand.vmem [shape: f32[2,24,64], index: 0, kind: input, shape index: {}]   ;;  %s900_s1 = inlined_call_operand.vmem [shape: f32[2,1,64], index: 1, kind: input, shape index: {}]   ;;  %s901_s2 = inlined_call_operand.vmem [shape: f32[2,1,64], index: 2, kind: input, shape index: {}]   ;;  %s902_s3 = inlined_call_operand.vmem [shape: bf16[64,192], index: 3, kind: input, shape index: {}]   ;;  %s903_s4 = inlined_call_operand.vmem [shape: f32[1,192], index: 4, kind: input, shape index: {}]   ;;  %s904_s5 = inlined_call_operand.vmem [shape: bf16[2,24,192], index: 5, kind: output, shape index: {}]  }
   0x1   :  { %s806_s20 = smov 0   ;;  %s808_s21 = smov 0  }
   0x2   :  { %s810_s22 = smov 0  }
   0x3 LB: > { %s27_s23 = sadd.s32 1, %s761_s20  ;;  %s30_s24 = sadd.s32 1, %s765_s21  ;;  %s769_s22 = sphi %s810_s22, %s15_s22   ;;  %s765_s21 = sphi %s808_s21, %s908_s21   ;;  %s761_s20 = sphi %s806_s20, %s907_s20   ;;  %s757_s19 = sphi %s804_s19, %s906_s19   ;;  %s753_s18 = sphi %s802_s18, %s905_s18  }
   0x4   : > { %p28_p0 = scmp.ge.s32.totalorder %s27_s23, 3  ;;  %p656_p1 = scmp.ge.s32.totalorder %s769_s22, 1 }
   0x5   : > { %p252_p2 = scmp.lt.s32.totalorder %s769_s22, 7 }
   0x6   : > { %s910_s23 = smov (%p28_p0, %s27_s23), 0  ;;  %s912_s24 = smov (!%p28_p0, %s30_s24), %s765_s21 }
   0x7   : > { %p253_p3 = pnand %p656_p1, %p252_p2  ;;  %p32_p4 = scmp.ge.s32.totalorder %s912_s24, 2 }
   0x8   : > { %p306_p5 = scmp.lt.s32.totalorder (!%p253_p3), %s757_s19, 1  ;;  %p308_p6 = scmp.lt.s32.totalorder (!%p253_p3), %s753_s18, 2 }
   0x9   : > { %s914_s24 = smov (%p32_p4, %s912_s24), 0  ;;  %256 = sbr.rel (%p253_p3) target bundleno = 531 (0x213), region = 40 }
   0xe   : > { %s916_s19 = smov (!%p306_p5, %s757_s19), 1  ;;  %s918_s18 = smov (!%p308_p6, %s753_s18), 2  ;;  %vm347_vm0 = vcmask 523264   ;;  %v717_v7 = vld [vmem:[%s902_s3 + $0x34] ss:$8 sps:$4 sm:$0xff]   ;;  %v771_v11 = vmov 0   ;;  %v365_v19 = vlaneseq }
   0xf   : > { %s674_s25 = smul.u32 3, %s916_s19  ;;  %v719_v8 = vld [vmem:[%s902_s3 + $0x30] ss:$8 sps:$4 sm:$0xff]   ;;  %v720_v9 = vld [vmem:[%s902_s3 + $0x24] ss:$8 sps:$4 sm:$0xff]   ;;  %451 = vmatprep.subr.bf16.mxu0 %v717_v7  ;;  %475 = vmatprep.mubr.bf16.mxu0 %v771_v11  ;;  %s316_s6 = scalar_lea.vmem %s900_s1, %s916_s19  ;;  %vm492_vm1 = vcmask 1043456  }
  0x10   : > { %452 = vmatpush1.bf16.msra.mxu0 %v719_v8  ;;  %v722_v10 = vld [vmem:[%s902_s3 + $0x20] ss:$8 sps:$4 sm:$0xff]   ;;  %v723_v12 = vld [vmem:[%s902_s3 + $0x14] ss:$8 sps:$4 sm:$0xff]   ;;  %v725_v13 = vld [vmem:[%s902_s3 + $0x10] ss:$8 sps:$4 sm:$0xff]   ;;  %s319_s9 = scalar_lea.vmem %s901_s2, %s916_s19 }
  0x11   : > { %s311_s26 = sadd.s32 %s674_s25, %s918_s18  ;;  %453 = vmatprep.subr.bf16.mxu0 %v720_v9  ;;  %v726_v14 = vld [vmem:[%s902_s3 + $0x4] ss:$8 sps:$4 sm:$0xff]   ;;  %v728_v15 = vld [vmem:[%s902_s3] ss:$8 sps:$4 sm:$0xff]   ;;  %v366_v20 = vshrl.u32 %v365_v19, 7  ;;  %s675_s10 = smul.u32 6, %s916_s19 }
  0x12   : > { %s657_s27 = sshll.u32 %s311_s26, 3  ;;  %v362_v21 = vld [vmem:[%s316_s6] sm:$0x1]  ;;  %s658_s11 = sshll.u32 %s918_s18, 1  ;;  %vm493_vm2 = vcmask 523268  }
  0x13   : > { %s313_s30 = scalar_lea.vmem %s899_s0, %s657_s27  ;;  %v363_v22 = vadd.f32 1.0, %v362_v21  ;;  %v367_v23 = vsub.s32 0, %v366_v20  ;;  %v660_v27 = vld [vmem:[%s319_s9] ss:$0 sm:$0xff]  ;;  %v396_v31 = vsub.s32 1, %v366_v20  ;;  %s341_s14 = sadd.s32 %s675_s10, %s658_s11  ;;  %vm494_vm3 = vmor %vm493_vm2, %vm492_vm1 }
  0x14   : > { %v346_v0 = vld [vmem:[%s313_s30] sm:$0xff]  ;;  %454 = vmatpush1.bf16.msra.mxu0 %v722_v10  ;;  %s659_s15 = sshll.u32 %s341_s14, 2 }
  0x15   : > { %v348_v1 = vsel %vm347_vm0, %v346_v0, 0.0  ;;  %455 = vmatprep.subr.bf16.mxu0 %v723_v12  ;;  %v368_v24 = vrot.slane %v363_v22, %v367_v23  ;;  %v388_v32 = vld [vmem:[%s903_s4] sm:$0x3]  ;;  %s343_s19 = scalar_lea.vmem %s904_s5, %s659_s15 }
  0x16   : > { %349 = vadd.xlane.f32.xlu0 %v348_v1  ;;  %v393_v33 = vrot.slane %v388_v32, %v367_v23  ;;  %v397_v34 = vrot.slane %v388_v32, %v396_v31 }
  0x18   : > { %456 = vmatpush1.bf16.msra.mxu0 %v725_v13 }
  0x19   : > { %457 = vmatprep.subr.bf16.mxu0 %v726_v14 }
  0x1c   : > { %458 = vmatpush1.bf16.msra.mxu0 %v728_v15 }
  0x9f   : > { %v350_v2 = vpop.xlane.xlu0 %349 }
  0xa0   : > { %v352_v3 = vmul.f32 0.015625, %v350_v2 }
  0xa2   : > { %v353_v4 = vsub.f32 %v346_v0, %v352_v3 }
  0xa4   : > { %v354_v5 = vmul.f32 %v353_v4, %v353_v4 }
  0xa6   : > { %v355_v6 = vsel %vm347_vm0, %v354_v5, 0.0 }
  0xa7   : > { %356 = vadd.xlane.f32.xlu0 %v355_v6 }
 0x130   : > { %v357_v16 = vpop.xlane.xlu0 %356 }
 0x131   : > { %v358_v17 = vmul.f32 0.015625, %v357_v16 }
 0x133   : > { %v359_v18 = vadd.f32 1e-06, %v358_v17 }
 0x135   : > { %729 = vrsqrt.f32 %v359_v18 }
 0x142   : > { %v730_v25 = vpop.eup %729 }
 0x143   : > { %v361_v26 = vmul.f32 %v730_v25, %v353_v4 }
 0x145   : > { %v370_v28 = vmul.f32 %v368_v24, %v361_v26 }
 0x147   : > { %v378_v29 = vadd.f32 %v660_v27, %v370_v28 }
 0x149   : > { %v379_v30 = vpack.c.bf16 %v378_v29, %v378_v29 }
 0x14b   : > { %669 = vmatmul.mubr.msk.bf16.vlgmr.msra.gmra.mxu0 %vm347_vm0, %v379_v30 }
 0x20b   : > { %v477_v35 = vpop.f32.mrf.mxu0 }
 0x20c   : > { %v478_v37 = vadd.f32 %v477_v35, %v393_v33 }
 0x20d   : > { %v479_v36 = vpop.f32.mrf.mxu0 }
 0x20e   : > { %v480_v38 = vadd.f32 %v479_v36, %v397_v34 }
 0x20f   : > { %v481_v39 = vpop.f32.mrf.mxu0 }
 0x210   : > { %v673_v40 = vpack.c.bf16 %v480_v38, %v478_v37 }
 0x211   : > { %v482_v41 = vpop.f32.mrf.mxu0 }
 0x212   : > { %495 = vst.msk [vmem:[%s343_s19] sm:$0xff] %vm494_vm3, %v673_v40 }
 0x213 PF: > { %s15_s22 = sadd.s32 1, %s769_s22   ;;  %s905_s18 = smov %s761_s20 }
 0x214   : > { %p12_p7 = scmp.ge.s32.totalorder %s15_s22, 8   ;;  %s906_s19 = smov %s765_s21 }
 0x215   : > { %s907_s20 = smov %s910_s23  ;;  %s908_s21 = smov %s914_s24 }
 0x216   :  { %14 = sbr.rel (!%p12_p7) target bundleno = 3 (0x3), region = 82 }

// kernel: double_stream_block.10
= control target key start
LH: loop header
LB: loop body
LE: loop exit
PB: predicated region body
PF: predicated region fallthrough
CT: control target
= control target key end

     0   :  { %s760_s18 = smov 0   ;;  %s762_s19 = smov 0   ;;  %s838_s0 = inlined_call_operand.vmem [shape: f32[2,8,64], index: 0, kind: input, shape index: {}]   ;;  %s839_s1 = inlined_call_operand.vmem [shape: f32[2,1,64], index: 1, kind: input, shape index: {}]   ;;  %s840_s2 = inlined_call_operand.vmem [shape: f32[2,1,64], index: 2, kind: input, shape index: {}]   ;;  %s841_s3 = inlined_call_operand.vmem [shape: bf16[64,192], index: 3, kind: input, shape index: {}]   ;;  %s842_s4 = inlined_call_operand.vmem [shape: f32[1,192], index: 4, kind: input, shape index: {}]   ;;  %s843_s5 = inlined_call_operand.vmem [shape: bf16[2,8,192], index: 5, kind: output, shape index: {}]  }
   0x1   :  { %s764_s20 = smov 0  }
   0x2 LB: > { %s30_s21 = sadd.s32 1, %s723_s19  ;;  %p647_p0 = scmp.ge.s32.totalorder %s727_s20, 1  ;;  %s727_s20 = sphi %s764_s20, %s15_s20   ;;  %s723_s19 = sphi %s762_s19, %s845_s19   ;;  %s719_s18 = sphi %s760_s18, %s844_s18  }
   0x3   : > { %p32_p1 = scmp.ge.s32.totalorder %s30_s21, 2  ;;  %p251_p2 = scmp.lt.s32.totalorder %s727_s20, 3 }
   0x5   : > { %s847_s21 = smov (%p32_p1, %s30_s21), 0  ;;  %p252_p3 = pnand %p647_p0, %p251_p2 }
   0x6   : > { %p304_p4 = scmp.lt.s32.totalorder (!%p252_p3), %s719_s18, 1 }
   0x7   : > { %255 = sbr.rel (%p252_p3) target bundleno = 526 (0x20e), region = 40 }
   0xc   : > { %s849_s18 = smov (!%p304_p4, %s719_s18), 1  ;;  %vm344_vm0 = vcmask 523264   ;;  %v691_v7 = vld [vmem:[%s841_s3 + $0x34] ss:$8 sps:$4 sm:$0xff]   ;;  %v693_v8 = vld [vmem:[%s841_s3 + $0x30] ss:$8 sps:$4 sm:$0xff]   ;;  %v362_v19 = vlaneseq }
   0xd   : > { %s648_s22 = sshll.u32 %s849_s18, 3  ;;  %v694_v9 = vld [vmem:[%s841_s3 + $0x24] ss:$8 sps:$4 sm:$0xff]   ;;  %448 = vmatprep.subr.bf16.mxu0 %v691_v7  ;;  %v696_v10 = vld [vmem:[%s841_s3 + $0x20] ss:$8 sps:$4 sm:$0xff]   ;;  %v729_v11 = vmov 0   ;;  %s313_s24 = scalar_lea.vmem %s839_s1, %s849_s18 }
   0xe   : > { %s310_s25 = scalar_lea.vmem %s838_s0, %s648_s22  ;;  %449 = vmatpush1.bf16.msra.mxu0 %v693_v8  ;;  %472 = vmatprep.mubr.bf16.mxu0 %v729_v11  ;;  %v697_v12 = vld [vmem:[%s841_s3 + $0x14] ss:$8 sps:$4 sm:$0xff]   ;;  %v699_v13 = vld [vmem:[%s841_s3 + $0x10] ss:$8 sps:$4 sm:$0xff]   ;;  %v700_v14 = vld [vmem:[%s841_s3 + $0x4] ss:$8 sps:$4 sm:$0xff]   ;;  %s316_s27 = scalar_lea.vmem %s840_s2, %s849_s18 }
   0xf   : > { %v343_v0 = vld [vmem:[%s310_s25] sm:$0xff]  ;;  %450 = vmatprep.subr.bf16.mxu0 %v694_v9  ;;  %v363_v20 = vshrl.u32 %v362_v19, 7  ;;  %vm489_vm1 = vcmask 1043456   ;;  %vm490_vm2 = vcmask 523268   ;;  %s340_s7 = scalar_lea.vmem %s843_s5, %s648_s22 }
  0x10   : > { %v345_v1 = vsel %vm344_vm0, %v343_v0, 0.0  ;;  %v702_v15 = vld [vmem:[%s841_s3] ss:$8 sps:$4 sm:$0xff]   ;;  %vm491_vm3 = vmor %vm490_vm2, %vm489_vm1 }
  0x11   : > { %346 = vadd.xlane.f32.xlu0 %v345_v1  ;;  %v359_v21 = vld [vmem:[%s313_s24] sm:$0x1]  ;;  %v364_v23 = vsub.s32 0, %v363_v20  ;;  %v393_v31 = vsub.s32 1, %v363_v20 }
  0x12   : > { %451 = vmatpush1.bf16.msra.mxu0 %v696_v10  ;;  %v360_v22 = vadd.f32 1.0, %v359_v21  ;;  %v651_v27 = vld [vmem:[%s316_s27] ss:$0 sm:$0xff] }
  0x13   : > { %452 = vmatprep.subr.bf16.mxu0 %v697_v12  ;;  %v385_v32 = vld [vmem:[%s842_s4] sm:$0x3] }
  0x14   : > { %v365_v24 = vrot.slane %v360_v22, %v364_v23  ;;  %v390_v33 = vrot.slane %v385_v32, %v364_v23  ;;  %v394_v34 = vrot.slane %v385_v32, %v393_v31 }
  0x16   : > { %453 = vmatpush1.bf16.msra.mxu0 %v699_v13 }
  0x17   : > { %454 = vmatprep.subr.bf16.mxu0 %v700_v14 }
  0x1a   : > { %455 = vmatpush1.bf16.msra.mxu0 %v702_v15 }
  0x9a   : > { %v347_v2 = vpop.xlane.xlu0 %346 }
  0x9b   : > { %v349_v3 = vmul.f32 0.015625, %v347_v2 }
  0x9d   : > { %v350_v4 = vsub.f32 %v343_v0, %v349_v3 }
  0x9f   : > { %v351_v5 = vmul.f32 %v350_v4, %v350_v4 }
  0xa1   : > { %v352_v6 = vsel %vm344_vm0, %v351_v5, 0.0 }
  0xa2   : > { %353 = vadd.xlane.f32.xlu0 %v352_v6 }
 0x12b   : > { %v354_v16 = vpop.xlane.xlu0 %353 }
 0x12c   : > { %v355_v17 = vmul.f32 0.015625, %v354_v16 }
 0x12e   : > { %v356_v18 = vadd.f32 1e-06, %v355_v17 }
 0x130   : > { %703 = vrsqrt.f32 %v356_v18 }
 0x13d   : > { %v704_v25 = vpop.eup %703 }
 0x13e   : > { %v358_v26 = vmul.f32 %v704_v25, %v350_v4 }
 0x140   : > { %v367_v28 = vmul.f32 %v365_v24, %v358_v26 }
 0x142   : > { %v375_v29 = vadd.f32 %v651_v27, %v367_v28 }
 0x144   : > { %v376_v30 = vpack.c.bf16 %v375_v29, %v375_v29 }
 0x146   : > { %660 = vmatmul.mubr.msk.bf16.vlgmr.msra.gmra.mxu0 %vm344_vm0, %v376_v30 }
 0x206   : > { %v474_v35 = vpop.f32.mrf.mxu0 }
 0x207   : > { %v475_v37 = vadd.f32 %v474_v35, %v390_v33 }
 0x208   : > { %v476_v36 = vpop.f32.mrf.mxu0 }
 0x209   : > { %v477_v38 = vadd.f32 %v476_v36, %v394_v34 }
 0x20a   : > { %v478_v39 = vpop.f32.mrf.mxu0 }
 0x20b   : > { %v665_v40 = vpack.c.bf16 %v477_v38, %v475_v37 }
 0x20c   : > { %v479_v41 = vpop.f32.mrf.mxu0 }
 0x20d   : > { %492 = vst.msk [vmem:[%s340_s7] sm:$0xff] %vm491_vm3, %v665_v40 }
 0x20e PF: > { %s15_s20 = sadd.s32 1, %s727_s20   ;;  %s844_s18 = smov %s723_s19 }
 0x20f   : > { %p12_p5 = scmp.ge.s32.totalorder %s15_s20, 4   ;;  %s845_s19 = smov %s847_s21 }
 0x211   :  { %14 = sbr.rel (!%p12_p5) target bundleno = 2 (0x2), region = 82 }

// kernel: double_stream_block.11
= control target key start
LH: loop header
LB: loop body
LE: loop exit
PB: predicated region body
PF: predicated region fallthrough
CT: control target
= control target key end

     0   :  { %s1373_s30 = smov 0   ;;  %s1375_s10 = smov 0   ;;  %s1559_s0 = inlined_call_operand.vmem [shape: bf16[2,4,32,16], index: 0, kind: input, shape index: {}]   ;;  %s1560_s1 = inlined_call_operand.vmem [shape: bf16[2,4,32,16], index: 1, kind: input, shape index: {}]   ;;  %s1561_s2 = inlined_call_operand.vmem [shape: bf16[2,4,32,16], index: 2, kind: input, shape index: {}]   ;;  %s1562_s3 = inlined_call_operand.vmem [shape: f32[32,8], index: 3, kind: input, shape index: {}, may-alias: {3,5}]   ;;  %s1563_s4 = inlined_call_operand.vmem [shape: f32[32,8], index: 4, kind: input, shape index: {}, may-alias: {4,6}]   ;;  %s1564_s5 = inlined_call_operand.vmem [shape: f32[32,8], index: 5, kind: input, shape index: {}, may-alias: {3,5}]   ;;  %s1565_s6 = inlined_call_operand.vmem [shape: f32[32,8], index: 6, kind: input, shape index: {}, may-alias: {4,6}]   ;;  %s1566_s7 = inlined_call_operand.vmem [shape: f32[32,16], index: 7, kind: input, shape index: {}]   ;;  %s1567_s8 = inlined_call_operand.vmem [shape: f32[32,16], index: 8, kind: input, shape index: {}]   ;;  %s1568_s9 = inlined_call_operand.vmem [shape: bf16[2,4,32,16], index: 9, kind: output, shape index: {}]  }
   0x1   :  { %1574 = sst [smem:[#allocation14_spill]] %s1559_s0  ;;  %s1377_s11 = smov 0  }
   0x2   :  { %s1379_s12 = smov 0   ;;  %s1381_s13 = smov 0  }
   0x3   :  { %s1383_s14 = smov 0   ;;  %s1385_s15 = smov 0  }
   0x4   :  { %s1387_s16 = smov 0   ;;  %s1389_s17 = smov 0  }
   0x5 LB: > { %1575 = sst [smem:[#allocation5_spill]] %s1297_s13  ;;  %s34_s18 = sadd.s32 1, %s1297_s13  ;;  %s1313_s17 = sphi %s1389_s17, %s19_s17   ;;  %s1309_s16 = sphi %s1387_s16, %s1596_s16   ;;  %s1305_s15 = sphi %s1385_s15, %s1595_s15   ;;  %s1301_s14 = sphi %s1383_s14, %s1594_s14   ;;  %s1297_s13 = sphi %s1381_s13, %s1593_s13   ;;  %s1293_s12 = sphi %s1379_s12, %s1592_s12   ;;  %s1289_s11 = sphi %s1377_s11, %s1591_s11   ;;  %s1285_s10 = sphi %s1375_s10, %s1590_s10   ;;  %s1281_s30 = sphi %s1373_s30, %s1589_s30  }
   0x6   : > { %1576 = sst [smem:[#allocation6_spill]] %s1301_s14  ;;  %p35_p0 = scmp.ge.s32.totalorder %s34_s18, 4 }
   0x7   : > { %1577 = sst [smem:[#allocation7_spill]] %s1305_s15  ;;  %s37_s19 = sadd.s32 1, %s1301_s14 }
   0x8   : > { %1578 = sst [smem:[#allocation8_spill]] %s1309_s16  ;;  %p1109_p1 = scmp.ge.s32.totalorder %s1313_s17, 1 }
   0x9   : > { %1579 = sst [smem:[#allocation9_spill]] %s1313_s17  ;;  %s1598_s18 = smov (%p35_p0, %s34_s18), 0 }
   0xa   : > { %1580 = sst [smem:[#allocation10_spill]] %s1598_s18  ;;  %s1600_s19 = smov (!%p35_p0, %s37_s19), %s1301_s14 }
   0xb   : > { %p424_p2 = scmp.lt.s32.totalorder %s1313_s17, 129  ;;  %p39_p3 = scmp.ge.s32.totalorder %s1600_s19, 4 }
   0xc   : > { %s41_s20 = sadd.s32 1, %s1305_s15  ;;  %s45_s21 = sadd.s32 1, %s1309_s16 }
   0xd   : > { %p425_p4 = pnand %p1109_p1, %p424_p2  ;;  %s1602_s19 = smov (%p39_p3, %s1600_s19), 0 }
   0xe   : > { %1581 = sst [smem:[#allocation11_spill]] %s1602_s19  ;;  %s1604_s20 = smov (!%p39_p3, %s41_s20), %s1305_s15 }
   0xf   : > { %p43_p5 = scmp.ge.s32.totalorder %s1604_s20, 4  ;;  %p522_p7 = scmp.lt.s32.totalorder (!%p425_p4), %s1293_s12, 1 }
  0x10   : > { %p524_p8 = scmp.lt.s32.totalorder (!%p425_p4), %s1289_s11, 3  ;;  %p526_p9 = scmp.lt.s32.totalorder (!%p425_p4), %s1285_s10, 3 }
  0x11   : > { %s1606_s20 = smov (%p43_p5, %s1604_s20), 0  ;;  %s1608_s21 = smov (!%p43_p5, %s45_s21), %s1309_s16 }
  0x12   : > { %1582 = sst [smem:[#allocation12_spill]] %s1606_s20  ;;  %p47_p6 = scmp.ge.s32.totalorder %s1608_s21, 2 }
  0x13   : > { %428 = sbr.rel (%p425_p4) target bundleno = 1272 (0x4f8), region = 56  ;;  %p538_p10 = scmp.lt.s32.totalorder (!%p425_p4), %s1281_s30, 3 }
  0x14   : > { %s1610_s21 = smov (%p47_p6, %s1608_s21), 0  ;;  %s1584_s0 = sld [smem:[#allocation14_spill]] (!%p425_p4) }
  0x15   : > { %1583 = sst [smem:[#allocation13_spill]] %s1610_s21  ;;  %p1128_p11 = scmp.ne.s32.totalorder (!%p425_p4), %s1281_s30, 0 }
  0x18   : > { %s1612_s12 = smov (!%p522_p7, %s1293_s12), 1  ;;  %s1614_s11 = smov (!%p524_p8, %s1289_s11), 3 }
  0x19   : > { %s1616_s10 = smov (!%p526_p9, %s1285_s10), 3  ;;  %s1110_s22 = sshll.u32 %s1614_s11, 2 }
  0x1a   : > { %s1111_s23 = sshll.u32 %s1612_s12, 4  ;;  %s529_s24 = sadd.s32 %s1110_s22, %s1616_s10 }
  0x1b   : > { %s1438_s25 = sshll.u32 %s1616_s10, 3  ;;  %s531_s26 = sadd.s32 %s1111_s23, %s529_s24 }
  0x1c   : > { %s1112_s21 = sshll.u32 %s531_s26, 2 }
  0x1d   : > { %s533_s11 = scalar_lea.vmem %s1584_s0, %s1112_s21  ;;  %s1461_s27 = scalar_lea.vmem %s1568_s9, %s1112_s21 }
  0x1e   : > { %s539_s13 = scalar_select %p538_p10, %s1281_s30, 3 }
  0x20   : > { %s541_s26 = sadd.s32 %s1110_s22, %s539_s13  ;;  %s1463_s28 = sshll.u32 %s539_s13, 3 }
  0x21   : > { %s543_s19 = sadd.s32 %s1111_s23, %s541_s26  ;;  %s569_s20 = scalar_lea.vmem %s1564_s5, %s1463_s28 }
  0x22   : > { %s1115_s12 = sshll.u32 %s543_s19, 2  ;;  %s573_s18 = scalar_lea.vmem %s1565_s6, %s1463_s28 }
  0x23   : > { %s545_s21 = scalar_lea.vmem %s1560_s1, %s1115_s12  ;;  %s1479_s24 = scalar_lea.vmem %s1561_s2, %s1115_s12 }
  0x24   : > { %s581_s26 = scalar_lea.vmem %s1567_s8, %s1463_s28  ;;  %598 = sbr.rel (%p1128_p11) target bundleno = 44 (0x2c), region = 60 }
  0x29   : > { %vm599_vm0 = vcmask 7168   ;;  %vm602_vm1 = vcmask 130048   ;;  %v1315_v0 = vmov -inf   ;;  %v1316_v1 = vmov 0.0  }
  0x2a   : > { %600 = vst.msk [vmem:[#allocation2] sm:$0xff] %vm599_vm0, %v1315_v0  ;;  %601 = vst.msk [vmem:[#allocation3] sm:$0xff] %vm599_vm0, %v1316_v1 }
  0x2b   : > { %603 = vst.msk [vmem:[#allocation4] sm:$0xff] %vm602_vm1, %v1316_v1 }
  0x2c PF: > { %v606_v2 = vld [vmem:[%s545_s21] sm:$0xf]  ;;  %vm609_vm2 = vcmask 130048   ;;  %s1317_s0 = smov 8   ;;  %s1585_s19 = scalar_lea.vmem %s1562_s3, %s1438_s25  ;;  %v1319_v36 = vmov 0.0   ;;  %vm1320_vm3 = vmmov 0  }
  0x2d   : > { %v604_v3 = vld [vmem:[%s533_s11] sm:$0xf]  ;;  %v607_v4 = vunpack.c.l.bf16 %v606_v2  ;;  %s1586_s16 = scalar_lea.vmem %s1563_s4, %s1438_s25  ;;  %s1587_s22 = scalar_lea.vmem %s1566_s7, %s1438_s25  ;;  %1139 = vmatprep.subr.mxu0 %v1319_v36  ;;  %1144 = vmatprep.subr.bf16.mxu1 %v1319_v36  ;;  %vm658_vm4 = vcmask 64512   ;;  %v1321_v57 = vmov 0   ;;  %vm788_vm5 = vcmask 7168  }
  0x2e   : > { %v605_v5 = vunpack.c.l.bf16 %v604_v3  ;;  %v661_v6 = vld [vmem:[%s569_s20] sm:$0xff]  ;;  %s1318_s13 = smov 120   ;;  %1141 = vmatprep.mubr.msk.f32.mxu0 %vm1320_vm3, %v1319_v36  ;;  %1146 = vmatprep.mubr.msk.bf16.mxu1 %vm1320_vm3, %v1319_v36  ;;  %vm802_vm6 = vcmask 1043456   ;;  %p1132_p12 = scmp.ne.s32.totalorder %s1281_s30, 3 }
  0x2f   : > { %676 = vrot.lane.b32.xlu1 %v661_v6, %s1317_s0  ;;  %v620_v7 = vmul.f32 %v607_v4, %v607_v4  ;;  %v630_v9 = vld [vmem:[%s1585_s19] sm:$0xff]  ;;  %1230 = vset.pattern.permute.xlu0 %v1321_v57 }
  0x30   : > { %v608_v8 = vmul.f32 %v605_v5, %v605_v5  ;;  %v631_v12 = vld [vmem:[%s1586_s16] sm:$0xff]  ;;  %1231 = vset.pattern.permute.xlu1 %v1321_v57 }
  0x31   : > { %v621_v10 = vsel %vm609_vm2, %v620_v7, 0.0  ;;  %v662_v13 = vld [vmem:[%s573_s18] sm:$0xff] }
  0x32   : > { %622 = vadd.xlane.f32.xlu0 %v621_v10  ;;  %v610_v11 = vsel %vm609_vm2, %v608_v8, 0.0  ;;  %v628_v21 = vld [vmem:[%s581_s26] sm:$0xff]  ;;  %v782_v8 = vld [vmem:[#allocation3] sm:$0xff] }
  0x33   : > { %645 = vrot.lane.b32.xlu1 %v630_v9, %s1317_s0  ;;  %v618_v26 = vld [vmem:[%s1587_s22] sm:$0xff] }
  0x34   : > { %v766_v58 = vld [vmem:[#allocation2] sm:$0xff] }
  0x35   : > { %v798_v62 = vld [vmem:[%s1479_s24] sm:$0xf] }
  0x36   : > { %611 = vadd.xlane.f32.xlu0 %v610_v11  ;;  %v804_v63 = vsel %vm802_vm6, %v798_v62, 0 }
  0x37   : > { %634 = vrot.lane.b32.xlu1 %v631_v12, %s1317_s0  ;;  %1145 = vmatpush3.bf16.msra.mxu1 %v804_v63 }
  0x4c   : > { %665 = vrot.lane.b32.xlu0 %v662_v13, %s1317_s0 }
  0xa1   : > { %v677_v23 = vpop.permute.xlu1 %676 }
  0xa5   : > { %v646_v30 = vpop.permute.xlu1 %645 }
  0xa9   : > { %v635_v34 = vpop.permute.xlu1 %634 }
  0xbb   : > { %v623_v14 = vpop.xlane.xlu0 %622 }
  0xbc   : > { %v624_v15 = vmul.f32 0.0625, %v623_v14 }
  0xbe   : > { %v625_v16 = vadd.f32 1e-06, %v624_v15 }
  0xbf   : > { %v612_v17 = vpop.xlane.xlu0 %611 }
  0xc0   : > { %1232 = vrsqrt.f32 %v625_v16  ;;  %v614_v18 = vmul.f32 0.0625, %v612_v17 }
  0xc2   : > { %v615_v19 = vadd.f32 1e-06, %v614_v18 }
  0xc3   : > { %v666_v32 = vpop.permute.xlu0 %665 }
  0xc4   : > { %1234 = vrsqrt.f32 %v615_v19 }
  0xcd   : > { %v1233_v20 = vpop.eup %1232 }
  0xce   : > { %v627_v22 = vmul.f32 %v1233_v20, %v607_v4 }
  0xd0   : > { %v629_v24 = vmul.f32 %v628_v21, %v627_v22 }
  0xd1   : > { %v1235_v25 = vpop.eup %1234 }
  0xd2   : > { %v679_v27 = vmul.f32 %v677_v23, %v629_v24  ;;  %v617_v28 = vmul.f32 %v1235_v25, %v605_v5  ;;  %v668_v33 = vmul.f32 %v666_v32, %v629_v24  ;;  %v674_v37 = vmul.f32 %v662_v13, %v629_v24 }
  0xd3   : > { %v663_v45 = vmul.f32 %v661_v6, %v629_v24 }
  0xd4   : > { %v619_v29 = vmul.f32 %v618_v26, %v617_v28  ;;  %681 = vrot.lane.b32.xlu1 %v679_v27, %s1318_s13 }
  0xd6   : > { %v648_v31 = vmul.f32 %v646_v30, %v619_v29  ;;  %v637_v35 = vmul.f32 %v635_v34, %v619_v29  ;;  %v643_v40 = vmul.f32 %v631_v12, %v619_v29  ;;  %v632_v48 = vmul.f32 %v630_v9, %v619_v29  ;;  %v790_v12 = vld [vmem:[#allocation4] sm:$0xff] }
  0xd8   : > { %650 = vrot.lane.b32.xlu1 %v648_v31, %s1318_s13 }
  0xdc   : > { %670 = vrot.lane.b32.xlu1 %v668_v33, %s1318_s13 }
  0xe0   : > { %639 = vrot.lane.b32.xlu1 %v637_v35, %s1318_s13 }
 0x146   : > { %v682_v38 = vpop.permute.xlu1 %681 }
 0x147   : > { %v684_v39 = vadd.f32 %v682_v38, %v674_v37 }
 0x149   : > { %686 = vrot.lane.b32.xlu1 %v684_v39, %s1317_s0 }
 0x14a   : > { %v651_v41 = vpop.permute.xlu1 %650 }
 0x14b   : > { %v653_v42 = vadd.f32 %v651_v41, %v643_v40 }
 0x14d   : > { %655 = vrot.lane.b32.xlu0 %v653_v42, %s1317_s0 }
 0x14e   : > { %v671_v43 = vpop.permute.xlu1 %670 }
 0x14f   : > { %v673_v46 = vsub.f32 %v663_v45, %v671_v43 }
 0x152   : > { %v640_v44 = vpop.permute.xlu1 %639 }
 0x153   : > { %v642_v50 = vsub.f32 %v632_v48, %v640_v44 }
 0x1bb   : > { %v687_v47 = vpop.permute.xlu1 %686 }
 0x1bc   : > { %v689_v49 = vsel %vm658_vm4, %v673_v46, %v687_v47 }
 0x1bd   : > { %1140 = vmatpush3.xpose.msk.msra.mxu0 %vm609_vm2, %v689_v49 }
 0x1bf   : > { %v656_v51 = vpop.permute.xlu0 %655 }
 0x1c0   : > { %v659_v52 = vsel %vm658_vm4, %v642_v50, %v656_v51 }
 0x1c1   : > { %v660_v53 = vmul.f32 0.5, %v659_v52 }
 0x1c3   : > { %1142 = vmatmul.mubr.msk.f32.vlgmr.msra.gmra.mxu0 %vm609_vm2, %v660_v53 }
 0x283   : > { %v762_v54 = vpop.f32.mrf.mxu0 }
 0x284   : > { %v767_v55 = vsel %vm658_vm4, %v762_v54, -inf }
 0x285   : > { %768 = vmax.xlane.f32.xlu1 %v767_v55  ;;  %v1143_v56 = vpop.f32.mrf.mxu0 }
 0x30e   : > { %v769_v59 = vpop.xlane.xlu1 %768 }
 0x30f   : > { %v770_v60 = vmax.f32 %v766_v58, %v769_v59 }
 0x311   : > { %v771_v61 = vsub.f32 %v766_v58, %v770_v60  ;;  %848 = vst.msk [vmem:[#allocation2] sm:$0xff] %vm788_vm5, %v770_v60  ;;  %776 = vperm.xlu0 %1230, %v770_v60  }
 0x313   : > { %v772_v0 = vmul.f32 1.442695, %v771_v61 }
 0x315   : > { %1236 = vpow2.f32 %v772_v0 }
 0x322   : > { %v1237_v1 = vpop.eup %1236 }
 0x323   : > { %793 = vperm.xlu1 %1231, %v1237_v1   ;;  %v783_v9 = vmul.f32 %v1237_v1, %v782_v8 }
 0x38c   : > { %v777_v2 = vpop.permute.xlu0 %776 }
 0x38d   : > { %v779_v3 = vsub.f32 %v762_v54, %v777_v2 }
 0x38f   : > { %v780_v4 = vmul.f32 1.442695, %v779_v3 }
 0x391   : > { %1238 = vpow2.f32 %v780_v4 }
 0x39e   : > { %v1239_v5 = vpop.eup %1238  ;;  %v794_v13 = vpop.permute.xlu1 %793 }
 0x39f   : > { %v784_v6 = vsel %vm658_vm4, %v1239_v5, 0.0  ;;  %v797_v7 = vpack.c.bf16 %v1239_v5, %v1239_v5  ;;  %v796_v14 = vmul.f32 %v794_v13, %v790_v12 }
 0x3a0   : > { %785 = vadd.xlane.f32.xlu0 %v784_v6 }
 0x3a1   : > { %1147 = vmatmul.mubr.msk.bf16.vlgmr.msra.gmra.mxu1 %vm658_vm4, %v797_v7 }
 0x429   : > { %v786_v10 = vpop.xlane.xlu0 %785 }
 0x42a   : > { %v787_v11 = vadd.f32 %v786_v10, %v783_v9 }
 0x42c   : > { %789 = vst.msk [vmem:[#allocation3] sm:$0xff] %vm788_vm5, %v787_v11 }
 0x461   : > { %v840_v15 = vpop.f32.mrf.mxu1 }
 0x462   : > { %v846_v16 = vadd.f32 %v840_v15, %v796_v14 }
 0x463   : > { %v1148_v17 = vpop.f32.mrf.mxu1  ;;  %852 = sbr.rel (%p1132_p12) target bundleno = 1272 (0x4f8), region = 64 }
 0x464   : > { %847 = vst.msk [vmem:[#allocation4] sm:$0xff] %vm609_vm2, %v846_v16 }
 0x465   : > { %v843_v18 = vpop.f32.mrf.mxu1 }
 0x467   : > { %v1149_v19 = vpop.f32.mrf.mxu1 }
 0x468   : > { %v854_v20 = vld [vmem:[#allocation3] sm:$0xff]  ;;  %v1322_v21 = vmov 0   ;;  %vm863_vm7 = vcmask 125952  }
 0x469   : > { %1240 = vset.pattern.permute.xlu0 %v1322_v21  ;;  %1241 = vrcp.f32 %v854_v20 }
 0x46b   : > { %v853_v23 = vld [vmem:[#allocation4] sm:$0xff] }
 0x476   : > { %v1242_v22 = vpop.eup %1241 }
 0x477   : > { %858 = vperm.xlu0 %1240, %v1242_v22  }
 0x4f2   : > { %v859_v24 = vpop.permute.xlu0 %858 }
 0x4f3   : > { %v861_v25 = vmul.f32 %v859_v24, %v853_v23 }
 0x4f5   : > { %v862_v26 = vpack.c.bf16 %v861_v25, %v861_v25 }
 0x4f7   : > { %864 = vst.msk [vmem:[%s1461_s27] sm:$0xf] %vm863_vm7, %v862_v26 }
 0x4f8 PF: > { %s1588_s25 = sld [smem:[#allocation9_spill]] }
 0x4f9   : > { %s1589_s30 = sld [smem:[#allocation5_spill]] }
 0x4fa   : > { %s1590_s10 = sld [smem:[#allocation6_spill]] }
 0x4fb   : > { %s1591_s11 = sld [smem:[#allocation7_spill]] }
 0x4fc   : > { %s1592_s12 = sld [smem:[#allocation8_spill]] }
 0x4fd   : > { %s1593_s13 = sld [smem:[#allocation10_spill]] }
 0x4fe   : > { %s19_s17 = sadd.s32 1, %s1588_s25   ;;  %s1594_s14 = sld [smem:[#allocation11_spill]] }
 0x4ff   : > { %p16_p13 = scmp.ge.s32.totalorder %s19_s17, 130   ;;  %s1595_s15 = sld [smem:[#allocation12_spill]] }
 0x500   : > { %s1596_s16 = sld [smem:[#allocation13_spill]] }
 0x501   :  { %18 = sbr.rel (!%p16_p13) target bundleno = 5 (0x5), region = 118 }

// kernel: double_stream_block.13
= control target key start
LH: loop header
LB: loop body
LE: loop exit
PB: predicated region body
PF: predicated region fallthrough
CT: control target
= control target key end

     0   :  { %s1869_s0 = inlined_call_operand.vmem [shape: f32[2,8,64], index: 0, kind: input, shape index: {}]   ;;  %s1870_s1 = inlined_call_operand.vmem [shape: bf16[2,8,64], index: 1, kind: input, shape index: {}]   ;;  %s1871_s2 = inlined_call_operand.vmem [shape: f32[2,1,64], index: 2, kind: input, shape index: {}]   ;;  %s1872_s3 = inlined_call_operand.vmem [shape: f32[2,1,64], index: 3, kind: input, shape index: {}]   ;;  %s1873_s4 = inlined_call_operand.vmem [shape: f32[2,1,64], index: 4, kind: input, shape index: {}]   ;;  %s1874_s5 = inlined_call_operand.vmem [shape: f32[2,1,64], index: 5, kind: input, shape index: {}]   ;;  %s1875_s6 = inlined_call_operand.vmem [shape: bf16[64,64], index: 6, kind: input, shape index: {}]   ;;  %s1876_s7 = inlined_call_operand.vmem [shape: f32[1,64], index: 7, kind: input, shape index: {}]   ;;  %s1877_s8 = inlined_call_operand.vmem [shape: bf16[64,256], index: 8, kind: input, shape index: {}]   ;;  %s1878_s9 = inlined_call_operand.vmem [shape: f32[1,256], index: 9, kind: input, shape index: {}]   ;;  %s1879_s10 = inlined_call_operand.vmem [shape: bf16[256,64], index: 10, kind: input, shape index: {}]   ;;  %s1880_s11 = inlined_call_operand.vmem [shape: f32[1,64], index: 11, kind: input, shape index: {}]   ;;  %s1881_s12 = inlined_call_operand.hbm [shape: f32[2,8,64], index: 12, kind: output, shape index: {}]  }
   0x1   :  { %1899 = sst [smem:[#allocation23_spill]] %s1869_s0 }
   0x2   :  { %1900 = sst [smem:[#allocation24_spill]] %s1875_s6 }
   0x3   :  { %1901 = sst [smem:[#allocation25_spill]] %s1876_s7 }
   0x4   :  { %1902 = sst [smem:[#allocation26_spill]] %s1877_s8 }
   0x5   :  { %1903 = sst [smem:[#allocation27_spill]] %s1880_s11 }
   0x6   :  { %1904 = sst [smem:[#allocation28_spill]] %s1881_s12 }
   0x7   :  { %17 = vsyncpa [#allocation7], 0 }
   0x8   :  { %19 = vsyncpa [#allocation7 + $0x1], 0  ;;  %s1590_s21 = smov 0   ;;  %s1592_s22 = smov 0  }
   0x9   :  { %s1594_s23 = smov 0   ;;  %s1596_s24 = smov 0  }
   0xa   :  { %s1598_s25 = smov 0   ;;  %s1600_s26 = smov 0  }
   0xb   :  { %s1602_s27 = smov 0   ;;  %s1604_s28 = smov 0  }
   0xc   :  { %s1606_s29 = smov 0   ;;  %s1608_s30 = smov 0  }
   0xd LB: > { %1905 = sst [smem:[#allocation9_spill]] %s1482_s21  ;;  %s1193_s13 = sadd.s32 4294967295, %s1518_s30   ;;  %s1518_s30 = sphi %s1608_s30, %s25_s30   ;;  %s1514_s29 = sphi %s1606_s29, %s1946_s29   ;;  %s1510_s28 = sphi %s1604_s28, %s1945_s28   ;;  %s1506_s27 = sphi %s1602_s27, %s1944_s27   ;;  %s1502_s26 = sphi %s1600_s26, %s1943_s26   ;;  %s1498_s25 = sphi %s1598_s25, %s1942_s25   ;;  %s1494_s24 = sphi %s1596_s24, %s1941_s24   ;;  %s1490_s23 = sphi %s1594_s23, %s1940_s23   ;;  %s1486_s22 = sphi %s1592_s22, %s1939_s22   ;;  %s1482_s21 = sphi %s1590_s21, %s1938_s21  }
   0xe   : > { %1906 = sst [smem:[#allocation10_spill]] %s1486_s22  ;;  %s1194_s14 = sadd.s32 4294967294, %s1518_s30  }
   0xf   : > { %1907 = sst [smem:[#allocation11_spill]] %s1490_s23  ;;  %s37_s15 = sadd.s32 1, %s1510_s28 }
  0x10   : > { %1908 = sst [smem:[#allocation12_spill]] %s1498_s25  ;;  %s44_s16 = sadd.s32 1, %s1514_s29 }
  0x11   : > { %1909 = sst [smem:[#allocation13_spill]] %s1506_s27  ;;  %p38_p0 = scmp.ge.s32.totalorder %s37_s15, 2 }
  0x12   : > { %1910 = sst [smem:[#allocation14_spill]] %s1510_s28  ;;  %s253_s17 = sadd.s32 1, %s1498_s25 }
  0x13   : > { %1911 = sst [smem:[#allocation15_spill]] %s1514_s29  ;;  %p260_p1 = scmp.ne.s32.totalorder %s1498_s25, %s1494_s24 }
  0x14   : > { %1912 = sst [smem:[#allocation16_spill]] %s1518_s30  ;;  %p261_p2 = scmp.eq.s32.totalorder %s1518_s30, 0 }
  0x15   : > { %s1948_s15 = smov (%p38_p0, %s37_s15), 0  ;;  %s1950_s16 = smov (!%p38_p0, %s44_s16), %s1514_s29 }
  0x16   : > { %1913 = sst [smem:[#allocation17_spill]] %s1948_s15  ;;  %s250_s18 = ssub.s32 %s1510_s28, %s1948_s15 }
  0x17   : > { %p1653_p3 = por %p261_p2, %p260_p1  ;;  %p46_p4 = scmp.ge.s32.totalorder %s1950_s16, 2 }
  0x18   : > { %p251_p5 = scmp.eq.s32.totalorder %s250_s18, 0  ;;  %s354_s20 = sadd.s32 1, %s1490_s23 }
  0x19   : > { %p364_p6 = scmp.ne.s32.totalorder %s1490_s23, %s1486_s22  ;;  %s1952_s16 = smov (%p46_p4, %s1950_s16), 0 }
  0x1a   : > { %1915 = sst [smem:[#allocation18_spill]] %s1952_s16  ;;  %s349_s11 = ssub.s32 %s1514_s29, %s1952_s16 }
  0x1b   : > { %s1663_s12 = scalar_select %p251_p5, %s1498_s25, %s253_s17  }
  0x1c   : > { %p365_p7 = scmp.eq.s32.totalorder %s1193_s13, 3  ;;  %p352_p8 = scmp.eq.s32.totalorder %s349_s11, 0 }
  0x1d   : > { %1916 = sst [smem:[#allocation19_spill]] %s1663_s12  ;;  %p370_p9 = scmp.ne.s32.totalorder %s1486_s22, %s1482_s21 }
  0x1e   : > { %p1669_p10 = por %p365_p7, %p364_p6  ;;  %p371_p11 = scmp.eq.s32.totalorder %s1194_s14, 3 }
  0x1f   : > { %s1674_s15 = scalar_select %p352_p8, %s1490_s23, %s354_s20  }
  0x20   : > { %s1917_s7 = scalar_select %p1669_p10, 1, 0 }
  0x21   : > { %1919 = sst [smem:[#allocation21_spill]] %s1674_s15  ;;  %p1676_p12 = por %p371_p11, %p370_p9 }
  0x22   : > { %1918 = sst [smem:[#allocation20_spill]] %s1917_s7  ;;  %p1196_p13 = scmp.ge.s32.totalorder %s1518_s30, 4 }
  0x23   : > { %s1920_s18 = scalar_select %p1676_p12, 1, 0 }
  0x24   : > { %396 = sbr.rel (%p1196_p13) target bundleno = 56 (0x38), region = 28 }
  0x25   : > { %1921 = sst [smem:[#allocation22_spill]] %s1920_s18 }
  0x29   : > { %443 = sbr.rel (!%p1653_p3) target bundleno = 56 (0x38), region = 56  ;;  %s445_s11 = sand.u32 (%p1653_p3), 1, %s1498_s25  }
  0x2a   : > { %s1198_s13 = sshll.u32 (%p1653_p3), %s1510_s28, 2  ;;  %s1197_s17 = sshll.u32 (%p1653_p3), %s445_s11, 5 }
  0x2b   : > { %s1922_s8 = sld [smem:[#allocation26_spill]] (%p1653_p3)  ;;  %s447_s20 = scalar_lea.vmem (%p1653_p3), [#allocation5], %s1197_s17 }
  0x31   : > { %s449_s14 = scalar_lea.vmem %s1922_s8, %s1198_s13 }
  0x32   : > { %v466_v0 = vld [vmem:[%s449_s14] sm:$0xf]  ;;  %v468_v1 = vld [vmem:[%s449_s14 + $0x8] sm:$0xf]  ;;  %v470_v2 = vld [vmem:[%s449_s14 + $0x10] sm:$0xf] }
  0x33   : > { %467 = vst [vmem:[%s447_s20] sm:$0xf] %v466_v0  ;;  %469 = vst [vmem:[%s447_s20 + $0x4] sm:$0xf] %v468_v1  ;;  %v472_v3 = vld [vmem:[%s449_s14 + $0x18] sm:$0xf] }
  0x34   : > { %v474_v4 = vld [vmem:[%s449_s14 + $0x20] sm:$0xf]  ;;  %471 = vst [vmem:[%s447_s20 + $0x8] sm:$0xf] %v470_v2  ;;  %473 = vst [vmem:[%s447_s20 + $0xc] sm:$0xf] %v472_v3 }
  0x35   : > { %475 = vst [vmem:[%s447_s20 + $0x10] sm:$0xf] %v474_v4  ;;  %v476_v5 = vld [vmem:[%s449_s14 + $0x28] sm:$0xf]  ;;  %v478_v6 = vld [vmem:[%s449_s14 + $0x30] sm:$0xf] }
  0x36   : > { %v480_v7 = vld [vmem:[%s449_s14 + $0x38] sm:$0xf]  ;;  %477 = vst [vmem:[%s447_s20 + $0x14] sm:$0xf] %v476_v5  ;;  %479 = vst [vmem:[%s447_s20 + $0x18] sm:$0xf] %v478_v6 }
  0x37   : > { %481 = vst [vmem:[%s447_s20 + $0x1c] sm:$0xf] %v480_v7 }
  0x38 PF: > { %p1199_p0 = scmp.ge.s32.totalorder %s1518_s30, 1  ;;  %p535_p1 = scmp.lt.s32.totalorder %s1518_s30, 5 }
  0x3a   : > { %p536_p2 = pnand %p1199_p0, %p535_p1 }
  0x3b   : > { %s542_s29 = sand.u32 (!%p536_p2), 1, %s1494_s24   ;;  %s1886_s16 = sand.u32 (!%p536_p2), 1, %s1486_s22  }
  0x3c   : > { %539 = sbr.rel (%p536_p2) target bundleno = 1080 (0x438), region = 105  ;;  %s1200_s19 = sshll.u32 (!%p536_p2), %s542_s29, 5 }
  0x3d   : > { %s1694_s11 = sshll.u32 (!%p536_p2), %s1886_s16, 3  ;;  %p617_p3 = scmp.lt.s32.totalorder (!%p536_p2), %s1506_s27, 1 }
  0x3e   : > { %p643_p4 = scmp.lt.s32.totalorder (!%p536_p2), %s1502_s26, 1  ;;  %s1204_s13 = sshll.u32 (!%p536_p2), %s1502_s26, 4 }
  0x3f   : > { %s1923_s0 = sld [smem:[#allocation23_spill]] (!%p536_p2)  ;;  %p647_p5 = scmp.lt.s32.totalorder (!%p536_p2), %s1204_s13, 31 }
  0x40   : > { %s1742_s30 = scalar_lea.vmem (!%p536_p2), [#allocation5], %s1200_s19  ;;  %s616_s22 = scalar_lea.vmem (!%p536_p2), [#allocation6], %s1694_s11 }
  0x41   : > { %s1700_s17 = scalar_select %p617_p3, %s1506_s27, 1 }
  0x42   : > { %s1703_s14 = scalar_select %p643_p4, %s1502_s26, 1 }
  0x43   : > { %s1202_s24 = sshll.u32 %s1700_s17, 3  ;;  %s1203_s20 = sshll.u32 %s1700_s17, 2 }
  0x44   : > { %s1715_s25 = scalar_lea.vmem %s1870_s1, %s1203_s20  ;;  %s633_s18 = scalar_lea.vmem %s1871_s2, %s1700_s17 }
  0x45   : > { %s1710_s8 = scalar_lea.vmem %s1923_s0, %s1202_s24  ;;  %s636_s7 = scalar_lea.vmem %s1872_s3, %s1700_s17 }
  0x46   : > { %s642_s29 = scalar_lea.vmem %s1874_s5, %s1700_s17  ;;  %s645_s28 = scalar_lea.vmem %s1878_s9, %s1703_s14 }
  0x47   : > { %s1954_s13 = smov (!%p647_p5, %s1204_s13), 31  ;;  %p1206_p6 = scmp.ne.s32.totalorder %s1502_s26, 0 }
  0x48   : > { %s1205_s23 = sshll.u32 %s1954_s13, 2  ;;  %s1924_s24 = sld [smem:[#allocation24_spill]] (!%p1206_p6) }
  0x49   : > { %s1740_s21 = scalar_lea.vmem %s1879_s10, %s1205_s23  ;;  %656 = sbr.rel (%p1206_p6) target bundleno = 603 (0x25b), region = 113 }
  0x4a   : > { %s1926_s16 = sld [smem:[#allocation25_spill]] (!%p1206_p6)  ;;  %s1927_s19 = scalar_lea.vmem (!%p1206_p6), %s1873_s4, %s1700_s17 }
  0x4e   : > { %s1925_s6 = smov %s1924_s24  ;;  %v1390_v8 = vld [vmem:[%s1924_s24 + $0x18] sm:$0xff]   ;;  %v1520_v9 = vmov 0.0   ;;  %vm1521_vm0 = vmmov 0   ;;  %vm697_vm1 = vcmask 523264   ;;  %v657_v13 = vld [vmem:[%s1715_s25] sm:$0xf]  ;;  %v769_v33 = vlaneseq }
  0x4f   : > { %1255 = vmatprep.subr.bf16.mxu0 %v1520_v9  ;;  %v1391_v10 = vld [vmem:[%s1925_s6 + $0x10] sm:$0xff]   ;;  %1263 = vmatprep.mubr.msk.bf16.mxu0 %vm1521_vm0, %v1520_v9  ;;  %784 = vst.msk [vmem:[#allocation4] sm:$0xff] %vm697_vm1, %v1520_v9  ;;  %v1392_v11 = vld [vmem:[%s1925_s6 + $0x8] sm:$0xff]   ;;  %v1393_v12 = vld [vmem:[%s1925_s6] sm:$0xff]  }
  0x50   : > { %1256 = vmatpush3.bf16.msra.mxu0 %v1390_v8  ;;  %v1207_v14 = vld [vmem:[%s1926_s16] ss:$0 sm:$0xff]  ;;  %v770_v34 = vshrl.u32 %v769_v33, 7 }
  0x51   : > { %1257 = vmatprep.subr.bf16.mxu0 %v1520_v9  ;;  %v1213_v16 = vld [vmem:[%s633_s18] ss:$0 sm:$0xff] }
  0x52   : > { %v741_v19 = vld [vmem:[%s1710_s8] sm:$0xff]  ;;  %v771_v37 = vsub.s32 0, %v770_v34 }
  0x53   : > { %v766_v35 = vld [vmem:[%s636_s7] sm:$0x1] }
  0x54   : > { %1258 = vmatpush3.bf16.msra.mxu0 %v1391_v10  ;;  %v767_v36 = vadd.f32 1.0, %v766_v35  ;;  %v1214_v41 = vld [vmem:[%s1927_s19] ss:$0 sm:$0xff] }
  0x55   : > { %1259 = vmatprep.subr.bf16.mxu0 %v1520_v9 }
  0x56   : > { %v772_v38 = vrot.slane %v767_v36, %v771_v37 }
  0x58   : > { %1260 = vmatpush3.bf16.msra.mxu0 %v1392_v11 }
  0x59   : > { %1261 = vmatprep.subr.bf16.mxu0 %v1520_v9 }
  0x5c   : > { %1262 = vmatpush3.bf16.msra.mxu0 %v1393_v12 }
  0x5f   : > { %1264 = vmatmul.mubr.msk.bf16.vlgmr.msra.gmra.mxu0 %vm697_vm1, %v657_v13 }
 0x11f   : > { %v735_v15 = vpop.f32.mrf.mxu0 }
 0x120   : > { %v736_v17 = vadd.f32 %v1207_v14, %v735_v15 }
 0x121   : > { %v1265_v18 = vpop.f32.mrf.mxu0 }
 0x122   : > { %v749_v20 = vmul.f32 %v1213_v16, %v736_v17 }
 0x123   : > { %v738_v21 = vpop.f32.mrf.mxu0 }
 0x124   : > { %v750_v22 = vadd.f32 %v749_v20, %v741_v19 }
 0x125   : > { %v1266_v23 = vpop.f32.mrf.mxu0 }
 0x126   : > { %v751_v24 = vsel %vm697_vm1, %v750_v22, 0.0  ;;  %765 = vst.msk [vmem:[#allocation2] sm:$0xff] %vm697_vm1, %v750_v22 }
 0x127   : > { %752 = vadd.xlane.f32.xlu0 %v751_v24 }
 0x1b0   : > { %v753_v25 = vpop.xlane.xlu0 %752 }
 0x1b1   : > { %v755_v26 = vmul.f32 0.015625, %v753_v25 }
 0x1b3   : > { %v756_v27 = vsub.f32 %v750_v22, %v755_v26 }
 0x1b5   : > { %v757_v28 = vmul.f32 %v756_v27, %v756_v27 }
 0x1b7   : > { %v758_v29 = vsel %vm697_vm1, %v757_v28, 0.0 }
 0x1b8   : > { %759 = vadd.xlane.f32.xlu0 %v758_v29 }
 0x241   : > { %v760_v30 = vpop.xlane.xlu0 %759 }
 0x242   : > { %v761_v31 = vmul.f32 0.015625, %v760_v30 }
 0x244   : > { %v762_v32 = vadd.f32 1e-06, %v761_v31 }
 0x246   : > { %1394 = vrsqrt.f32 %v762_v32 }
 0x253   : > { %v1395_v39 = vpop.eup %1394 }
 0x254   : > { %v764_v40 = vmul.f32 %v1395_v39, %v756_v27 }
 0x256   : > { %v774_v42 = vmul.f32 %v772_v38, %v764_v40 }
 0x258   : > { %v782_v43 = vadd.f32 %v1214_v41, %v774_v42 }
 0x25a   : > { %783 = vst.msk [vmem:[#allocation3] sm:$0xff] %vm697_vm1, %v782_v43 }
 0x25b PF: > { %v1396_v44 = vld [vmem:[%s1742_s30 + $0x18] sm:$0xff]   ;;  %v1522_v45 = vmov 0.0   ;;  %v1397_v46 = vld [vmem:[%s1742_s30 + $0x10] sm:$0xff]   ;;  %vm1523_vm2 = vmmov 0   ;;  %v1398_v47 = vld [vmem:[%s1742_s30 + $0x8] sm:$0xff]   ;;  %vm826_vm3 = vcmask 523264  }
 0x25c   : > { %1267 = vmatprep.subr.bf16.mxu0 %v1522_v45  ;;  %1279 = vmatprep.subr.bf16.mxu1 %v1522_v45  ;;  %v1399_v48 = vld [vmem:[%s1742_s30] sm:$0xff]   ;;  %v1401_v52 = vld [vmem:[%s1740_s21 + $0x30] sm:$0xff]   ;;  %v1402_v53 = vld [vmem:[%s1740_s21 + $0x28] sm:$0xff]   ;;  %p1229_p7 = scmp.ne.s32.totalorder %s1502_s26, 1 }
 0x25d   : > { %1268 = vmatpush3.bf16.msra.mxu0 %v1396_v44  ;;  %1275 = vmatprep.mubr.msk.bf16.mxu0 %vm1523_vm2, %v1522_v45  ;;  %v1400_v51 = vld [vmem:[%s1740_s21 + $0x38] sm:$0xff]   ;;  %v1403_v54 = vld [vmem:[%s1740_s21 + $0x20] sm:$0xff]   ;;  %v1405_v56 = vld [vmem:[%s1740_s21 + $0x10] sm:$0xff]   ;;  %s1928_s23 = sld [smem:[#allocation27_spill]] (!%p1229_p7) }
 0x25e   : > { %1269 = vmatprep.subr.bf16.mxu0 %v1522_v45  ;;  %1295 = vmatprep.mubr.msk.bf16.mxu1 %vm1523_vm2, %v1522_v45  ;;  %v1404_v55 = vld [vmem:[%s1740_s21 + $0x18] sm:$0xff]   ;;  %v1406_v57 = vld [vmem:[%s1740_s21 + $0x8] sm:$0xff]   ;;  %v1407_v58 = vld [vmem:[%s1740_s21] sm:$0xff]  }
 0x25f   : > { %1280 = vmatpush3.bf16.msra.mxu1 %v1400_v51  ;;  %v1215_v59 = vld [vmem:[%s645_s28] ss:$0 sm:$0xff]  ;;  %v879_v11 = vld [vmem:[#allocation4] sm:$0xff] }
 0x260   : > { %1281 = vmatprep.subr.bf16.mxu1 %v1522_v45 }
 0x261   : > { %1270 = vmatpush3.bf16.msra.mxu0 %v1397_v46  ;;  %v785_v49 = vld [vmem:[#allocation3] sm:$0xff] }
 0x262   : > { %1271 = vmatprep.subr.bf16.mxu0 %v1522_v45  ;;  %v786_v50 = vpack.c.bf16 %v785_v49, %v785_v49 }
 0x263   : > { %1282 = vmatpush3.bf16.msra.mxu1 %v1401_v52 }
 0x264   : > { %1283 = vmatprep.subr.bf16.mxu1 %v1522_v45 }
 0x265   : > { %1272 = vmatpush3.bf16.msra.mxu0 %v1398_v47 }
 0x266   : > { %1273 = vmatprep.subr.bf16.mxu0 %v1522_v45 }
 0x267   : > { %1284 = vmatpush3.bf16.msra.mxu1 %v1402_v53 }
 0x268   : > { %1285 = vmatprep.subr.bf16.mxu1 %v1522_v45 }
 0x269   : > { %1274 = vmatpush3.bf16.msra.mxu0 %v1399_v48 }
 0x26b   : > { %1286 = vmatpush3.bf16.msra.mxu1 %v1403_v54 }
 0x26c   : > { %1276 = vmatmul.mubr.msk.bf16.vlgmr.msra.gmra.mxu0 %vm826_vm3, %v786_v50  ;;  %1287 = vmatprep.subr.bf16.mxu1 %v1522_v45 }
 0x26f   : > { %1288 = vmatpush3.bf16.msra.mxu1 %v1404_v55 }
 0x270   : > { %1289 = vmatprep.subr.bf16.mxu1 %v1522_v45 }
 0x273   : > { %1290 = vmatpush3.bf16.msra.mxu1 %v1405_v56 }
 0x274   : > { %1291 = vmatprep.subr.bf16.mxu1 %v1522_v45 }
 0x277   : > { %1292 = vmatpush3.bf16.msra.mxu1 %v1406_v57 }
 0x278   : > { %1293 = vmatprep.subr.bf16.mxu1 %v1522_v45 }
 0x27b   : > { %1294 = vmatpush3.bf16.msra.mxu1 %v1407_v58 }
 0x32c   : > { %v864_v60 = vpop.f32.mrf.mxu0 }
 0x32d   : > { %v865_v61 = vadd.f32 %v1215_v59, %v864_v60 }
 0x32e   : > { %v1277_v62 = vpop.f32.mrf.mxu0 }
 0x32f   : > { %v871_v63 = vmul.f32 0.044715, %v865_v61  ;;  %v870_v7 = vmul.f32 0.5, %v865_v61 }
 0x330   : > { %v867_v0 = vpop.f32.mrf.mxu0 }
 0x331   : > { %v872_v1 = vmul.f32 %v871_v63, %v865_v61 }
 0x332   : > { %v1278_v2 = vpop.f32.mrf.mxu0 }
 0x333   : > { %v873_v3 = vmul.f32 %v872_v1, %v865_v61 }
 0x335   : > { %v874_v4 = vadd.f32 %v873_v3, %v865_v61 }
 0x337   : > { %v875_v5 = vmul.f32 0.7978846, %v874_v4 }
 0x339   : > { %1408 = vtanh.f32 %v875_v5 }
 0x346   : > { %v1409_v6 = vpop.eup %1408 }
 0x347   : > { %v877_v8 = vadd.f32 1.0, %v1409_v6 }
 0x349   : > { %v878_v9 = vmul.f32 %v877_v8, %v870_v7 }
 0x34b   : > { %v880_v10 = vpack.c.bf16 %v878_v9, %v878_v9 }
 0x34d   : > { %1296 = vmatmul.mubr.bf16.vlgmr.msra.gmra.mxu1 %v880_v10 }
 0x40d   : > { %v979_v12 = vpop.f32.mrf.mxu1 }
 0x40e   : > { %v985_v13 = vadd.f32 %v979_v12, %v879_v11 }
 0x40f   : > { %v1297_v14 = vpop.f32.mrf.mxu1  ;;  %990 = sbr.rel (%p1229_p7) target bundleno = 1055 (0x41f), region = 117 }
 0x410   : > { %986 = vst.msk [vmem:[#allocation4] sm:$0xff] %vm826_vm3, %v985_v13 }
 0x411   : > { %v982_v15 = vpop.f32.mrf.mxu1 }
 0x413   : > { %v1298_v16 = vpop.f32.mrf.mxu1 }
 0x414   : > { %v1231_v18 = vld [vmem:[%s642_s29] ss:$0 sm:$0xff] }
 0x415   : > { %v1230_v19 = vld [vmem:[%s1928_s23] ss:$0 sm:$0xff] }
 0x416   : > { %v991_v21 = vld [vmem:[#allocation2] sm:$0xff] }
 0x417   : > { %v993_v17 = vld [vmem:[#allocation4] sm:$0xff] }
 0x418   : > { %v1001_v20 = vadd.f32 %v1230_v19, %v993_v17 }
 0x41a   : > { %v1008_v22 = vmul.f32 %v1231_v18, %v1001_v20 }
 0x41c   : > { %v1009_v23 = vadd.f32 %v1008_v22, %v991_v21 }
 0x41e   : > { %1010 = vst.msk [vmem:[%s616_s22] sm:$0xff] %vm826_vm3, %v1009_v23 }
 0x41f PF: > { %s1929_s26 = sld [smem:[#allocation13_spill]]  ;;  %s1026_s8 = sshll.u32 %s616_s22, 4  ;;  %s1027_s8 = int_to_ptr.vmem [resolvable:$true] %s1026_s8 }
 0x420   : > { %s1930_s15 = sld [smem:[#allocation10_spill]]  ;;  %s1410_s13 = scalar_lea.vmem %s1027_s8, 128 }
 0x421   : > { %s1932_s29 = sld [smem:[#allocation28_spill]]  ;;  %p1411_p8 = scmp.ne.s32.totalorder %s1027_s8, %s1410_s13 }
 0x422   : > { %s1524_s19 = smov [#allocation6]  }
 0x423   : > { %p1412_p9 = pnand %p1411_p8, %p1669_p10  ;;  %s1414_s7 = sshll.u32 %s1524_s19, 4  ;;  %s1415_s7 = int_to_ptr.vmem [resolvable:$false] %s1414_s7 }
 0x424   : > { %s1416_s30 = scalar_lea.vmem %s1415_s7, 256  ;;  %p1417_p13 = scmp.lt.s32.totalorder %s1027_s8, %s1415_s7 }
 0x425   : > { %s1233_s27 = sshll.u32 %s1929_s26, 7  ;;  %p1413_p11 = pneg %p1412_p9 }
 0x426   : > { %s1934_s25 = sand.u32 1, %s1930_s15   ;;  %p1418_p0 = scmp.lt.s32.totalorder %s1416_s30, %s1410_s13 }
 0x427   : > { %s1933_s0 = smov %s1932_s29  ;;  %s1024_s24 = scalar_lea.hbm %s1932_s29, %s1233_s27 }
 0x428   : > { %s1012_s18 = scalar_lea.sflag [#allocation7], %s1934_s25  ;;  %p1419_p1 = por %p1418_p0, %p1417_p13 }
 0x42a   : > { %p1420_p2 = pnand %p1419_p1, %p1413_p11 }
 0x42c   : > { %1423 = shalt.err (!%p1420_p2)
}
 0x42d   : > { %s1424_s14 = scalar_lea.hbm %s1024_s24, 128  ;;  %s1428_s28 = scalar_lea.hbm %s1933_s0, 256 }
 0x42e   : > { %p1425_p3 = scmp.ne.s32.totalorder %s1024_s24, %s1424_s14  ;;  %p1429_p6 = scmp.lt.s32.totalorder %s1024_s24, %s1933_s0 }
 0x42f   : > { %p1430_p7 = scmp.lt.s32.totalorder %s1428_s28, %s1424_s14 }
 0x430   : > { %p1426_p4 = pnand %p1425_p3, %p1669_p10 }
 0x431   : > { %p1431_p8 = por %p1430_p7, %p1429_p6 }
 0x432   : > { %p1427_p5 = pneg %p1426_p4 }
 0x434   : > { %p1432_p9 = pnand %p1431_p8, %p1427_p5 }
 0x436   : > { %1435 = shalt.err (!%p1432_p9)
}
 0x437   : > { %1299 = dma.vmem_to_hbm [thread:$0]  (%p1669_p10), %s1027_s8, 128, %s1024_s24, %s1012_s18  }
 0x438 PF: > { %s1935_s23 = sld [smem:[#allocation16_spill]] }
 0x439   : > { %s1936_s26 = sld [smem:[#allocation9_spill]] }
 0x43e   : > { %p1305_p11 = scmp.ge.s32.totalorder %s1935_s23, 2 }
 0x43f   : > { %s1038_s27 = sand.u32 1, %s1936_s26  }
 0x440   : > { %p1302_p13 = pnand %p1305_p11, %p1676_p12  ;;  %s1039_s17 = scalar_lea.sflag [#allocation7], %s1038_s27 }
 0x442   : > { %p1303_p0 = pneg %p1302_p13 }
 0x444   : > { %1477 = dma.done.wait (%p1303_p0), %s1039_s17, 128  }
 0x445   : > { %1479 = vsyncadd (%p1303_p0), %s1039_s17, 4294967168  ;;  %s25_s30 = sadd.s32 1, %s1935_s23   ;;  %s1938_s21 = sld [smem:[#allocation10_spill]] }
 0x446   : > { %p22_p1 = scmp.ge.s32.totalorder %s25_s30, 6   ;;  %s1939_s22 = sld [smem:[#allocation11_spill]] }
 0x447   : > { %s1940_s23 = sld [smem:[#allocation21_spill]] }
 0x448   : > { %s1941_s24 = sld [smem:[#allocation12_spill]] }
 0x449   : > { %s1942_s25 = sld [smem:[#allocation19_spill]]  ;;  %24 = sbr.rel (!%p22_p1) target bundleno = 13 (0xd), region = 181 }
 0x44a   : > { %s1943_s26 = sld [smem:[#allocation14_spill]] }
 0x44b   : > { %s1944_s27 = sld [smem:[#allocation15_spill]] }
 0x44c   : > { %s1945_s28 = sld [smem:[#allocation17_spill]] }
 0x44d   : > { %s1946_s29 = sld [smem:[#allocation18_spill]] }
 0x44e   :  { %1044 = vsyncpa [#allocation7], 1 }
 0x44f   :  { %1046 = vsyncpa [#allocation7 + $0x1], 1 }

// kernel: double_stream_block.12
= control target key start
LH: loop header
LB: loop body
LE: loop exit
PB: predicated region body
PF: predicated region fallthrough
CT: control target
= control target key end

     0   :  { %s1943_s0 = inlined_call_operand.vmem [shape: f32[2,24,64], index: 0, kind: input, shape index: {}]   ;;  %s1944_s1 = inlined_call_operand.vmem [shape: bf16[2,24,64], index: 1, kind: input, shape index: {}]   ;;  %s1945_s2 = inlined_call_operand.vmem [shape: f32[2,1,64], index: 2, kind: input, shape index: {}]   ;;  %s1946_s3 = inlined_call_operand.vmem [shape: f32[2,1,64], index: 3, kind: input, shape index: {}]   ;;  %s1947_s4 = inlined_call_operand.vmem [shape: f32[2,1,64], index: 4, kind: input, shape index: {}]   ;;  %s1948_s5 = inlined_call_operand.vmem [shape: f32[2,1,64], index: 5, kind: input, shape index: {}]   ;;  %s1949_s6 = inlined_call_operand.vmem [shape: bf16[64,64], index: 6, kind: input, shape index: {}]   ;;  %s1950_s7 = inlined_call_operand.vmem [shape: f32[1,64], index: 7, kind: input, shape index: {}]   ;;  %s1951_s8 = inlined_call_operand.vmem [shape: bf16[64,256], index: 8, kind: input, shape index: {}]   ;;  %s1952_s9 = inlined_call_operand.vmem [shape: f32[1,256], index: 9, kind: input, shape index: {}]   ;;  %s1953_s10 = inlined_call_operand.vmem [shape: bf16[256,64], index: 10, kind: input, shape index: {}]   ;;  %s1954_s11 = inlined_call_operand.vmem [shape: f32[1,64], index: 11, kind: input, shape index: {}]   ;;  %s1955_s12 = inlined_call_operand.hbm [shape: f32[2,24,64], index: 12, kind: output, shape index: {}]  }
   0x1   :  { %1975 = sst [smem:[#allocation25_spill]] %s1949_s6 }
   0x2   :  { %1976 = sst [smem:[#allocation26_spill]] %s1950_s7 }
   0x3   :  { %1977 = sst [smem:[#allocation27_spill]] %s1951_s8 }
   0x4   :  { %1978 = sst [smem:[#allocation28_spill]] %s1952_s9 }
   0x5   :  { %1979 = sst [smem:[#allocation29_spill]] %s1953_s10 }
   0x6   :  { %1980 = sst [smem:[#allocation30_spill]] %s1954_s11 }
   0x7   :  { %1981 = sst [smem:[#allocation31_spill]] %s1955_s12 }
   0x8   :  { %17 = vsyncpa [#allocation7], 0 }
   0x9   :  { %19 = vsyncpa [#allocation7 + $0x1], 0  ;;  %s1641_s21 = smov 0   ;;  %s1643_s22 = smov 0  }
   0xa   :  { %s1645_s23 = smov 0   ;;  %s1647_s24 = smov 0  }
   0xb   :  { %s1649_s25 = smov 0   ;;  %s1651_s26 = smov 0  }
   0xc   :  { %s1653_s27 = smov 0   ;;  %s1655_s28 = smov 0  }
   0xd   :  { %s1657_s29 = smov 0   ;;  %s1659_s30 = smov 0  }
   0xe   :  { %s1661_s13 = smov 0   ;;  %s1663_s14 = smov 0  }
   0xf LB: > { %1982 = sst [smem:[#allocation9_spill]] %s1525_s21  ;;  %s1210_s15 = sadd.s32 4294967295, %s1569_s14   ;;  %s1569_s14 = sphi %s1663_s14, %s25_s14   ;;  %s1565_s13 = sphi %s1661_s13, %s2030_s13   ;;  %s1561_s30 = sphi %s1659_s30, %s2029_s30   ;;  %s1557_s29 = sphi %s1657_s29, %s2028_s29   ;;  %s1553_s28 = sphi %s1655_s28, %s2027_s28   ;;  %s1549_s27 = sphi %s1653_s27, %s2026_s27   ;;  %s1545_s26 = sphi %s1651_s26, %s2025_s26   ;;  %s1541_s25 = sphi %s1649_s25, %s2024_s25   ;;  %s1537_s24 = sphi %s1647_s24, %s2023_s24   ;;  %s1533_s23 = sphi %s1645_s23, %s2022_s23   ;;  %s1529_s22 = sphi %s1643_s22, %s2021_s22   ;;  %s1525_s21 = sphi %s1641_s21, %s2020_s21  }
  0x10   : > { %1983 = sst [smem:[#allocation10_spill]] %s1529_s22  ;;  %s1211_s16 = sadd.s32 4294967294, %s1569_s14  }
  0x11   : > { %1984 = sst [smem:[#allocation11_spill]] %s1533_s23  ;;  %s37_s17 = sadd.s32 1, %s1557_s29 }
  0x12   : > { %1985 = sst [smem:[#allocation12_spill]] %s1541_s25  ;;  %p38_p0 = scmp.ge.s32.totalorder %s37_s17, 2 }
  0x13   : > { %1986 = sst [smem:[#allocation13_spill]] %s1549_s27  ;;  %s40_s18 = sadd.s32 1, %s1561_s30 }
  0x14   : > { %1987 = sst [smem:[#allocation14_spill]] %s1557_s29  ;;  %s44_s19 = sadd.s32 1, %s1565_s13 }
  0x15   : > { %1988 = sst [smem:[#allocation15_spill]] %s1561_s30  ;;  %p260_p1 = scmp.ne.s32.totalorder %s1541_s25, %s1537_s24 }
  0x16   : > { %1989 = sst [smem:[#allocation16_spill]] %s1565_s13  ;;  %s2032_s17 = smov (%p38_p0, %s37_s17), 0 }
  0x17   : > { %1990 = sst [smem:[#allocation17_spill]] %s1569_s14  ;;  %s2034_s18 = smov (!%p38_p0, %s40_s18), %s1561_s30 }
  0x18   : > { %1991 = sst [smem:[#allocation18_spill]] %s2032_s17  ;;  %s250_s20 = ssub.s32 %s1557_s29, %s2032_s17 }
  0x19   : > { %p261_p2 = scmp.eq.s32.totalorder %s1569_s14, 0  ;;  %p42_p3 = scmp.ge.s32.totalorder %s2034_s18, 3 }
  0x1a   : > { %p251_p4 = scmp.eq.s32.totalorder %s250_s20, 0  ;;  %s253_s12 = sadd.s32 1, %s1541_s25 }
  0x1b   : > { %p1715_p5 = por %p261_p2, %p260_p1  ;;  %s2036_s18 = smov (%p42_p3, %s2034_s18), 0 }
  0x1c   : > { %1993 = sst [smem:[#allocation19_spill]] %s2036_s18  ;;  %s2038_s19 = smov (!%p42_p3, %s44_s19), %s1565_s13 }
  0x1d   : > { %s1723_s7 = scalar_select %p251_p4, %s1541_s25, %s253_s12  }
  0x1e   : > { %p46_p6 = scmp.ge.s32.totalorder %s2038_s19, 2  ;;  %s350_s6 = ssub.s32 %s1561_s30, %s2036_s18 }
  0x1f   : > { %1994 = sst [smem:[#allocation20_spill]] %s1723_s7  ;;  %p364_p7 = scmp.ne.s32.totalorder %s1533_s23, %s1529_s22 }
  0x20   : > { %p365_p8 = scmp.eq.s32.totalorder %s1210_s15, 11  ;;  %s2040_s19 = smov (%p46_p6, %s2038_s19), 0 }
  0x21   : > { %1995 = sst [smem:[#allocation21_spill]] %s2040_s19  ;;  %p370_p10 = scmp.ne.s32.totalorder %s1529_s22, %s1525_s21 }
  0x22   : > { %p1731_p9 = por %p365_p8, %p364_p7  ;;  %s349_s17 = ssub.s32 %s1565_s13, %s2040_s19 }
  0x23   : > { %p371_p11 = scmp.eq.s32.totalorder %s1211_s16, 11  ;;  %s351_s10 = sor.u32 %s350_s6, %s349_s17 }
  0x24   : > { %s1996_s20 = scalar_select %p1731_p9, 1, 0 }
  0x25   : > { %s354_s9 = sadd.s32 1, %s1533_s23  ;;  %p352_p12 = scmp.eq.s32.totalorder %s351_s10, 0 }
  0x26   : > { %1997 = sst [smem:[#allocation22_spill]] %s1996_s20  ;;  %p1740_p13 = por %p371_p11, %p370_p10 }
  0x27   : > { %s1745_s18 = scalar_select %p352_p12, %s1533_s23, %s354_s9  }
  0x28   : > { %s1998_s12 = scalar_select %p1740_p13, 1, 0 }
  0x29   : > { %2000 = sst [smem:[#allocation24_spill]] %s1745_s18  ;;  %p1213_p0 = scmp.ge.s32.totalorder %s1569_s14, 12 }
  0x2a   : > { %1999 = sst [smem:[#allocation23_spill]] %s1998_s12 }
  0x2b   : > { %396 = sbr.rel (%p1213_p0) target bundleno = 63 (0x3f), region = 28 }
  0x30   : > { %445 = sbr.rel (!%p1715_p5) target bundleno = 63 (0x3f), region = 56  ;;  %s447_s15 = sand.u32 (%p1715_p5), 1, %s1541_s25  }
  0x31   : > { %s1215_s19 = sshll.u32 (%p1715_p5), %s1557_s29, 2  ;;  %s1214_s16 = sshll.u32 (%p1715_p5), %s447_s15, 5 }
  0x32   : > { %s2001_s8 = sld [smem:[#allocation27_spill]] (%p1715_p5)  ;;  %s449_s13 = scalar_lea.vmem (%p1715_p5), [#allocation5], %s1214_s16 }
  0x38   : > { %s451_s10 = scalar_lea.vmem %s2001_s8, %s1215_s19 }
  0x39   : > { %v468_v0 = vld [vmem:[%s451_s10] sm:$0xf]  ;;  %v470_v1 = vld [vmem:[%s451_s10 + $0x8] sm:$0xf]  ;;  %v472_v2 = vld [vmem:[%s451_s10 + $0x10] sm:$0xf] }
  0x3a   : > { %469 = vst [vmem:[%s449_s13] sm:$0xf] %v468_v0  ;;  %471 = vst [vmem:[%s449_s13 + $0x4] sm:$0xf] %v470_v1  ;;  %v474_v3 = vld [vmem:[%s451_s10 + $0x18] sm:$0xf] }
  0x3b   : > { %v476_v4 = vld [vmem:[%s451_s10 + $0x20] sm:$0xf]  ;;  %473 = vst [vmem:[%s449_s13 + $0x8] sm:$0xf] %v472_v2  ;;  %475 = vst [vmem:[%s449_s13 + $0xc] sm:$0xf] %v474_v3 }
  0x3c   : > { %477 = vst [vmem:[%s449_s13 + $0x10] sm:$0xf] %v476_v4  ;;  %v478_v5 = vld [vmem:[%s451_s10 + $0x28] sm:$0xf]  ;;  %v480_v6 = vld [vmem:[%s451_s10 + $0x30] sm:$0xf] }
  0x3d   : > { %v482_v7 = vld [vmem:[%s451_s10 + $0x38] sm:$0xf]  ;;  %479 = vst [vmem:[%s449_s13 + $0x14] sm:$0xf] %v478_v5  ;;  %481 = vst [vmem:[%s449_s13 + $0x18] sm:$0xf] %v480_v6 }
  0x3e   : > { %483 = vst [vmem:[%s449_s13 + $0x1c] sm:$0xf] %v482_v7 }
  0x3f PF: > { %p1216_p1 = scmp.ge.s32.totalorder %s1569_s14, 1  ;;  %p537_p2 = scmp.lt.s32.totalorder %s1569_s14, 13 }
  0x41   : > { %p538_p3 = pnand %p1216_p1, %p537_p2 }
  0x42   : > { %s544_s9 = sand.u32 (!%p538_p3), 1, %s1537_s24   ;;  %s1962_s11 = sand.u32 (!%p538_p3), 1, %s1529_s22  }
  0x43   : > { %541 = sbr.rel (%p538_p3) target bundleno = 1092 (0x444), region = 105  ;;  %s1217_s13 = sshll.u32 (!%p538_p3), %s544_s9, 5 }
  0x44   : > { %s1761_s19 = sshll.u32 (!%p538_p3), %s1962_s11, 3  ;;  %p621_p4 = scmp.lt.s32.totalorder (!%p538_p3), %s1553_s28, 1 }
  0x45   : > { %p623_p5 = scmp.lt.s32.totalorder (!%p538_p3), %s1549_s27, 2  ;;  %p649_p6 = scmp.lt.s32.totalorder (!%p538_p3), %s1545_s26, 1 }
  0x46   : > { %s1221_s15 = sshll.u32 (!%p538_p3), %s1545_s26, 4  ;;  %s2002_s23 = sld [smem:[#allocation28_spill]] (!%p538_p3) }
  0x47   : > { %p653_p7 = scmp.lt.s32.totalorder (!%p538_p3), %s1221_s15, 31  ;;  %s2003_s22 = sld [smem:[#allocation29_spill]] (!%p538_p3) }
  0x48   : > { %s1768_s16 = scalar_select %p621_p4, %s1553_s28, 1 }
  0x49   : > { %s624_s6 = scalar_select %p623_p5, %s1549_s27, 2 }
  0x4a   : > { %s1316_s24 = smul.u32 3, %s1768_s16  ;;  %s645_s25 = scalar_lea.vmem %s1947_s4, %s1768_s16 }
  0x4b   : > { %s1799_s30 = scalar_select %p649_p6, %s1545_s26, 1 }
  0x4c   : > { %s626_s18 = sadd.s32 %s1316_s24, %s624_s6  ;;  %s2042_s15 = smov (!%p653_p7, %s1221_s15), 31 }
  0x4d   : > { %s1219_s14 = sshll.u32 %s626_s18, 3  ;;  %s1220_s20 = sshll.u32 %s626_s18, 2 }
  0x4e   : > { %s1791_s17 = scalar_lea.vmem %s1943_s0, %s1219_s14  ;;  %s636_s11 = scalar_lea.vmem %s1944_s1, %s1220_s20 }
  0x4f   : > { %s651_s12 = scalar_lea.vmem %s2002_s23, %s1799_s30  ;;  %s1222_s18 = sshll.u32 %s2042_s15, 2 }
  0x50   : > { %s1808_s27 = scalar_lea.vmem %s2003_s22, %s1222_s18  ;;  %s1810_s14 = scalar_lea.vmem [#allocation5], %s1217_s13 }
  0x51   : > { %s620_s10 = scalar_lea.vmem [#allocation6], %s1761_s19  ;;  %p1223_p8 = scmp.ne.s32.totalorder %s1545_s26, 0 }
  0x52   : > { %s2004_s21 = sld [smem:[#allocation25_spill]] (!%p1223_p8)  ;;  %s2007_s8 = scalar_lea.vmem (!%p1223_p8), %s1945_s2, %s1768_s16 }
  0x53   : > { %662 = sbr.rel (%p1223_p8) target bundleno = 613 (0x265), region = 113  ;;  %s2006_s24 = sld [smem:[#allocation26_spill]] (!%p1223_p8) }
  0x54   : > { %s2008_s7 = scalar_lea.vmem (!%p1223_p8), %s1946_s3, %s1768_s16 }
  0x58   : > { %s2005_s9 = smov %s2004_s21  ;;  %v1425_v8 = vld [vmem:[%s2004_s21 + $0x18] sm:$0xff]   ;;  %v1571_v9 = vmov 0.0   ;;  %vm1572_vm0 = vmmov 0   ;;  %vm703_vm1 = vcmask 523264   ;;  %v663_v13 = vld [vmem:[%s636_s11] sm:$0xf]  ;;  %v775_v33 = vlaneseq }
  0x59   : > { %1272 = vmatprep.subr.bf16.mxu0 %v1571_v9  ;;  %v1426_v10 = vld [vmem:[%s2005_s9 + $0x10] sm:$0xff]   ;;  %1280 = vmatprep.mubr.msk.bf16.mxu0 %vm1572_vm0, %v1571_v9  ;;  %790 = vst.msk [vmem:[#allocation4] sm:$0xff] %vm703_vm1, %v1571_v9  ;;  %v1427_v11 = vld [vmem:[%s2005_s9 + $0x8] sm:$0xff]   ;;  %v1428_v12 = vld [vmem:[%s2005_s9] sm:$0xff]  }
  0x5a   : > { %1273 = vmatpush3.bf16.msra.mxu0 %v1425_v8  ;;  %v1224_v14 = vld [vmem:[%s2006_s24] ss:$0 sm:$0xff]  ;;  %v776_v34 = vshrl.u32 %v775_v33, 7 }
  0x5b   : > { %1274 = vmatprep.subr.bf16.mxu0 %v1571_v9  ;;  %v1230_v16 = vld [vmem:[%s2007_s8] ss:$0 sm:$0xff] }
  0x5c   : > { %v747_v19 = vld [vmem:[%s1791_s17] sm:$0xff]  ;;  %v777_v37 = vsub.s32 0, %v776_v34 }
  0x5d   : > { %v772_v35 = vld [vmem:[%s2008_s7] sm:$0x1] }
  0x5e   : > { %1275 = vmatpush3.bf16.msra.mxu0 %v1426_v10  ;;  %v773_v36 = vadd.f32 1.0, %v772_v35  ;;  %v1231_v41 = vld [vmem:[%s645_s25] ss:$0 sm:$0xff] }
  0x5f   : > { %1276 = vmatprep.subr.bf16.mxu0 %v1571_v9 }
  0x60   : > { %v778_v38 = vrot.slane %v773_v36, %v777_v37 }
  0x62   : > { %1277 = vmatpush3.bf16.msra.mxu0 %v1427_v11 }
  0x63   : > { %1278 = vmatprep.subr.bf16.mxu0 %v1571_v9 }
  0x66   : > { %1279 = vmatpush3.bf16.msra.mxu0 %v1428_v12 }
  0x69   : > { %1281 = vmatmul.mubr.msk.bf16.vlgmr.msra.gmra.mxu0 %vm703_vm1, %v663_v13 }
 0x129   : > { %v741_v15 = vpop.f32.mrf.mxu0 }
 0x12a   : > { %v742_v17 = vadd.f32 %v1224_v14, %v741_v15 }
 0x12b   : > { %v1282_v18 = vpop.f32.mrf.mxu0 }
 0x12c   : > { %v755_v20 = vmul.f32 %v1230_v16, %v742_v17 }
 0x12d   : > { %v744_v21 = vpop.f32.mrf.mxu0 }
 0x12e   : > { %v756_v22 = vadd.f32 %v755_v20, %v747_v19 }
 0x12f   : > { %v1283_v23 = vpop.f32.mrf.mxu0 }
 0x130   : > { %v757_v24 = vsel %vm703_vm1, %v756_v22, 0.0  ;;  %771 = vst.msk [vmem:[#allocation2] sm:$0xff] %vm703_vm1, %v756_v22 }
 0x131   : > { %758 = vadd.xlane.f32.xlu0 %v757_v24 }
 0x1ba   : > { %v759_v25 = vpop.xlane.xlu0 %758 }
 0x1bb   : > { %v761_v26 = vmul.f32 0.015625, %v759_v25 }
 0x1bd   : > { %v762_v27 = vsub.f32 %v756_v22, %v761_v26 }
 0x1bf   : > { %v763_v28 = vmul.f32 %v762_v27, %v762_v27 }
 0x1c1   : > { %v764_v29 = vsel %vm703_vm1, %v763_v28, 0.0 }
 0x1c2   : > { %765 = vadd.xlane.f32.xlu0 %v764_v29 }
 0x24b   : > { %v766_v30 = vpop.xlane.xlu0 %765 }
 0x24c   : > { %v767_v31 = vmul.f32 0.015625, %v766_v30 }
 0x24e   : > { %v768_v32 = vadd.f32 1e-06, %v767_v31 }
 0x250   : > { %1429 = vrsqrt.f32 %v768_v32 }
 0x25d   : > { %v1430_v39 = vpop.eup %1429 }
 0x25e   : > { %v770_v40 = vmul.f32 %v1430_v39, %v762_v27 }
 0x260   : > { %v780_v42 = vmul.f32 %v778_v38, %v770_v40 }
 0x262   : > { %v788_v43 = vadd.f32 %v1231_v41, %v780_v42 }
 0x264   : > { %789 = vst.msk [vmem:[#allocation3] sm:$0xff] %vm703_vm1, %v788_v43 }
 0x265 PF: > { %v1431_v44 = vld [vmem:[%s1810_s14 + $0x18] sm:$0xff]   ;;  %v1573_v45 = vmov 0.0   ;;  %v1432_v46 = vld [vmem:[%s1810_s14 + $0x10] sm:$0xff]   ;;  %vm1574_vm2 = vmmov 0   ;;  %v1433_v47 = vld [vmem:[%s1810_s14 + $0x8] sm:$0xff]   ;;  %vm832_vm3 = vcmask 523264  }
 0x266   : > { %1284 = vmatprep.subr.bf16.mxu0 %v1573_v45  ;;  %1296 = vmatprep.subr.bf16.mxu1 %v1573_v45  ;;  %v1434_v48 = vld [vmem:[%s1810_s14] sm:$0xff]   ;;  %v1436_v52 = vld [vmem:[%s1808_s27 + $0x30] sm:$0xff]   ;;  %v1437_v53 = vld [vmem:[%s1808_s27 + $0x28] sm:$0xff]   ;;  %p1246_p10 = scmp.ne.s32.totalorder %s1545_s26, 1 }
 0x267   : > { %1285 = vmatpush3.bf16.msra.mxu0 %v1431_v44  ;;  %1292 = vmatprep.mubr.msk.bf16.mxu0 %vm1574_vm2, %v1573_v45  ;;  %v1435_v51 = vld [vmem:[%s1808_s27 + $0x38] sm:$0xff]   ;;  %v1438_v54 = vld [vmem:[%s1808_s27 + $0x20] sm:$0xff]   ;;  %v1440_v56 = vld [vmem:[%s1808_s27 + $0x10] sm:$0xff]   ;;  %s2011_s18 = sld [smem:[#allocation30_spill]] (!%p1246_p10) }
 0x268   : > { %1286 = vmatprep.subr.bf16.mxu0 %v1573_v45  ;;  %1312 = vmatprep.mubr.msk.bf16.mxu1 %vm1574_vm2, %v1573_v45  ;;  %v1439_v55 = vld [vmem:[%s1808_s27 + $0x18] sm:$0xff]   ;;  %v1441_v57 = vld [vmem:[%s1808_s27 + $0x8] sm:$0xff]   ;;  %v1442_v58 = vld [vmem:[%s1808_s27] sm:$0xff]   ;;  %s2010_s27 = scalar_lea.vmem (!%p1246_p10), %s1948_s5, %s1768_s16 }
 0x269   : > { %1297 = vmatpush3.bf16.msra.mxu1 %v1435_v51  ;;  %v1232_v59 = vld [vmem:[%s651_s12] ss:$0 sm:$0xff]  ;;  %v885_v11 = vld [vmem:[#allocation4] sm:$0xff] }
 0x26a   : > { %1298 = vmatprep.subr.bf16.mxu1 %v1573_v45 }
 0x26b   : > { %1287 = vmatpush3.bf16.msra.mxu0 %v1432_v46  ;;  %v791_v49 = vld [vmem:[#allocation3] sm:$0xff] }
 0x26c   : > { %1288 = vmatprep.subr.bf16.mxu0 %v1573_v45  ;;  %v792_v50 = vpack.c.bf16 %v791_v49, %v791_v49 }
 0x26d   : > { %1299 = vmatpush3.bf16.msra.mxu1 %v1436_v52 }
 0x26e   : > { %1300 = vmatprep.subr.bf16.mxu1 %v1573_v45 }
 0x26f   : > { %1289 = vmatpush3.bf16.msra.mxu0 %v1433_v47 }
 0x270   : > { %1290 = vmatprep.subr.bf16.mxu0 %v1573_v45 }
 0x271   : > { %1301 = vmatpush3.bf16.msra.mxu1 %v1437_v53 }
 0x272   : > { %1302 = vmatprep.subr.bf16.mxu1 %v1573_v45 }
 0x273   : > { %1291 = vmatpush3.bf16.msra.mxu0 %v1434_v48 }
 0x275   : > { %1303 = vmatpush3.bf16.msra.mxu1 %v1438_v54 }
 0x276   : > { %1293 = vmatmul.mubr.msk.bf16.vlgmr.msra.gmra.mxu0 %vm832_vm3, %v792_v50  ;;  %1304 = vmatprep.subr.bf16.mxu1 %v1573_v45 }
 0x279   : > { %1305 = vmatpush3.bf16.msra.mxu1 %v1439_v55 }
 0x27a   : > { %1306 = vmatprep.subr.bf16.mxu1 %v1573_v45 }
 0x27d   : > { %1307 = vmatpush3.bf16.msra.mxu1 %v1440_v56 }
 0x27e   : > { %1308 = vmatprep.subr.bf16.mxu1 %v1573_v45 }
 0x281   : > { %1309 = vmatpush3.bf16.msra.mxu1 %v1441_v57 }
 0x282   : > { %1310 = vmatprep.subr.bf16.mxu1 %v1573_v45 }
 0x285   : > { %1311 = vmatpush3.bf16.msra.mxu1 %v1442_v58 }
 0x336   : > { %v870_v60 = vpop.f32.mrf.mxu0 }
 0x337   : > { %v871_v61 = vadd.f32 %v1232_v59, %v870_v60 }
 0x338   : > { %v1294_v62 = vpop.f32.mrf.mxu0 }
 0x339   : > { %v877_v63 = vmul.f32 0.044715, %v871_v61  ;;  %v876_v7 = vmul.f32 0.5, %v871_v61 }
 0x33a   : > { %v873_v0 = vpop.f32.mrf.mxu0 }
 0x33b   : > { %v878_v1 = vmul.f32 %v877_v63, %v871_v61 }
 0x33c   : > { %v1295_v2 = vpop.f32.mrf.mxu0 }
 0x33d   : > { %v879_v3 = vmul.f32 %v878_v1, %v871_v61 }
 0x33f   : > { %v880_v4 = vadd.f32 %v879_v3, %v871_v61 }
 0x341   : > { %v881_v5 = vmul.f32 0.7978846, %v880_v4 }
 0x343   : > { %1443 = vtanh.f32 %v881_v5 }
 0x350   : > { %v1444_v6 = vpop.eup %1443 }
 0x351   : > { %v883_v8 = vadd.f32 1.0, %v1444_v6 }
 0x353   : > { %v884_v9 = vmul.f32 %v883_v8, %v876_v7 }
 0x355   : > { %v886_v10 = vpack.c.bf16 %v884_v9, %v884_v9 }
 0x357   : > { %1313 = vmatmul.mubr.bf16.vlgmr.msra.gmra.mxu1 %v886_v10 }
 0x417   : > { %v985_v12 = vpop.f32.mrf.mxu1 }
 0x418   : > { %v991_v13 = vadd.f32 %v985_v12, %v885_v11 }
 0x419   : > { %v1314_v14 = vpop.f32.mrf.mxu1  ;;  %996 = sbr.rel (%p1246_p10) target bundleno = 1065 (0x429), region = 117 }
 0x41a   : > { %992 = vst.msk [vmem:[#allocation4] sm:$0xff] %vm832_vm3, %v991_v13 }
 0x41b   : > { %v988_v15 = vpop.f32.mrf.mxu1 }
 0x41d   : > { %v1315_v16 = vpop.f32.mrf.mxu1 }
 0x41e   : > { %v1248_v18 = vld [vmem:[%s2010_s27] ss:$0 sm:$0xff] }
 0x41f   : > { %v1247_v19 = vld [vmem:[%s2011_s18] ss:$0 sm:$0xff] }
 0x420   : > { %v997_v21 = vld [vmem:[#allocation2] sm:$0xff] }
 0x421   : > { %v999_v17 = vld [vmem:[#allocation4] sm:$0xff] }
 0x422   : > { %v1007_v20 = vadd.f32 %v1247_v19, %v999_v17 }
 0x424   : > { %v1014_v22 = vmul.f32 %v1248_v18, %v1007_v20 }
 0x426   : > { %v1015_v23 = vadd.f32 %v1014_v22, %v997_v21 }
 0x428   : > { %1016 = vst.msk [vmem:[%s620_s10] sm:$0xff] %vm832_vm3, %v1015_v23 }
 0x429 PF: > { %s2012_s26 = sld [smem:[#allocation13_spill]]  ;;  %s1317_s16 = smul.u32 3, %s1553_s28 }
 0x42a   : > { %s2013_s6 = sld [smem:[#allocation10_spill]]  ;;  %s1033_s22 = sshll.u32 %s620_s10, 4  ;;  %s1034_s22 = int_to_ptr.vmem [resolvable:$true] %s1033_s22 }
 0x42b   : > { %s2015_s7 = sld [smem:[#allocation31_spill]]  ;;  %s1445_s14 = scalar_lea.vmem %s1034_s22, 128 }
 0x42c   : > { %p1446_p11 = scmp.ne.s32.totalorder %s1034_s22, %s1445_s14  ;;  %s1575_s29 = smov [#allocation6]  }
 0x42d   : > { %s1449_s30 = sshll.u32 %s1575_s29, 4  ;;  %s1450_s30 = int_to_ptr.vmem [resolvable:$false] %s1449_s30 }
 0x42e   : > { %p1447_p12 = pnand %p1446_p11, %p1731_p9  ;;  %s1451_s28 = scalar_lea.vmem %s1450_s30, 256 }
 0x42f   : > { %s1029_s20 = sadd.s32 %s2012_s26, %s1317_s16  ;;  %p1452_p1 = scmp.lt.s32.totalorder %s1034_s22, %s1450_s30 }
 0x430   : > { %s1250_s8 = sshll.u32 %s1029_s20, 7  ;;  %s2016_s13 = sand.u32 1, %s2013_s6  }
 0x431   : > { %s1031_s15 = scalar_lea.hbm %s2015_s7, %s1250_s8  ;;  %s1018_s25 = scalar_lea.sflag [#allocation7], %s2016_s13 }
 0x432   : > { %p1448_p0 = pneg %p1447_p12  ;;  %p1453_p2 = scmp.lt.s32.totalorder %s1451_s28, %s1445_s14 }
 0x434   : > { %p1454_p3 = por %p1453_p2, %p1452_p1 }
 0x436   : > { %p1455_p4 = pnand %p1454_p3, %p1448_p0 }
 0x438   : > { %1458 = shalt.err (!%p1455_p4)
}
 0x439   : > { %s1459_s19 = scalar_lea.hbm %s1031_s15, 128  ;;  %s1463_s27 = scalar_lea.hbm %s2015_s7, 768 }
 0x43a   : > { %p1460_p5 = scmp.ne.s32.totalorder %s1031_s15, %s1459_s19  ;;  %p1464_p8 = scmp.lt.s32.totalorder %s1031_s15, %s2015_s7 }
 0x43b   : > { %p1465_p10 = scmp.lt.s32.totalorder %s1463_s27, %s1459_s19 }
 0x43c   : > { %p1461_p6 = pnand %p1460_p5, %p1731_p9 }
 0x43d   : > { %p1466_p11 = por %p1465_p10, %p1464_p8 }
 0x43e   : > { %p1462_p7 = pneg %p1461_p6 }
 0x440   : > { %p1467_p12 = pnand %p1466_p11, %p1462_p7 }
 0x442   : > { %1470 = shalt.err (!%p1467_p12)
}
 0x443   : > { %1318 = dma.vmem_to_hbm [thread:$0]  (%p1731_p9), %s1034_s22, 128, %s1031_s15, %s1018_s25  }
 0x444 PF: > { %s2017_s18 = sld [smem:[#allocation17_spill]] }
 0x445   : > { %s2018_s26 = sld [smem:[#allocation9_spill]] }
 0x44a   : > { %p1324_p0 = scmp.ge.s32.totalorder %s2017_s18, 2 }
 0x44b   : > { %s1045_s16 = sand.u32 1, %s2018_s26  }
 0x44c   : > { %p1321_p1 = pnand %p1324_p0, %p1740_p13  ;;  %s1046_s20 = scalar_lea.sflag [#allocation7], %s1045_s16 }
 0x44e   : > { %p1322_p2 = pneg %p1321_p1 }
 0x450   : > { %1520 = dma.done.wait (%p1322_p2), %s1046_s20, 128  }
 0x451   : > { %1522 = vsyncadd (%p1322_p2), %s1046_s20, 4294967168  ;;  %s25_s14 = sadd.s32 1, %s2017_s18   ;;  %s2020_s21 = sld [smem:[#allocation10_spill]] }
 0x452   : > { %p22_p3 = scmp.ge.s32.totalorder %s25_s14, 14   ;;  %s2021_s22 = sld [smem:[#allocation11_spill]] }
 0x453   : > { %s2022_s23 = sld [smem:[#allocation24_spill]] }
 0x454   : > { %s2023_s24 = sld [smem:[#allocation12_spill]] }
 0x455   : > { %s2024_s25 = sld [smem:[#allocation20_spill]] }
 0x456   : > { %s2025_s26 = sld [smem:[#allocation14_spill]] }
 0x457   : > { %s2026_s27 = sld [smem:[#allocation15_spill]]  ;;  %24 = sbr.rel (!%p22_p3) target bundleno = 15 (0xf), region = 181 }
 0x458   : > { %s2027_s28 = sld [smem:[#allocation16_spill]] }
 0x459   : > { %s2028_s29 = sld [smem:[#allocation18_spill]] }
 0x45a   : > { %s2029_s30 = sld [smem:[#allocation19_spill]] }
 0x45b   : > { %s2030_s13 = sld [smem:[#allocation21_spill]] }
 0x45c   :  { %1051 = vsyncpa [#allocation7], 1 }
 0x45d   :  { %1053 = vsyncpa [#allocation7 + $0x1], 1 }

</bundles_post_ra>
